<compile_context>
chip_gen: v7x
topology: tpu7x:2x2x1
jax: 0.10.0
libtpu: 0.0.40
codegen_flags: <defaults>
</compile_context>

<pallas_src>
import jax
import jax.numpy as jnp
from jax import lax
from jax.experimental import pallas as pl
from jax.experimental.pallas import tpu as pltpu

EPS = 1e-5


def _round_up(x, m):
    return (x + m - 1) // m * m


def _down_kernel(xr_ref, w1_ref, b1_ref, g1_ref, be1_ref,
                 w2_ref, b2_ref, g2_ref, be2_ref,
                 out_ref, pad_ref):
    """Whole Down block (everything VMEM-resident at these shapes).

    xr_ref : (N, H2, W2, 4*Cin_p)  -- 4 max-pool taps packed along channels
    w1_ref : (9*Cin_p,  Cmid_p)    bf16, im2col layout (row = k*Cin_p + ci)
    w2_ref : (9*Cmid_p, Cout_p)    bf16
    b*/g*/be* : (1, C_p)           f32 bias / BN gamma / BN beta (zero-padded)
    out_ref: (N*H2*W2, Cout_p)     f32, lane-dense
    pad_ref: (N, H2+2, W2+2, Cmax) f32 shared zero-padded conv-input scratch
    """
    N, H2, W2, C4 = xr_ref.shape
    Cin = C4 // 4                      # padded input channels
    Cmid = w2_ref.shape[0] // 9        # padded mid channels
    M = N * H2 * W2
    Cmax = pad_ref.shape[-1]

    # ---- zero only the 1-pixel halo of the shared padded scratch ----
    zrow = jnp.zeros((N, 1, W2 + 2, Cmax), jnp.float32)
    zcol = jnp.zeros((N, H2, 1, Cmax), jnp.float32)
    pad_ref[:, 0:1, :, :] = zrow
    pad_ref[:, H2 + 1:H2 + 2, :, :] = zrow
    pad_ref[:, 1:H2 + 1, 0:1, :] = zcol
    pad_ref[:, 1:H2 + 1, W2 + 1:W2 + 2, :] = zcol

    # ---- MaxPool2d(2): max over the 4 packed taps (128-aligned lane slices) ----
    x = xr_ref[...]
    pooled = jnp.maximum(
        jnp.maximum(x[..., 0 * Cin:1 * Cin], x[..., 1 * Cin:2 * Cin]),
        jnp.maximum(x[..., 2 * Cin:3 * Cin], x[..., 3 * Cin:4 * Cin]))

    def conv3x3(inp, w_ref, b_ref):
        c = inp.shape[-1]                       # multiple of 128
        # write the interior exactly once (halo already zero)
        pad_ref[:, 1:H2 + 1, 1:W2 + 1, 0:c] = inp
        # im2col: 9 shifted windows concatenated along the channel axis
        taps = [pad_ref[:, dy:dy + H2, dx:dx + W2, 0:c]
                for dy in range(3) for dx in range(3)]
        patch = jnp.concatenate(taps, axis=-1).reshape(M, 9 * c)
        # single MXU matmul: bf16 operands, f32 accumulation
        z = jnp.dot(patch.astype(jnp.bfloat16), w_ref[...],
                    preferred_element_type=jnp.float32)
        return z + b_ref[...]

    def bn_relu(z, g_ref, be_ref):
        # training-mode BatchNorm: batch mean + biased variance over (N,H,W)
        mean = jnp.mean(z, axis=0, keepdims=True)
        var = jnp.mean((z - mean) * (z - mean), axis=0, keepdims=True)
        y = (z - mean) * lax.rsqrt(var + EPS)
        return jnp.maximum(y * g_ref[...] + be_ref[...], 0.0)

    # ---- conv1 -> BN -> ReLU ----
    y1 = bn_relu(conv3x3(pooled, w1_ref, b1_ref), g1_ref, be1_ref)
    # ---- conv2 -> BN -> ReLU ----
    y2 = bn_relu(conv3x3(y1.reshape(N, H2, W2, Cmid), w2_ref, b2_ref),
                 g2_ref, be2_ref)
    out_ref[...] = y2


def down_pallas(x_nchw, params):
    """Down.forward: NCHW in, NCHW out (out_channels, H/2, W/2)."""
    w1, b1, g1, be1, w2, b2, g2, be2 = params
    N, Cin, H, W = x_nchw.shape
    H2, W2 = H // 2, W // 2
    Cmid, Cout = w1.shape[-1], w2.shape[-1]

    # lane-dense channel padding (multiples of 128)
    Cin_p = _round_up(Cin, 128)
    Cmid_p = _round_up(Cmid, 128)
    Cout_p = _round_up(Cout, 128)

    # NCHW -> NHWC, zero-pad input channels, pack the 2x2 pooling taps into
    # channels so the kernel sees (N, H2, W2, 4*Cin_p).
    x = jnp.transpose(x_nchw, (0, 2, 3, 1)).astype(jnp.float32)
    x = jnp.pad(x, ((0, 0), (0, 0), (0, 0), (0, Cin_p - Cin)))
    xr = (x.reshape(N, H2, 2, W2, 2, Cin_p)
           .transpose(0, 1, 3, 2, 4, 5)
           .reshape(N, H2, W2, 4 * Cin_p))

    # im2col weights, zero-padded channels, bf16 operands for the MXU.
    w1_p = jnp.pad(w1, ((0, 0), (0, Cin_p - Cin), (0, Cmid_p - Cmid)))
    w1_p = w1_p.reshape(9 * Cin_p, Cmid_p).astype(jnp.bfloat16)
    w2_p = jnp.pad(w2, ((0, 0), (0, Cmid_p - Cmid), (0, Cout_p - Cout)))
    w2_p = w2_p.reshape(9 * Cmid_p, Cout_p).astype(jnp.bfloat16)

    def pad_vec(v, cp):
        v = v.astype(jnp.float32)
        return jnp.pad(v, ((0, 0), (0, cp - v.shape[-1])))

    b1_p, g1_p, be1_p = (pad_vec(b1, Cmid_p), pad_vec(g1, Cmid_p),
                         pad_vec(be1, Cmid_p))
    b2_p, g2_p, be2_p = (pad_vec(b2, Cout_p), pad_vec(g2, Cout_p),
                         pad_vec(be2, Cout_p))

    Cmax = max(Cin_p, Cmid_p)
    vmem = pl.BlockSpec(memory_space=pltpu.MemorySpace.VMEM)
    out_flat = pl.pallas_call(
        _down_kernel,
        out_shape=jax.ShapeDtypeStruct((N * H2 * W2, Cout_p), jnp.float32),
        in_specs=[vmem] * 9,
        out_specs=vmem,
        scratch_shapes=[
            # single shared padded-conv-input slab (reused by both convs)
            pltpu.VMEM((N, H2 + 2, W2 + 2, Cmax), jnp.float32),
        ],
        compiler_params=pltpu.CompilerParams(
            vmem_limit_bytes=48 * 1024 * 1024),
    )(xr, w1_p, b1_p, g1_p, be1_p, w2_p, b2_p, g2_p, be2_p)

    # (N*H2*W2, Cout_p) -> slice off channel padding -> NCHW
    out = out_flat[:, :Cout].reshape(N, H2, W2, Cout)
    return out.transpose(0, 3, 1, 2)


# ----------------------------- pure-JAX reference -----------------------------
def _ref_conv_bn_relu(x_nchw, w_kco, b, g, be):
    cin, cout = w_kco.shape[1], w_kco.shape[2]
    w_oihw = w_kco.reshape(3, 3, cin, cout).transpose(3, 2, 0, 1)
    z = lax.conv_general_dilated(
        x_nchw, w_oihw, window_strides=(1, 1), padding="SAME",
        dimension_numbers=("NCHW", "OIHW", "NCHW"),
        precision=lax.Precision.HIGHEST)
    z = z + b.reshape(1, cout, 1, 1)
    mean = jnp.mean(z, axis=(0, 2, 3), keepdims=True)
    var = jnp.mean((z - mean) ** 2, axis=(0, 2, 3), keepdims=True)
    y = (z - mean) * lax.rsqrt(var + EPS)
    y = y * g.reshape(1, cout, 1, 1) + be.reshape(1, cout, 1, 1)
    return jnp.maximum(y, 0.0)


def down_reference(x_nchw, params):
    w1, b1, g1, be1, w2, b2, g2, be2 = params
    N, C, H, W = x_nchw.shape
    xp = x_nchw.reshape(N, C, H // 2, 2, W // 2, 2).max(axis=(3, 5))
    y = _ref_conv_bn_relu(xp, w1, b1[0], g1[0], be1[0])
    y = _ref_conv_bn_relu(y, w2, b2[0], g2[0], be2[0])
    return y


# ---------------------------------- main ----------------------------------
if __name__ == "__main__":
    key = jax.random.PRNGKey(0)
    ks = jax.random.split(key, 8)

    N, Cin, H, W = 2, 4, 16, 16
    Cout = 8  # out_channels of Down; DoubleConv uses Cout for both convs

    x = jax.random.normal(ks[0], (N, Cin, H, W), jnp.float32)

    # Deterministic synthetic parameters (shapes follow Conv2d/BatchNorm2d init)
    w1 = jax.random.normal(ks[1], (9, Cin, Cout), jnp.float32) * 0.1
    b1 = jax.random.normal(ks[2], (1, Cout), jnp.float32) * 0.05
    g1 = jnp.ones((1, Cout), jnp.float32)
    be1 = jnp.zeros((1, Cout), jnp.float32)

    w2 = jax.random.normal(ks[3], (9, Cout, Cout), jnp.float32) * 0.1
    b2 = jax.random.normal(ks[4], (1, Cout), jnp.float32) * 0.05
    g2 = jnp.ones((1, Cout), jnp.float32)
    be2 = jnp.zeros((1, Cout), jnp.float32)

    params = (w1, b1, g1, be1, w2, b2, g2, be2)

    out = down_pallas(x, params)
    out = jax.block_until_ready(out)
    assert out.shape == (N, Cout, H // 2, W // 2), out.shape

    ref = jax.block_until_ready(down_reference(x, params))
    assert jnp.allclose(out, ref, atol=5e-2, rtol=5e-2), (
        float(jnp.max(jnp.abs(out - ref))))

    print("KERNEL_OK")
</pallas_src>

<mosaic_0001>
module attributes {stable_mosaic.version = 11 : i64} {
  func.func @_down_kernel(%arg0: memref<2x8x8x512xf32, #tpu.memory_space<vmem>>, %arg1: memref<1152x128xbf16, #tpu.memory_space<vmem>>, %arg2: memref<1x128xf32, #tpu.memory_space<vmem>>, %arg3: memref<1x128xf32, #tpu.memory_space<vmem>>, %arg4: memref<1x128xf32, #tpu.memory_space<vmem>>, %arg5: memref<1152x128xbf16, #tpu.memory_space<vmem>>, %arg6: memref<1x128xf32, #tpu.memory_space<vmem>>, %arg7: memref<1x128xf32, #tpu.memory_space<vmem>>, %arg8: memref<1x128xf32, #tpu.memory_space<vmem>>, %arg9: memref<128x128xf32, #tpu.memory_space<vmem>>, %arg10: memref<2x10x10x128xf32, #tpu.memory_space<vmem>>) attributes {dimension_semantics = [], scalar_prefetch = 0 : i64, scratch_operands = 1 : i64, tpu.core_type = #tpu.core_type<tc>} {
    %cst = arith.constant 0.000000e+00 : f32
    %0 = vector.broadcast %cst : f32 to vector<2x1x10x128xf32>
    %cst_0 = arith.constant 0.000000e+00 : f32
    %1 = vector.broadcast %cst_0 : f32 to vector<2x8x1x128xf32>
    %c0 = arith.constant 0 : index
    %c0_1 = arith.constant 0 : index
    %c0_2 = arith.constant 0 : index
    %c0_3 = arith.constant 0 : index
    %2 = vector.load %arg10[%c0, %c0_1, %c0_2, %c0_3] : memref<2x10x10x128xf32, #tpu.memory_space<vmem>>, vector<2x1x10x128xf32>
    tpu.vector_store %arg10[%c0, %c0_1, %c0_2, %c0_3], %0 {strides = array<i32>} : memref<2x10x10x128xf32, #tpu.memory_space<vmem>>, vector<2x1x10x128xf32>,
    %c0_4 = arith.constant 0 : index
    %c9 = arith.constant 9 : index
    %c0_5 = arith.constant 0 : index
    %c0_6 = arith.constant 0 : index
    %3 = vector.load %arg10[%c0_4, %c9, %c0_5, %c0_6] : memref<2x10x10x128xf32, #tpu.memory_space<vmem>>, vector<2x1x10x128xf32>
    tpu.vector_store %arg10[%c0_4, %c9, %c0_5, %c0_6], %0 {strides = array<i32>} : memref<2x10x10x128xf32, #tpu.memory_space<vmem>>, vector<2x1x10x128xf32>,
    %c0_7 = arith.constant 0 : index
    %c1 = arith.constant 1 : index
    %c0_8 = arith.constant 0 : index
    %c0_9 = arith.constant 0 : index
    %4 = vector.load %arg10[%c0_7, %c1, %c0_8, %c0_9] : memref<2x10x10x128xf32, #tpu.memory_space<vmem>>, vector<2x8x1x128xf32>
    tpu.vector_store %arg10[%c0_7, %c1, %c0_8, %c0_9], %1 {strides = array<i32>} : memref<2x10x10x128xf32, #tpu.memory_space<vmem>>, vector<2x8x1x128xf32>,
    %c0_10 = arith.constant 0 : index
    %c1_11 = arith.constant 1 : index
    %c9_12 = arith.constant 9 : index
    %c0_13 = arith.constant 0 : index
    %5 = vector.load %arg10[%c0_10, %c1_11, %c9_12, %c0_13] : memref<2x10x10x128xf32, #tpu.memory_space<vmem>>, vector<2x8x1x128xf32>
    tpu.vector_store %arg10[%c0_10, %c1_11, %c9_12, %c0_13], %1 {strides = array<i32>} : memref<2x10x10x128xf32, #tpu.memory_space<vmem>>, vector<2x8x1x128xf32>,
    %c0_14 = arith.constant 0 : index
    %c0_15 = arith.constant 0 : index
    %c0_16 = arith.constant 0 : index
    %c0_17 = arith.constant 0 : index
    %6 = vector.load %arg0[%c0_14, %c0_15, %c0_16, %c0_17] : memref<2x8x8x512xf32, #tpu.memory_space<vmem>>, vector<2x8x8x512xf32>
    %7 = vector.extract_strided_slice %6 {offsets = [0, 0, 0, 0], sizes = [2, 8, 8, 128], strides = [1, 1, 1, 1]} : vector<2x8x8x512xf32> to vector<2x8x8x128xf32>
    %8 = vector.extract_strided_slice %6 {offsets = [0, 0, 0, 128], sizes = [2, 8, 8, 128], strides = [1, 1, 1, 1]} : vector<2x8x8x512xf32> to vector<2x8x8x128xf32>
    %9 = arith.maximumf %7, %8 : vector<2x8x8x128xf32>
    %10 = vector.extract_strided_slice %6 {offsets = [0, 0, 0, 256], sizes = [2, 8, 8, 128], strides = [1, 1, 1, 1]} : vector<2x8x8x512xf32> to vector<2x8x8x128xf32>
    %11 = vector.extract_strided_slice %6 {offsets = [0, 0, 0, 384], sizes = [2, 8, 8, 128], strides = [1, 1, 1, 1]} : vector<2x8x8x512xf32> to vector<2x8x8x128xf32>
    %12 = arith.maximumf %10, %11 : vector<2x8x8x128xf32>
    %13 = arith.maximumf %9, %12 : vector<2x8x8x128xf32>
    %c0_18 = arith.constant 0 : index
    %c1_19 = arith.constant 1 : index
    %c1_20 = arith.constant 1 : index
    %c0_21 = arith.constant 0 : index
    %14 = vector.load %arg10[%c0_18, %c1_19, %c1_20, %c0_21] : memref<2x10x10x128xf32, #tpu.memory_space<vmem>>, vector<2x8x8x128xf32>
    tpu.vector_store %arg10[%c0_18, %c1_19, %c1_20, %c0_21], %13 {strides = array<i32>} : memref<2x10x10x128xf32, #tpu.memory_space<vmem>>, vector<2x8x8x128xf32>,
    %c0_22 = arith.constant 0 : index
    %c0_23 = arith.constant 0 : index
    %c0_24 = arith.constant 0 : index
    %c0_25 = arith.constant 0 : index
    %15 = vector.load %arg10[%c0_22, %c0_23, %c0_24, %c0_25] : memref<2x10x10x128xf32, #tpu.memory_space<vmem>>, vector<2x8x8x128xf32>
    %c0_26 = arith.constant 0 : index
    %c0_27 = arith.constant 0 : index
    %c1_28 = arith.constant 1 : index
    %c0_29 = arith.constant 0 : index
    %16 = vector.load %arg10[%c0_26, %c0_27, %c1_28, %c0_29] : memref<2x10x10x128xf32, #tpu.memory_space<vmem>>, vector<2x8x8x128xf32>
    %c0_30 = arith.constant 0 : index
    %c0_31 = arith.constant 0 : index
    %c2 = arith.constant 2 : index
    %c0_32 = arith.constant 0 : index
    %17 = vector.load %arg10[%c0_30, %c0_31, %c2, %c0_32] : memref<2x10x10x128xf32, #tpu.memory_space<vmem>>, vector<2x8x8x128xf32>
    %c0_33 = arith.constant 0 : index
    %c1_34 = arith.constant 1 : index
    %c0_35 = arith.constant 0 : index
    %c0_36 = arith.constant 0 : index
    %18 = vector.load %arg10[%c0_33, %c1_34, %c0_35, %c0_36] : memref<2x10x10x128xf32, #tpu.memory_space<vmem>>, vector<2x8x8x128xf32>
    %c0_37 = arith.constant 0 : index
    %c1_38 = arith.constant 1 : index
    %c1_39 = arith.constant 1 : index
    %c0_40 = arith.constant 0 : index
    %19 = vector.load %arg10[%c0_37, %c1_38, %c1_39, %c0_40] : memref<2x10x10x128xf32, #tpu.memory_space<vmem>>, vector<2x8x8x128xf32>
    %c0_41 = arith.constant 0 : index
    %c1_42 = arith.constant 1 : index
    %c2_43 = arith.constant 2 : index
    %c0_44 = arith.constant 0 : index
    %20 = vector.load %arg10[%c0_41, %c1_42, %c2_43, %c0_44] : memref<2x10x10x128xf32, #tpu.memory_space<vmem>>, vector<2x8x8x128xf32>
    %c0_45 = arith.constant 0 : index
    %c2_46 = arith.constant 2 : index
    %c0_47 = arith.constant 0 : index
    %c0_48 = arith.constant 0 : index
    %21 = vector.load %arg10[%c0_45, %c2_46, %c0_47, %c0_48] : memref<2x10x10x128xf32, #tpu.memory_space<vmem>>, vector<2x8x8x128xf32>
    %c0_49 = arith.constant 0 : index
    %c2_50 = arith.constant 2 : index
    %c1_51 = arith.constant 1 : index
    %c0_52 = arith.constant 0 : index
    %22 = vector.load %arg10[%c0_49, %c2_50, %c1_51, %c0_52] : memref<2x10x10x128xf32, #tpu.memory_space<vmem>>, vector<2x8x8x128xf32>
    %c0_53 = arith.constant 0 : index
    %c2_54 = arith.constant 2 : index
    %c2_55 = arith.constant 2 : index
    %c0_56 = arith.constant 0 : index
    %23 = vector.load %arg10[%c0_53, %c2_54, %c2_55, %c0_56] : memref<2x10x10x128xf32, #tpu.memory_space<vmem>>, vector<2x8x8x128xf32>
    %24 = tpu.concatenate %15, %16, %17, %18, %19, %20, %21, %22, %23 in 3 : vector<2x8x8x128xf32>, vector<2x8x8x128xf32>, vector<2x8x8x128xf32>, vector<2x8x8x128xf32>, vector<2x8x8x128xf32>, vector<2x8x8x128xf32>, vector<2x8x8x128xf32>, vector<2x8x8x128xf32>, vector<2x8x8x128xf32> -> vector<2x8x8x1152xf32>
    %25 = vector.shape_cast %24 : vector<2x8x8x1152xf32> to vector<128x1152xf32>
    %26 = arith.truncf %25 : vector<128x1152xf32> to vector<128x1152xbf16>
    %c0_57 = arith.constant 0 : index
    %c0_58 = arith.constant 0 : index
    %27 = vector.load %arg1[%c0_57, %c0_58] : memref<1152x128xbf16, #tpu.memory_space<vmem>>, vector<1152x128xbf16>
    %cst_59 = arith.constant dense<0.000000e+00> : vector<128x128xf32>
    %28 = tpu.matmul %26, %27, %cst_59 {dimension_numbers = #tpu.dot_dimension_numbers<[1], [0], [0], [1], [0, 0, 1, 1], [], []>} : vector<128x1152xbf16>, vector<1152x128xbf16>, vector<128x128xf32> -> vector<128x128xf32>
    %c0_60 = arith.constant 0 : index
    %c0_61 = arith.constant 0 : index
    %29 = vector.load %arg2[%c0_60, %c0_61] : memref<1x128xf32, #tpu.memory_space<vmem>>, vector<1x128xf32>
    %30 = vector.broadcast %29 : vector<1x128xf32> to vector<128x128xf32>
    %31 = arith.addf %28, %30 : vector<128x128xf32>
    %cst_62 = arith.constant dense<0.000000e+00> : vector<128xf32>
    %32 = vector.multi_reduction <add>, %31, %cst_62 [0] : vector<128x128xf32> to vector<128xf32>
    %33 = vector.shape_cast %32 : vector<128xf32> to vector<1x128xf32>
    %cst_63 = arith.constant 1.280000e+02 : f32
    %34 = vector.broadcast %cst_63 : f32 to vector<1x128xf32>
    %35 = arith.divf %33, %34 : vector<1x128xf32>
    %36 = vector.broadcast %35 : vector<1x128xf32> to vector<128x128xf32>
    %37 = arith.subf %31, %36 : vector<128x128xf32>
    %38 = vector.broadcast %35 : vector<1x128xf32> to vector<128x128xf32>
    %39 = arith.subf %31, %38 : vector<128x128xf32>
    %40 = arith.mulf %37, %39 : vector<128x128xf32>
    %cst_64 = arith.constant dense<0.000000e+00> : vector<128xf32>
    %41 = vector.multi_reduction <add>, %40, %cst_64 [0] : vector<128x128xf32> to vector<128xf32>
    %42 = vector.shape_cast %41 : vector<128xf32> to vector<1x128xf32>
    %cst_65 = arith.constant 1.280000e+02 : f32
    %43 = vector.broadcast %cst_65 : f32 to vector<1x128xf32>
    %44 = arith.divf %42, %43 : vector<1x128xf32>
    %45 = vector.broadcast %35 : vector<1x128xf32> to vector<128x128xf32>
    %46 = arith.subf %31, %45 : vector<128x128xf32>
    %cst_66 = arith.constant 9.99999974E-6 : f32
    %47 = vector.broadcast %cst_66 : f32 to vector<1x128xf32>
    %48 = arith.addf %44, %47 : vector<1x128xf32>
    %49 = math.rsqrt %48 : vector<1x128xf32>
    %50 = vector.broadcast %49 : vector<1x128xf32> to vector<128x128xf32>
    %51 = arith.mulf %46, %50 : vector<128x128xf32>
    %c0_67 = arith.constant 0 : index
    %c0_68 = arith.constant 0 : index
    %52 = vector.load %arg3[%c0_67, %c0_68] : memref<1x128xf32, #tpu.memory_space<vmem>>, vector<1x128xf32>
    %53 = vector.broadcast %52 : vector<1x128xf32> to vector<128x128xf32>
    %54 = arith.mulf %51, %53 : vector<128x128xf32>
    %c0_69 = arith.constant 0 : index
    %c0_70 = arith.constant 0 : index
    %55 = vector.load %arg4[%c0_69, %c0_70] : memref<1x128xf32, #tpu.memory_space<vmem>>, vector<1x128xf32>
    %56 = vector.broadcast %55 : vector<1x128xf32> to vector<128x128xf32>
    %57 = arith.addf %54, %56 : vector<128x128xf32>
    %cst_71 = arith.constant 0.000000e+00 : f32
    %58 = vector.broadcast %cst_71 : f32 to vector<128x128xf32>
    %59 = arith.maximumf %57, %58 : vector<128x128xf32>
    %60 = vector.shape_cast %59 : vector<128x128xf32> to vector<2x8x8x128xf32>
    %c0_72 = arith.constant 0 : index
    %c1_73 = arith.constant 1 : index
    %c1_74 = arith.constant 1 : index
    %c0_75 = arith.constant 0 : index
    %61 = vector.load %arg10[%c0_72, %c1_73, %c1_74, %c0_75] : memref<2x10x10x128xf32, #tpu.memory_space<vmem>>, vector<2x8x8x128xf32>
    tpu.vector_store %arg10[%c0_72, %c1_73, %c1_74, %c0_75], %60 {strides = array<i32>} : memref<2x10x10x128xf32, #tpu.memory_space<vmem>>, vector<2x8x8x128xf32>,
    %c0_76 = arith.constant 0 : index
    %c0_77 = arith.constant 0 : index
    %c0_78 = arith.constant 0 : index
    %c0_79 = arith.constant 0 : index
    %62 = vector.load %arg10[%c0_76, %c0_77, %c0_78, %c0_79] : memref<2x10x10x128xf32, #tpu.memory_space<vmem>>, vector<2x8x8x128xf32>
    %c0_80 = arith.constant 0 : index
    %c0_81 = arith.constant 0 : index
    %c1_82 = arith.constant 1 : index
    %c0_83 = arith.constant 0 : index
    %63 = vector.load %arg10[%c0_80, %c0_81, %c1_82, %c0_83] : memref<2x10x10x128xf32, #tpu.memory_space<vmem>>, vector<2x8x8x128xf32>
    %c0_84 = arith.constant 0 : index
    %c0_85 = arith.constant 0 : index
    %c2_86 = arith.constant 2 : index
    %c0_87 = arith.constant 0 : index
    %64 = vector.load %arg10[%c0_84, %c0_85, %c2_86, %c0_87] : memref<2x10x10x128xf32, #tpu.memory_space<vmem>>, vector<2x8x8x128xf32>
    %c0_88 = arith.constant 0 : index
    %c1_89 = arith.constant 1 : index
    %c0_90 = arith.constant 0 : index
    %c0_91 = arith.constant 0 : index
    %65 = vector.load %arg10[%c0_88, %c1_89, %c0_90, %c0_91] : memref<2x10x10x128xf32, #tpu.memory_space<vmem>>, vector<2x8x8x128xf32>
    %c0_92 = arith.constant 0 : index
    %c1_93 = arith.constant 1 : index
    %c1_94 = arith.constant 1 : index
    %c0_95 = arith.constant 0 : index
    %66 = vector.load %arg10[%c0_92, %c1_93, %c1_94, %c0_95] : memref<2x10x10x128xf32, #tpu.memory_space<vmem>>, vector<2x8x8x128xf32>
    %c0_96 = arith.constant 0 : index
    %c1_97 = arith.constant 1 : index
    %c2_98 = arith.constant 2 : index
    %c0_99 = arith.constant 0 : index
    %67 = vector.load %arg10[%c0_96, %c1_97, %c2_98, %c0_99] : memref<2x10x10x128xf32, #tpu.memory_space<vmem>>, vector<2x8x8x128xf32>
    %c0_100 = arith.constant 0 : index
    %c2_101 = arith.constant 2 : index
    %c0_102 = arith.constant 0 : index
    %c0_103 = arith.constant 0 : index
    %68 = vector.load %arg10[%c0_100, %c2_101, %c0_102, %c0_103] : memref<2x10x10x128xf32, #tpu.memory_space<vmem>>, vector<2x8x8x128xf32>
    %c0_104 = arith.constant 0 : index
    %c2_105 = arith.constant 2 : index
    %c1_106 = arith.constant 1 : index
    %c0_107 = arith.constant 0 : index
    %69 = vector.load %arg10[%c0_104, %c2_105, %c1_106, %c0_107] : memref<2x10x10x128xf32, #tpu.memory_space<vmem>>, vector<2x8x8x128xf32>
    %c0_108 = arith.constant 0 : index
    %c2_109 = arith.constant 2 : index
    %c2_110 = arith.constant 2 : index
    %c0_111 = arith.constant 0 : index
    %70 = vector.load %arg10[%c0_108, %c2_109, %c2_110, %c0_111] : memref<2x10x10x128xf32, #tpu.memory_space<vmem>>, vector<2x8x8x128xf32>
    %71 = tpu.concatenate %62, %63, %64, %65, %66, %67, %68, %69, %70 in 3 : vector<2x8x8x128xf32>, vector<2x8x8x128xf32>, vector<2x8x8x128xf32>, vector<2x8x8x128xf32>, vector<2x8x8x128xf32>, vector<2x8x8x128xf32>, vector<2x8x8x128xf32>, vector<2x8x8x128xf32>, vector<2x8x8x128xf32> -> vector<2x8x8x1152xf32>
    %72 = vector.shape_cast %71 : vector<2x8x8x1152xf32> to vector<128x1152xf32>
    %73 = arith.truncf %72 : vector<128x1152xf32> to vector<128x1152xbf16>
    %c0_112 = arith.constant 0 : index
    %c0_113 = arith.constant 0 : index
    %74 = vector.load %arg5[%c0_112, %c0_113] : memref<1152x128xbf16, #tpu.memory_space<vmem>>, vector<1152x128xbf16>
    %cst_114 = arith.constant dense<0.000000e+00> : vector<128x128xf32>
    %75 = tpu.matmul %73, %74, %cst_114 {dimension_numbers = #tpu.dot_dimension_numbers<[1], [0], [0], [1], [0, 0, 1, 1], [], []>} : vector<128x1152xbf16>, vector<1152x128xbf16>, vector<128x128xf32> -> vector<128x128xf32>
    %c0_115 = arith.constant 0 : index
    %c0_116 = arith.constant 0 : index
    %76 = vector.load %arg6[%c0_115, %c0_116] : memref<1x128xf32, #tpu.memory_space<vmem>>, vector<1x128xf32>
    %77 = vector.broadcast %76 : vector<1x128xf32> to vector<128x128xf32>
    %78 = arith.addf %75, %77 : vector<128x128xf32>
    %cst_117 = arith.constant dense<0.000000e+00> : vector<128xf32>
    %79 = vector.multi_reduction <add>, %78, %cst_117 [0] : vector<128x128xf32> to vector<128xf32>
    %80 = vector.shape_cast %79 : vector<128xf32> to vector<1x128xf32>
    %cst_118 = arith.constant 1.280000e+02 : f32
    %81 = vector.broadcast %cst_118 : f32 to vector<1x128xf32>
    %82 = arith.divf %80, %81 : vector<1x128xf32>
    %83 = vector.broadcast %82 : vector<1x128xf32> to vector<128x128xf32>
    %84 = arith.subf %78, %83 : vector<128x128xf32>
    %85 = vector.broadcast %82 : vector<1x128xf32> to vector<128x128xf32>
    %86 = arith.subf %78, %85 : vector<128x128xf32>
    %87 = arith.mulf %84, %86 : vector<128x128xf32>
    %cst_119 = arith.constant dense<0.000000e+00> : vector<128xf32>
    %88 = vector.multi_reduction <add>, %87, %cst_119 [0] : vector<128x128xf32> to vector<128xf32>
    %89 = vector.shape_cast %88 : vector<128xf32> to vector<1x128xf32>
    %cst_120 = arith.constant 1.280000e+02 : f32
    %90 = vector.broadcast %cst_120 : f32 to vector<1x128xf32>
    %91 = arith.divf %89, %90 : vector<1x128xf32>
    %92 = vector.broadcast %82 : vector<1x128xf32> to vector<128x128xf32>
    %93 = arith.subf %78, %92 : vector<128x128xf32>
    %cst_121 = arith.constant 9.99999974E-6 : f32
    %94 = vector.broadcast %cst_121 : f32 to vector<1x128xf32>
    %95 = arith.addf %91, %94 : vector<1x128xf32>
    %96 = math.rsqrt %95 : vector<1x128xf32>
    %97 = vector.broadcast %96 : vector<1x128xf32> to vector<128x128xf32>
    %98 = arith.mulf %93, %97 : vector<128x128xf32>
    %c0_122 = arith.constant 0 : index
    %c0_123 = arith.constant 0 : index
    %99 = vector.load %arg7[%c0_122, %c0_123] : memref<1x128xf32, #tpu.memory_space<vmem>>, vector<1x128xf32>
    %100 = vector.broadcast %99 : vector<1x128xf32> to vector<128x128xf32>
    %101 = arith.mulf %98, %100 : vector<128x128xf32>
    %c0_124 = arith.constant 0 : index
    %c0_125 = arith.constant 0 : index
    %102 = vector.load %arg8[%c0_124, %c0_125] : memref<1x128xf32, #tpu.memory_space<vmem>>, vector<1x128xf32>
    %103 = vector.broadcast %102 : vector<1x128xf32> to vector<128x128xf32>
    %104 = arith.addf %101, %103 : vector<128x128xf32>
    %cst_126 = arith.constant 0.000000e+00 : f32
    %105 = vector.broadcast %cst_126 : f32 to vector<128x128xf32>
    %106 = arith.maximumf %104, %105 : vector<128x128xf32>
    %c0_127 = arith.constant 0 : index
    %c0_128 = arith.constant 0 : index
    %107 = vector.load %arg9[%c0_127, %c0_128] : memref<128x128xf32, #tpu.memory_space<vmem>>, vector<128x128xf32>
    tpu.vector_store %arg9[%c0_127, %c0_128], %106 {strides = array<i32>} : memref<128x128xf32, #tpu.memory_space<vmem>>, vector<128x128xf32>,
    return
  }
}

</mosaic_0001>

<bundles_post_ra>
// kernel: tpu_custom_call.1
= control target key start
LH: loop header
LB: loop body
LE: loop exit
PB: predicated region body
PF: predicated region fallthrough
CT: control target
= control target key end

     0   :  { %14 = vsyncpa [#allocation4], 0  ;;  %s5054_s0 = inlined_call_operand.hbm [shape: f32[2,8,8,512], index: 0, kind: input, shape index: {}]   ;;  %s5055_s1 = inlined_call_operand.hbm [shape: bf16[1152,128], index: 1, kind: input, shape index: {}]   ;;  %s5056_s2 = inlined_call_operand.vmem [shape: f32[1,128], index: 2, kind: input, shape index: {}]   ;;  %s5057_s3 = inlined_call_operand.vmem [shape: f32[1,128], index: 3, kind: input, shape index: {}]   ;;  %s5058_s4 = inlined_call_operand.vmem [shape: f32[1,128], index: 4, kind: input, shape index: {}]   ;;  %s5059_s5 = inlined_call_operand.hbm [shape: bf16[1152,128], index: 5, kind: input, shape index: {}]   ;;  %s5060_s6 = inlined_call_operand.vmem [shape: f32[1,128], index: 6, kind: input, shape index: {}]   ;;  %s5061_s7 = inlined_call_operand.vmem [shape: f32[1,128], index: 7, kind: input, shape index: {}]   ;;  %s5062_s8 = inlined_call_operand.vmem [shape: f32[1,128], index: 8, kind: input, shape index: {}]   ;;  %s5063_s9 = inlined_call_operand.hbm [shape: f32[128,128], index: 9, kind: output, shape index: {}]  }
   0x1   :  { %15 = vsyncpa [#allocation7], 0 }
   0x2   :  { %16 = vsyncpa [#allocation5], 0  ;;  %s4190_s30 = smov [#allocation6]   ;;  %s4096_s13 = scalar_lea.hbm %s5055_s1, 9216 }
   0x3   :  { %s34_s10 = sshll.u32 %s4190_s30, 4  ;;  %p4097_p0 = scmp.ne.s32.totalorder %s5055_s1, %s4096_s13  ;;  %s35_s10 = int_to_ptr.vmem [resolvable:$true] %s34_s10 }
   0x4   :  { %p4100_p1 = scmp.lt.u32.totalorder %s4096_s13, %s5055_s1 }
   0x6   :  { %p4102_p2 = pnand %p4100_p1, %p4097_p0 }
   0x8   :  { %4105 = shalt.err (!%p4102_p2)
}
   0x9   :  { %s4106_s18 = scalar_lea.vmem %s35_s10, 9216  ;;  %p4111_p4 = scmp.lt.s32.totalorder %s35_s10, %s35_s10 }
   0xa   :  { %p4107_p3 = scmp.ne.s32.totalorder %s35_s10, %s4106_s18  ;;  %p4112_p5 = scmp.lt.s32.totalorder %s4106_s18, %s4106_s18 }
   0xc   :  { %p4113_p6 = por %p4112_p5, %p4111_p4 }
   0xe   :  { %p4114_p7 = pnand %p4113_p6, %p4107_p3 }
  0x10   :  { %4117 = shalt.err (!%p4114_p7)
}
  0x11   :  { %s4191_s19 = smov 64   ;;  %s4192_s20 = smov 4  }
  0x12   :  { %40 = dma.hbm_to_vmem [thread:$0]  %s5055_s1, 9216, %s35_s10, [#allocation7], %s4191_s19, %s4191_s19, %s4192_s20  }
  0x13   :  { %s4193_s23 = smov [#allocation3]   ;;  %s4118_s27 = scalar_lea.hbm %s5054_s0, 8192 }
  0x14   :  { %s22_s24 = sshll.u32 %s4193_s23, 4  ;;  %p4119_p8 = scmp.ne.s32.totalorder %s5054_s0, %s4118_s27  ;;  %s23_s24 = int_to_ptr.vmem [resolvable:$true] %s22_s24 }
  0x15   :  { %p4122_p9 = scmp.lt.u32.totalorder %s4118_s27, %s5054_s0 }
  0x17   :  { %p4124_p10 = pnand %p4122_p9, %p4119_p8 }
  0x19   :  { %4127 = shalt.err (!%p4124_p10)
}
  0x1a   :  { %s4128_s12 = scalar_lea.vmem %s23_s24, 8192  ;;  %p4133_p12 = scmp.lt.s32.totalorder %s23_s24, %s23_s24 }
  0x1b   :  { %p4129_p11 = scmp.ne.s32.totalorder %s23_s24, %s4128_s12  ;;  %p4134_p13 = scmp.lt.s32.totalorder %s4128_s12, %s4128_s12 }
  0x1d   :  { %p4135_p0 = por %p4134_p13, %p4133_p12 }
  0x1f   :  { %p4136_p1 = pnand %p4135_p0, %p4129_p11 }
  0x21   :  { %4139 = shalt.err (!%p4136_p1)
}
  0x22   :  { %s4194_s1 = smov 512   ;;  %s4195_s10 = smov 32  }
  0x23   :  { %28 = dma.hbm_to_vmem [thread:$0]  %s5054_s0, 8192, %s23_s24, [#allocation4], %s4194_s1, %s4194_s1, %s4195_s10  }
  0x24   :  { %s4196_s15 = smov [#allocation8]   ;;  %s4140_s21 = scalar_lea.hbm %s5059_s5, 9216 }
  0x25   :  { %s52_s16 = sshll.u32 %s4196_s15, 4  ;;  %p4141_p2 = scmp.ne.s32.totalorder %s5059_s5, %s4140_s21  ;;  %s53_s16 = int_to_ptr.vmem [resolvable:$true] %s52_s16 }
  0x26   :  { %p4144_p3 = scmp.lt.u32.totalorder %s4140_s21, %s5059_s5 }
  0x28   :  { %p4146_p4 = pnand %p4144_p3, %p4141_p2 }
  0x2a   :  { %4149 = shalt.err (!%p4146_p4)
}
  0x2b   :  { %s4150_s27 = scalar_lea.vmem %s53_s16, 9216  ;;  %p4155_p6 = scmp.lt.s32.totalorder %s53_s16, %s53_s16 }
  0x2c   :  { %p4151_p5 = scmp.ne.s32.totalorder %s53_s16, %s4150_s27  ;;  %p4156_p7 = scmp.lt.s32.totalorder %s4150_s27, %s4150_s27 }
  0x2e   :  { %p4157_p8 = por %p4156_p7, %p4155_p6 }
  0x30   :  { %p4158_p9 = pnand %p4157_p8, %p4151_p5 }
  0x32   :  { %4161 = shalt.err (!%p4158_p9)
}
  0x33   :  { %58 = dma.hbm_to_vmem [thread:$0]  %s5059_s5, 9216, %s53_s16, [#allocation7], %s4191_s19, %s4191_s19, %s4192_s20  }
  0x34   :  { %4184 = dma.done.wait [#allocation4], 8192  }
  0x35   :  { %4185 = vsyncadd [#allocation4], 4294959104 }
  0x36   :  { %4186 = dma.done.wait [#allocation7], 18432  }
  0x37   :  { %4187 = vsyncadd [#allocation7], 4294948864  ;;  %v4197_v0 = vmov 0.0   ;;  %v3946_v1 = vld [vmem:[#allocation6 + $0x40] sm:$0xff]   ;;  %v3950_v5 = vld [vmem:[#allocation6 + $0x48] sm:$0xff]  }
  0x38   :  { %75 = vst [vmem:[#allocation2] sm:$0xff] %v4197_v0  ;;  %76 = vst [vmem:[#allocation2 + $0x8] sm:$0x3] %v4197_v0  ;;  %v3947_v2 = vld [vmem:[#allocation6] sm:$0xff]   ;;  %3327 = vmatprep.subr.bf16.mxu0 %v3946_v1  ;;  %v3951_v6 = vld [vmem:[#allocation6 + $0x8] sm:$0xff]  }
  0x39   :  { %77 = vst [vmem:[#allocation2 + $0xa0] sm:$0xff] %v4197_v0  ;;  %78 = vst [vmem:[#allocation2 + $0xa8] sm:$0x3] %v4197_v0  ;;  %v3948_v3 = vld [vmem:[#allocation6 + $0xc0] sm:$0xff]   ;;  %3328 = vmatpush3.bf16.msra.mxu0 %v3947_v2  ;;  %v3952_v7 = vld [vmem:[#allocation6 + $0xc8] sm:$0xff]  }
  0x3a   :  { %80 = vst [vmem:[#allocation2 + $0x90] sm:$0xff] %v4197_v0  ;;  %81 = vst [vmem:[#allocation2 + $0x98] sm:$0x3] %v4197_v0  ;;  %v3949_v4 = vld [vmem:[#allocation6 + $0x80] sm:$0xff]   ;;  %3391 = vmatprep.subr.bf16.mxu1 %v3948_v3  ;;  %3329 = vmatprep.subr.bf16.mxu0 %v3950_v5  ;;  %v3953_v8 = vld [vmem:[#allocation6 + $0x88] sm:$0xff]  }
  0x3b   :  { %82 = vst [vmem:[#allocation2 + $0x130] sm:$0xff] %v4197_v0  ;;  %83 = vst [vmem:[#allocation2 + $0x138] sm:$0x3] %v4197_v0  ;;  %3392 = vmatpush3.bf16.msra.mxu1 %v3949_v4  ;;  %v3954_v9 = vld [vmem:[#allocation6 + $0x50] sm:$0xff]   ;;  %v3958_v13 = vld [vmem:[#allocation6 + $0x58] sm:$0xff]  }
  0x3c   :  { %85 = vst [vmem:[#allocation2 + $0x10] sm:$0x1] %v4197_v0  ;;  %86 = vst [vmem:[#allocation2 + $0x20] sm:$0x1] %v4197_v0  ;;  %3393 = vmatprep.subr.bf16.mxu1 %v3952_v7  ;;  %v3955_v10 = vld [vmem:[#allocation6 + $0x10] sm:$0xff]   ;;  %v3959_v14 = vld [vmem:[#allocation6 + $0x18] sm:$0xff]  }
  0x3d   :  { %87 = vst [vmem:[#allocation2 + $0x30] sm:$0x1] %v4197_v0  ;;  %88 = vst [vmem:[#allocation2 + $0x40] sm:$0x1] %v4197_v0  ;;  %3330 = vmatpush3.bf16.msra.mxu0 %v3951_v6  ;;  %v3956_v11 = vld [vmem:[#allocation6 + $0xd0] sm:$0xff]   ;;  %v3960_v15 = vld [vmem:[#allocation6 + $0xd8] sm:$0xff]  }
  0x3e   :  { %89 = vst [vmem:[#allocation2 + $0x50] sm:$0x1] %v4197_v0  ;;  %90 = vst [vmem:[#allocation2 + $0x60] sm:$0x1] %v4197_v0  ;;  %3331 = vmatprep.subr.bf16.mxu0 %v3954_v9  ;;  %v3957_v12 = vld [vmem:[#allocation6 + $0x90] sm:$0xff]   ;;  %v3961_v16 = vld [vmem:[#allocation6 + $0x98] sm:$0xff]  }
  0x3f   :  { %91 = vst [vmem:[#allocation2 + $0x70] sm:$0x1] %v4197_v0  ;;  %92 = vst [vmem:[#allocation2 + $0x80] sm:$0x1] %v4197_v0  ;;  %3394 = vmatpush3.bf16.msra.mxu1 %v3953_v8  ;;  %v3962_v17 = vld [vmem:[#allocation6 + $0x60] sm:$0xff]   ;;  %v3966_v21 = vld [vmem:[#allocation6 + $0x68] sm:$0xff]  }
  0x40   :  { %93 = vst [vmem:[#allocation2 + $0xb0] sm:$0x1] %v4197_v0  ;;  %94 = vst [vmem:[#allocation2 + $0xc0] sm:$0x1] %v4197_v0  ;;  %3395 = vmatprep.subr.bf16.mxu1 %v3956_v11  ;;  %v3963_v18 = vld [vmem:[#allocation6 + $0x20] sm:$0xff]   ;;  %v3967_v22 = vld [vmem:[#allocation6 + $0x28] sm:$0xff]  }
  0x41   :  { %95 = vst [vmem:[#allocation2 + $0xd0] sm:$0x1] %v4197_v0  ;;  %96 = vst [vmem:[#allocation2 + $0xe0] sm:$0x1] %v4197_v0  ;;  %3332 = vmatpush3.bf16.msra.mxu0 %v3955_v10  ;;  %v3964_v19 = vld [vmem:[#allocation6 + $0xe0] sm:$0xff]   ;;  %v3968_v23 = vld [vmem:[#allocation6 + $0xe8] sm:$0xff]  }
  0x42   :  { %97 = vst [vmem:[#allocation2 + $0xf0] sm:$0x1] %v4197_v0  ;;  %98 = vst [vmem:[#allocation2 + $0x100] sm:$0x1] %v4197_v0  ;;  %3333 = vmatprep.subr.bf16.mxu0 %v3958_v13  ;;  %v3965_v20 = vld [vmem:[#allocation6 + $0xa0] sm:$0xff]   ;;  %v3969_v24 = vld [vmem:[#allocation6 + $0xa8] sm:$0xff]  }
  0x43   :  { %99 = vst [vmem:[#allocation2 + $0x110] sm:$0x1] %v4197_v0  ;;  %100 = vst [vmem:[#allocation2 + $0x120] sm:$0x1] %v4197_v0  ;;  %3396 = vmatpush3.bf16.msra.mxu1 %v3957_v12  ;;  %v3970_v25 = vld [vmem:[#allocation6 + $0x70] sm:$0xff]   ;;  %v3974_v29 = vld [vmem:[#allocation6 + $0x78] sm:$0xff]  }
  0x44   :  { %101 = vst [vmem:[#allocation2 + $0x19] sm:$0x1] %v4197_v0  ;;  %102 = vst [vmem:[#allocation2 + $0x29] sm:$0x1] %v4197_v0  ;;  %3397 = vmatprep.subr.bf16.mxu1 %v3960_v15  ;;  %v3971_v26 = vld [vmem:[#allocation6 + $0x30] sm:$0xff]   ;;  %v3975_v30 = vld [vmem:[#allocation6 + $0x38] sm:$0xff]  }
  0x45   :  { %103 = vst [vmem:[#allocation2 + $0x39] sm:$0x1] %v4197_v0  ;;  %104 = vst [vmem:[#allocation2 + $0x49] sm:$0x1] %v4197_v0  ;;  %3334 = vmatpush3.bf16.msra.mxu0 %v3959_v14  ;;  %v3972_v27 = vld [vmem:[#allocation6 + $0xf0] sm:$0xff]   ;;  %v3976_v31 = vld [vmem:[#allocation6 + $0xf8] sm:$0xff]  }
  0x46   :  { %105 = vst [vmem:[#allocation2 + $0x59] sm:$0x1] %v4197_v0  ;;  %106 = vst [vmem:[#allocation2 + $0x69] sm:$0x1] %v4197_v0  ;;  %3335 = vmatprep.subr.bf16.mxu0 %v3962_v17  ;;  %v3973_v28 = vld [vmem:[#allocation6 + $0xb0] sm:$0xff]   ;;  %v117_v32 = vld [vmem:[#allocation3] sm:$0xff] }
  0x47   :  { %107 = vst [vmem:[#allocation2 + $0x79] sm:$0x1] %v4197_v0  ;;  %108 = vst [vmem:[#allocation2 + $0x89] sm:$0x1] %v4197_v0  ;;  %3398 = vmatpush3.bf16.msra.mxu1 %v3961_v16  ;;  %v118_v33 = vld [vmem:[#allocation3 + $0x8] sm:$0xff]  ;;  %v119_v34 = vld [vmem:[#allocation3 + $0x10] sm:$0xff] }
  0x48   :  { %109 = vst [vmem:[#allocation2 + $0xb9] sm:$0x1] %v4197_v0  ;;  %110 = vst [vmem:[#allocation2 + $0xc9] sm:$0x1] %v4197_v0  ;;  %3399 = vmatprep.subr.bf16.mxu1 %v3964_v19  ;;  %v120_v35 = vld [vmem:[#allocation3 + $0x18] sm:$0xff]  ;;  %v181_v36 = vmax.f32 %v117_v32, %v118_v33  ;;  %v261_v37 = vld [vmem:[#allocation2 + $0x1] sm:$0xff] }
  0x49   :  { %111 = vst [vmem:[#allocation2 + $0xd9] sm:$0x1] %v4197_v0  ;;  %112 = vst [vmem:[#allocation2 + $0xe9] sm:$0x1] %v4197_v0  ;;  %3336 = vmatpush3.bf16.msra.mxu0 %v3963_v18  ;;  %v197_v38 = vmax.f32 %v119_v34, %v120_v35  ;;  %v3977_v39 = vld [vmem:[#allocation6 + $0xb8] sm:$0xff]   ;;  %v3978_v40 = vld [vmem:[#allocation6 + $0x140] sm:$0xff]  }
  0x4a   :  { %113 = vst [vmem:[#allocation2 + $0xf9] sm:$0x1] %v4197_v0  ;;  %114 = vst [vmem:[#allocation2 + $0x109] sm:$0x1] %v4197_v0  ;;  %3337 = vmatprep.subr.bf16.mxu0 %v3966_v21  ;;  %v121_v41 = vld [vmem:[#allocation3 + $0x20] sm:$0xff]  ;;  %v122_v43 = vld [vmem:[#allocation3 + $0x28] sm:$0xff] }
  0x4b   :  { %115 = vst [vmem:[#allocation2 + $0x119] sm:$0x1] %v4197_v0  ;;  %116 = vst [vmem:[#allocation2 + $0x129] sm:$0x1] %v4197_v0  ;;  %3400 = vmatpush3.bf16.msra.mxu1 %v3965_v20  ;;  %v4333_v42 = vmax.f32 %v181_v36, %v197_v38  ;;  %v123_v44 = vld [vmem:[#allocation3 + $0x30] sm:$0xff]  ;;  %v124_v45 = vld [vmem:[#allocation3 + $0x38] sm:$0xff]  ;;  %v182_v46 = vmax.f32 %v121_v41, %v122_v43 }
  0x4c   :  { %3401 = vmatprep.subr.bf16.mxu1 %v3968_v23  ;;  %v198_v47 = vmax.f32 %v123_v44, %v124_v45  ;;  %v125_v49 = vld [vmem:[#allocation3 + $0x40] sm:$0xff]  ;;  %v126_v50 = vld [vmem:[#allocation3 + $0x48] sm:$0xff]  ;;  %v127_v52 = vld [vmem:[#allocation3 + $0x50] sm:$0xff] }
  0x4d   :  { %3338 = vmatpush3.bf16.msra.mxu0 %v3967_v22  ;;  %229 = vst [vmem:[#allocation2 + $0x11] sm:$0xff] %v4333_v42  ;;  %v391_v48 = vpack.c.bf16 %v4333_v42, %v261_v37  ;;  %v128_v53 = vld [vmem:[#allocation3 + $0x58] sm:$0xff]  ;;  %v183_v54 = vmax.f32 %v125_v49, %v126_v50  ;;  %v129_v56 = vld [vmem:[#allocation3 + $0x60] sm:$0xff]  ;;  %v130_v57 = vld [vmem:[#allocation3 + $0x68] sm:$0xff] }
  0x4e   :  { %3339 = vmatprep.subr.bf16.mxu0 %v3970_v25  ;;  %v4337_v51 = vmax.f32 %v182_v46, %v198_v47  ;;  %v199_v55 = vmax.f32 %v127_v52, %v128_v53  ;;  %v131_v58 = vld [vmem:[#allocation3 + $0x70] sm:$0xff]  ;;  %v132_v59 = vld [vmem:[#allocation3 + $0x78] sm:$0xff]  ;;  %v184_v62 = vmax.f32 %v129_v56, %v130_v57  ;;  %v3979_v1 = vld [vmem:[#allocation6 + $0x100] sm:$0xff]  }
  0x4f   :  { %3402 = vmatpush3.bf16.msra.mxu1 %v3969_v24  ;;  %1077 = vmatprep.mubr.bf16.mxu0 %v391_v48  ;;  %v200_v63 = vmax.f32 %v131_v58, %v132_v59  ;;  %v277_v2 = vld [vmem:[#allocation2 + $0x2] sm:$0xff]  ;;  %v135_v5 = vld [vmem:[#allocation3 + $0x90] sm:$0xff]  ;;  %v136_v7 = vld [vmem:[#allocation3 + $0x98] sm:$0xff] }
  0x50   :  { %3403 = vmatprep.subr.bf16.mxu1 %v3972_v27  ;;  %230 = vst [vmem:[#allocation2 + $0x21] sm:$0xff] %v4337_v51  ;;  %v394_v60 = vpack.c.bf16 %v4337_v51, %v4333_v42  ;;  %v4342_v61 = vmax.f32 %v183_v54, %v199_v55  ;;  %v133_v3 = vld [vmem:[#allocation3 + $0x80] sm:$0xff]  ;;  %v134_v4 = vld [vmem:[#allocation3 + $0x88] sm:$0xff]  ;;  %v201_v13 = vmax.f32 %v135_v5, %v136_v7  ;;  %v139_v17 = vld [vmem:[#allocation3 + $0xb0] sm:$0xff] }
  0x51   :  { %3340 = vmatpush3.bf16.msra.mxu0 %v3971_v26  ;;  %v4345_v6 = vmax.f32 %v184_v62, %v200_v63  ;;  %v185_v8 = vmax.f32 %v133_v3, %v134_v4  ;;  %v3980_v12 = vld [vmem:[#allocation6 + $0x148] sm:$0xff]   ;;  %v137_v15 = vld [vmem:[#allocation3 + $0xa0] sm:$0xff]  ;;  %v140_v20 = vld [vmem:[#allocation3 + $0xb8] sm:$0xff] }
  0x52   :  { %3341 = vmatprep.subr.bf16.mxu0 %v3974_v29  ;;  %231 = vst [vmem:[#allocation2 + $0x31] sm:$0xff] %v4342_v61  ;;  %v4351_v11 = vpack.c.bf16 %v4342_v61, %v4337_v51  ;;  %v138_v16 = vld [vmem:[#allocation3 + $0xa8] sm:$0xff]  ;;  %v3982_v25 = vld [vmem:[#allocation6 + $0x150] sm:$0xff]   ;;  %v202_v26 = vmax.f32 %v139_v17, %v140_v20  ;;  %v144_v32 = vld [vmem:[#allocation3 + $0xd8] sm:$0xff] }
  0x53   :  { %3404 = vmatpush3.bf16.msra.mxu1 %v3973_v28  ;;  %232 = vst [vmem:[#allocation2 + $0x41] sm:$0xff] %v4345_v6  ;;  %v403_v18 = vpack.c.bf16 %v4345_v6, %v4342_v61  ;;  %v4357_v19 = vmax.f32 %v185_v8, %v201_v13  ;;  %v186_v21 = vmax.f32 %v137_v15, %v138_v16  ;;  %v3981_v24 = vld [vmem:[#allocation6 + $0x108] sm:$0xff]   ;;  %v141_v28 = vld [vmem:[#allocation3 + $0xc0] sm:$0xff]  ;;  %v3983_v36 = vld [vmem:[#allocation6 + $0x110] sm:$0xff]  }
  0x54   :  { %3405 = vmatprep.subr.bf16.mxu1 %v3976_v31  ;;  %v246_v9 = vld [vmem:[#allocation2 + $0x10] sm:$0xff]  ;;  %v142_v29 = vld [vmem:[#allocation3 + $0xc8] sm:$0xff]  ;;  %v148_v48 = vld [vmem:[#allocation3 + $0xf8] sm:$0xff] }
  0x55   :  { %3342 = vmatpush3.bf16.msra.mxu0 %v3975_v30  ;;  %v4347_v10 = vld [vmem:[#allocation2 + $0x12] sm:$0xff]  ;;  %v390_v14 = vpack.c.bf16 %v246_v9, %v4197_v0  ;;  %233 = vst [vmem:[#allocation2 + $0x51] sm:$0xff] %v4357_v19  ;;  %v4362_v31 = vmax.f32 %v186_v21, %v202_v26  ;;  %v187_v33 = vmax.f32 %v141_v28, %v142_v29  ;;  %v149_v54 = vld [vmem:[#allocation3 + $0x100] sm:$0xff]  ;;  %v150_v55 = vld [vmem:[#allocation3 + $0x108] sm:$0xff] }
  0x56   :  { %3455 = vmatprep.subr.bf16.mxu0 %v3978_v40  ;;  %v392_v23 = vpack.c.bf16 %v4347_v10, %v277_v2  ;;  %v143_v30 = vld [vmem:[#allocation3 + $0xd0] sm:$0xff]  ;;  %v146_v40 = vld [vmem:[#allocation3 + $0xe8] sm:$0xff]  ;;  %v4375_v46 = vpack.c.bf16 %v4357_v19, %v4345_v6  ;;  %v3984_v52 = vld [vmem:[#allocation6 + $0x158] sm:$0xff]   ;;  %v189_v63 = vmax.f32 %v149_v54, %v150_v55 }
  0x57   :  { %3406 = vmatpush3.bf16.msra.mxu1 %v3977_v39  ;;  %v294_v22 = vld [vmem:[#allocation2 + $0x20] sm:$0xff]  ;;  %v203_v37 = vmax.f32 %v143_v30, %v144_v32  ;;  %234 = vst [vmem:[#allocation2 + $0x61] sm:$0xff] %v4362_v31  ;;  %v147_v41 = vld [vmem:[#allocation3 + $0xf0] sm:$0xff]  ;;  %v412_v43 = vpack.c.bf16 %v4362_v31, %v4357_v19  ;;  %v3985_v59 = vld [vmem:[#allocation6 + $0x118] sm:$0xff]  }
  0x58   :  { %1078 = vmatmul.mubr.bf16.vlgmr.msra.gmra.mrb[0].mxu0 %v390_v14  ;;  %v393_v27 = vpack.c.bf16 %v294_v22, %v246_v9  ;;  %v4364_v35 = vld [vmem:[#allocation2 + $0x22] sm:$0xff]  ;;  %v204_v53 = vmax.f32 %v147_v41, %v148_v48  ;;  %v151_v56 = vld [vmem:[#allocation3 + $0x110] sm:$0xff]  ;;  %v152_v62 = vld [vmem:[#allocation3 + $0x118] sm:$0xff] }
  0x59   :  { %3456 = vmatpush3.bf16.msra.mxu0 %v3979_v1  ;;  %1085 = vmatprep.mubr.bf16.mxu0 %v4351_v11  ;;  %v248_v34 = vld [vmem:[#allocation2 + $0x30] sm:$0xff]  ;;  %v145_v39 = vld [vmem:[#allocation3 + $0xe0] sm:$0xff]  ;;  %v4377_v47 = vmax.f32 %v187_v33, %v203_v37  ;;  %v205_v2 = vmax.f32 %v151_v56, %v152_v62  ;;  %v154_v16 = vld [vmem:[#allocation3 + $0x128] sm:$0xff] }
  0x5a   :  { %3457 = vmatprep.subr.bf16.mxu0 %v3980_v12  ;;  %1174 = vmatprep.mubr.bf16.mxu1 %v393_v27  ;;  %v4366_v38 = vpack.c.bf16 %v248_v34, %v294_v22  ;;  %v296_v44 = vld [vmem:[#allocation2 + $0x40] sm:$0xff]  ;;  %v4371_v45 = vld [vmem:[#allocation2 + $0x32] sm:$0xff]  ;;  %v188_v49 = vmax.f32 %v145_v39, %v146_v40  ;;  %v3990_v32 = vld [vmem:[#allocation6 + $0x1c8] sm:$0xff]  }
  0x5b   :  { %1175 = vmatmul.mubr.bf16.vlgmr.msra.gmra.mrb[0].mxu1 %v392_v23  ;;  %v402_v50 = vpack.c.bf16 %v296_v44, %v248_v34  ;;  %235 = vst [vmem:[#allocation2 + $0x71] sm:$0xff] %v4377_v47  ;;  %v4383_v57 = vpack.c.bf16 %v4371_v45, %v4364_v35  ;;  %v3986_v3 = vld [vmem:[#allocation6 + $0x160] sm:$0xff]   ;;  %v4395_v9 = vmax.f32 %v189_v63, %v205_v2  ;;  %v155_v17 = vld [vmem:[#allocation3 + $0x130] sm:$0xff]  ;;  %v156_v21 = vld [vmem:[#allocation3 + $0x138] sm:$0xff] }
  0x5c   :  { %v4385_v58 = vmax.f32 %v188_v49, %v204_v53  ;;  %v250_v1 = vld [vmem:[#allocation2 + $0x50] sm:$0xff]  ;;  %v4391_v7 = vld [vmem:[#allocation2 + $0x42] sm:$0xff]  ;;  %v4402_v20 = vpack.c.bf16 %v4377_v47, %v4362_v31  ;;  %v160_v39 = vld [vmem:[#allocation3 + $0x158] sm:$0xff] }
  0x5d   :  { %3458 = vmatpush3.bf16.msra.mxu0 %v3981_v24  ;;  %1182 = vmatprep.mubr.bf16.mxu1 %v402_v50  ;;  %v4393_v8 = vld [vmem:[#allocation2 + $0x52] sm:$0xff]  ;;  %v3987_v12 = vld [vmem:[#allocation6 + $0x1c0] sm:$0xff]   ;;  %v4398_v13 = vpack.c.bf16 %v250_v1, %v296_v44  ;;  %237 = vst [vmem:[#allocation2 + $0xb1] sm:$0xff] %v4395_v9  ;;  %v206_v24 = vmax.f32 %v155_v17, %v156_v21  ;;  %v3991_v48 = vld [vmem:[#allocation6 + $0x188] sm:$0xff]  }
  0x5e   :  { %3459 = vmatprep.subr.bf16.mxu0 %v3982_v25  ;;  %236 = vst [vmem:[#allocation2 + $0x81] sm:$0xff] %v4385_v58  ;;  %v421_v4 = vpack.c.bf16 %v4385_v58, %v4377_v47  ;;  %v298_v5 = vld [vmem:[#allocation2 + $0x60] sm:$0xff]  ;;  %3519 = vmatprep.subr.bf16.mxu1 %v3987_v12  ;;  %v4408_v27 = vpack.c.bf16 %v4393_v8, %v4391_v7  ;;  %v159_v37 = vld [vmem:[#allocation3 + $0x150] sm:$0xff]  ;;  %v3992_v56 = vld [vmem:[#allocation6 + $0x168] sm:$0xff]  }
  0x5f   :  { %v411_v14 = vpack.c.bf16 %v298_v5, %v250_v1  ;;  %v153_v15 = vld [vmem:[#allocation3 + $0x120] sm:$0xff]  ;;  %v207_v44 = vmax.f32 %v159_v37, %v160_v39  ;;  %v162_v62 = vld [vmem:[#allocation3 + $0x168] sm:$0xff]  ;;  %v163_v63 = vld [vmem:[#allocation3 + $0x170] sm:$0xff] }
  0x60   :  { %1086 = vmatmul.mubr.bf16.gmra.mrb[4].mxu0 %v4366_v38  ;;  %v190_v22 = vmax.f32 %v153_v15, %v154_v16  ;;  %v3988_v25 = vld [vmem:[#allocation6 + $0x120] sm:$0xff]   ;;  %v164_v1 = vld [vmem:[#allocation3 + $0x178] sm:$0xff]  ;;  %v3995_v21 = vld [vmem:[#allocation6 + $0x190] sm:$0xff]  }
  0x61   :  { %1093 = vmatprep.mubr.bf16.mxu0 %v4375_v46  ;;  %3460 = vmatpush3.bf16.msra.mxu0 %v3983_v36  ;;  %v3989_v26 = vld [vmem:[#allocation6 + $0x180] sm:$0xff]   ;;  %v158_v36 = vld [vmem:[#allocation3 + $0x148] sm:$0xff]  ;;  %v4016_v61 = vld [vmem:[#allocation6 + $0x230] sm:$0xff]  }
  0x62   :  { %3461 = vmatprep.subr.bf16.mxu0 %v3984_v52  ;;  %v252_v23 = vld [vmem:[#allocation2 + $0x70] sm:$0xff]  ;;  %v269_v28 = vld [vmem:[#allocation2 + $0xa1] sm:$0xff]  ;;  %v4410_v29 = vmax.f32 %v190_v22, %v206_v24  ;;  %3520 = vmatpush3.bf16.msra.mxu1 %v3989_v26  ;;  %v3996_v24 = vld [vmem:[#allocation6 + $0x1d8] sm:$0xff]  }
  0x63   :  { %1183 = vmatmul.mubr.bf16.gmra.mrb[4].mxu1 %v4383_v57  ;;  %v157_v33 = vld [vmem:[#allocation3 + $0x140] sm:$0xff]  ;;  %3521 = vmatprep.subr.bf16.mxu1 %v3990_v32  ;;  %v4420_v49 = vpack.c.bf16 %v252_v23, %v298_v5  ;;  %v4424_v52 = vld [vmem:[#allocation2 + $0x72] sm:$0xff]  ;;  %v427_v53 = vpack.c.bf16 %v4395_v9, %v269_v28  ;;  %v3993_v5 = vld [vmem:[#allocation6 + $0x128] sm:$0xff]  }
  0x64   :  { %1190 = vmatprep.mubr.bf16.mxu1 %v411_v14  ;;  %238 = vst [vmem:[#allocation2 + $0xc1] sm:$0xff] %v4410_v29  ;;  %v430_v40 = vpack.c.bf16 %v4410_v29, %v4395_v9  ;;  %v191_v41 = vmax.f32 %v157_v33, %v158_v36  ;;  %v4422_v50 = vld [vmem:[#allocation2 + $0x62] sm:$0xff]  ;;  %v254_v54 = vld [vmem:[#allocation2 + $0xb0] sm:$0xff] }
  0x65   :  { %3462 = vmatpush3.bf16.msra.mxu0 %v3985_v59  ;;  %v4413_v30 = vld [vmem:[#allocation2 + $0x80] sm:$0xff]  ;;  %v4433_v12 = vpack.c.bf16 %v4424_v52, %v4422_v50  ;;  %v3994_v14 = vld [vmem:[#allocation6 + $0x1d0] sm:$0xff]   ;;  %v426_v28 = vpack.c.bf16 %v254_v54, %v4197_v0  ;;  %v166_v32 = vld [vmem:[#allocation3 + $0x188] sm:$0xff] }
  0x66   :  { %3463 = vmatprep.subr.bf16.mxu0 %v3986_v3  ;;  %v420_v34 = vpack.c.bf16 %v4413_v30, %v252_v23  ;;  %v4427_v55 = vmax.f32 %v191_v41, %v207_v44  ;;  %v161_v59 = vld [vmem:[#allocation3 + $0x160] sm:$0xff]  ;;  %3522 = vmatpush3.bf16.msra.mxu1 %v3991_v48  ;;  %v208_v3 = vmax.f32 %v163_v63, %v164_v1  ;;  %v4437_v23 = vld [vmem:[#allocation2 + $0xb2] sm:$0xff] }
  0x67   :  { %v192_v2 = vmax.f32 %v161_v59, %v162_v62  ;;  %3523 = vmatprep.subr.bf16.mxu1 %v3994_v14  ;;  %v285_v22 = vld [vmem:[#allocation2 + $0xa2] sm:$0xff]  ;;  %v167_v33 = vld [vmem:[#allocation3 + $0x190] sm:$0xff]  ;;  %v3997_v41 = vld [vmem:[#allocation6 + $0x198] sm:$0xff]  }
  0x68   :  { %1094 = vmatmul.mubr.bf16.gmra.mrb[8].mxu0 %v4398_v13  ;;  %239 = vst [vmem:[#allocation2 + $0xd1] sm:$0xff] %v4427_v55  ;;  %v4446_v36 = vpack.c.bf16 %v4427_v55, %v4410_v29  ;;  %v428_v0 = vpack.c.bf16 %v4437_v23, %v285_v22  ;;  %v171_v59 = vld [vmem:[#allocation3 + $0x1b0] sm:$0xff]  ;;  %v172_v62 = vld [vmem:[#allocation3 + $0x1b8] sm:$0xff]  ;;  %v4000_v22 = vld [vmem:[#allocation6 + $0x1e0] sm:$0xff]  }
  0x69   :  { %1101 = vmatprep.mubr.bf16.mxu0 %v4402_v20  ;;  %3464 = vmatpush3.bf16.msra.mxu0 %v3988_v25  ;;  %v4435_v16 = vmax.f32 %v192_v2, %v208_v3  ;;  %v165_v25 = vld [vmem:[#allocation3 + $0x180] sm:$0xff]  ;;  %v210_v1 = vmax.f32 %v171_v59, %v172_v62  ;;  %v3999_v2 = vld [vmem:[#allocation6 + $0x130] sm:$0xff]   ;;  %v4004_v59 = vld [vmem:[#allocation6 + $0x178] sm:$0xff]  }
  0x6a   :  { %3465 = vmatprep.subr.bf16.mxu0 %v3992_v56  ;;  %3524 = vmatpush3.bf16.msra.mxu1 %v3995_v21  ;;  %v193_v37 = vmax.f32 %v165_v25, %v166_v32  ;;  %v169_v56 = vld [vmem:[#allocation3 + $0x1a0] sm:$0xff]  ;;  %v4002_v32 = vld [vmem:[#allocation6 + $0x1e8] sm:$0xff]   ;;  %v389_v29 = vld [vmem:[#allocation2 + $0x132] sm:$0xff] }
  0x6b   :  { %1191 = vmatmul.mubr.bf16.gmra.mrb[8].mxu1 %v4408_v27  ;;  %v302_v15 = vld [vmem:[#allocation2 + $0xc0] sm:$0xff]  ;;  %240 = vst [vmem:[#allocation2 + $0xe1] sm:$0xff] %v4435_v16  ;;  %v439_v26 = vpack.c.bf16 %v4435_v16, %v4427_v55  ;;  %3525 = vmatprep.subr.bf16.mxu1 %v3996_v24 }
  0x6c   :  { %1198 = vmatprep.mubr.bf16.mxu1 %v420_v34  ;;  %v429_v17 = vpack.c.bf16 %v302_v15, %v254_v54  ;;  %v168_v34 = vld [vmem:[#allocation3 + $0x198] sm:$0xff]  ;;  %v170_v54 = vld [vmem:[#allocation3 + $0x1a8] sm:$0xff]  ;;  %v4001_v25 = vld [vmem:[#allocation6 + $0x1a0] sm:$0xff]  }
  0x6d   :  { %3466 = vmatpush3.bf16.msra.mxu0 %v3993_v5  ;;  %v209_v39 = vmax.f32 %v167_v33, %v168_v34  ;;  %v194_v63 = vmax.f32 %v169_v56, %v170_v54  ;;  %v4453_v14 = vld [vmem:[#allocation2 + $0xc2] sm:$0xff] }
  0x6e   :  { %3526 = vmatpush3.bf16.msra.mxu1 %v3997_v41  ;;  %v173_v33 = vld [vmem:[#allocation3 + $0x1c0] sm:$0xff]  ;;  %v176_v41 = vld [vmem:[#allocation3 + $0x1d8] sm:$0xff] }
  0x6f   :  { %v256_v44 = vld [vmem:[#allocation2 + $0xd0] sm:$0xff]  ;;  %v4448_v48 = vmax.f32 %v193_v37, %v209_v39  ;;  %v4457_v21 = vmax.f32 %v194_v63, %v210_v1  ;;  %3527 = vmatprep.subr.bf16.mxu1 %v4000_v22  ;;  %v174_v37 = vld [vmem:[#allocation3 + $0x1c8] sm:$0xff]  ;;  %v177_v62 = vld [vmem:[#allocation3 + $0x1e0] sm:$0xff] }
  0x70   :  { %1102 = vmatmul.mubr.bf16.gmra.mrb[12].mxu0 %v4420_v49  ;;  %v4459_v24 = vpack.c.bf16 %v256_v44, %v302_v15  ;;  %v175_v39 = vld [vmem:[#allocation3 + $0x1d0] sm:$0xff]  ;;  %v195_v15 = vmax.f32 %v173_v33, %v174_v37  ;;  %v178_v63 = vld [vmem:[#allocation3 + $0x1e8] sm:$0xff]  ;;  %v4014_v51 = vld [vmem:[#allocation6 + $0x220] sm:$0xff]  }
  0x71   :  { %1109 = vmatprep.mubr.bf16.mxu0 %v427_v53  ;;  %v3998_v53 = vld [vmem:[#allocation6 + $0x170] sm:$0xff]   ;;  %241 = vst [vmem:[#allocation2 + $0xf1] sm:$0xff] %v4448_v48  ;;  %242 = vst [vmem:[#allocation2 + $0x101] sm:$0xff] %v4457_v21  ;;  %v448_v34 = vpack.c.bf16 %v4457_v21, %v4448_v48  ;;  %v196_v22 = vmax.f32 %v177_v62, %v178_v63  ;;  %v4008_v62 = vld [vmem:[#allocation6 + $0x1f8] sm:$0xff]  }
  0x72   :  { %v304_v3 = vld [vmem:[#allocation2 + $0xe0] sm:$0xff]  ;;  %3467 = vmatprep.subr.bf16.mxu0 %v3998_v53  ;;  %3528 = vmatpush3.bf16.msra.mxu1 %v4001_v25  ;;  %v4003_v53 = vld [vmem:[#allocation6 + $0x1a8] sm:$0xff]   ;;  %v179_v1 = vld [vmem:[#allocation3 + $0x1f0] sm:$0xff] }
  0x73   :  { %1199 = vmatmul.mubr.bf16.gmra.mrb[12].mxu1 %v4433_v12  ;;  %v438_v5 = vpack.c.bf16 %v304_v3, %v256_v44  ;;  %3468 = vmatpush3.bf16.msra.mxu0 %v3999_v2  ;;  %v211_v44 = vmax.f32 %v175_v39, %v176_v41  ;;  %v180_v2 = vld [vmem:[#allocation3 + $0x1f8] sm:$0xff]  ;;  %v332_v42 = vld [vmem:[#allocation2 + $0x82] sm:$0xff] }
  0x74   :  { %1206 = vmatprep.mubr.bf16.mxu1 %v429_v17  ;;  %v4455_v17 = vld [vmem:[#allocation2 + $0xd2] sm:$0xff]  ;;  %3529 = vmatprep.subr.bf16.mxu1 %v4002_v32  ;;  %v212_v25 = vmax.f32 %v179_v1, %v180_v2  ;;  %v4010_v1 = vld [vmem:[#allocation6 + $0x200] sm:$0xff]  }
  0x75   :  { %v4471_v56 = vpack.c.bf16 %v4455_v17, %v4453_v14  ;;  %v4474_v54 = vmax.f32 %v195_v15, %v211_v44  ;;  %3469 = vmatprep.subr.bf16.mxu0 %v4004_v59  ;;  %v4005_v32 = vld [vmem:[#allocation6 + $0x138] sm:$0xff]   ;;  %v4007_v59 = vld [vmem:[#allocation6 + $0x1b0] sm:$0xff]   ;;  %v4094_v19 = vld [vmem:[#allocation2] sm:$0xff] }
  0x76   :  { %3530 = vmatpush3.bf16.msra.mxu1 %v4003_v53  ;;  %v4488_v44 = vmax.f32 %v196_v22, %v212_v25  ;;  %v4006_v53 = vld [vmem:[#allocation6 + $0x1f0] sm:$0xff]   ;;  %v4009_v63 = vld [vmem:[#allocation6 + $0x1b8] sm:$0xff]   ;;  %v423_v31 = vpack.c.bf16 %v4094_v19, %v4413_v30 }
  0x77   :  { %243 = vst [vmem:[#allocation2 + $0x111] sm:$0xff] %v4474_v54  ;;  %v4486_v15 = vpack.c.bf16 %v4474_v54, %v4457_v21  ;;  %3470 = vmatpush3.bf16.msra.mxu0 %v4005_v32  ;;  %3531 = vmatprep.subr.bf16.mxu1 %v4006_v53 }
  0x78   :  { %1110 = vmatmul.mubr.bf16.gmra.mrb[16].mxu0 %v426_v28  ;;  %v4463_v28 = vpack.c.bf16 %v4448_v48, %v4435_v16  ;;  %v306_v37 = vld [vmem:[#allocation2 + $0x100] sm:$0xff]  ;;  %v4482_v39 = vld [vmem:[#allocation2 + $0xf2] sm:$0xff]  ;;  %244 = vst [vmem:[#allocation2 + $0x121] sm:$0xff] %v4488_v44  ;;  %3871 = vmatprep.subr.bf16.mxu0 %v4010_v1 }
  0x79   :  { %1117 = vmatprep.mubr.bf16.mxu0 %v4446_v36  ;;  %v4502_v25 = vld [vmem:[#allocation2 + $0x102] sm:$0xff] }
  0x7a   :  { %3532 = vmatpush3.bf16.msra.mxu1 %v4007_v59  ;;  %v449_v47 = vpack.c.bf16 %v4502_v25, %v4482_v39 }
  0x7b   :  { %1207 = vmatmul.mubr.bf16.gmra.mrb[16].mxu1 %v428_v0  ;;  %v258_v0 = vld [vmem:[#allocation2 + $0xf0] sm:$0xff]  ;;  %3533 = vmatprep.subr.bf16.mxu1 %v4008_v62 }
  0x7c   :  { %1214 = vmatprep.mubr.bf16.mxu1 %v438_v5  ;;  %v4476_v5 = vld [vmem:[#allocation2 + $0xe2] sm:$0xff]  ;;  %v4480_v33 = vpack.c.bf16 %v258_v0, %v304_v3  ;;  %v447_v41 = vpack.c.bf16 %v306_v37, %v258_v0  ;;  %v457_v3 = vpack.c.bf16 %v4488_v44, %v4474_v54 }
  0x7d   :  { %v4496_v0 = vpack.c.bf16 %v4482_v39, %v4476_v5 }
  0x7e   :  { %v260_v2 = vld [vmem:[#allocation2 + $0x110] sm:$0xff]  ;;  %3534 = vmatpush3.bf16.msra.mxu1 %v4009_v63  ;;  %v4013_v63 = vld [vmem:[#allocation6 + $0x218] sm:$0xff]  }
  0x7f   :  { %v4500_v22 = vpack.c.bf16 %v260_v2, %v306_v37  ;;  %v4504_v32 = vld [vmem:[#allocation2 + $0x112] sm:$0xff]  ;;  %v4508_v53 = vld [vmem:[#allocation2 + $0x120] sm:$0xff]  ;;  %v4011_v37 = vld [vmem:[#allocation6 + $0x208] sm:$0xff]  }
  0x80   :  { %1118 = vmatmul.mubr.bf16.gmra.mrb[20].mxu0 %v4459_v24  ;;  %v456_v59 = vpack.c.bf16 %v4508_v53, %v260_v2  ;;  %v4514_v62 = vpack.c.bf16 %v4504_v32, %v4502_v25  ;;  %v459_v9 = vpack.c.bf16 %v4094_v19, %v4508_v53 }
  0x81   :  { %1125 = vmatprep.mubr.bf16.mxu0 %v4463_v28 }
  0x83   :  { %1215 = vmatmul.mubr.bf16.gmra.mrb[20].mxu1 %v4471_v56 }
  0x84   :  { %1222 = vmatprep.mubr.bf16.mxu1 %v447_v41  ;;  %v395_v41 = vpack.c.bf16 %v4364_v35, %v4347_v10  ;;  %v404_v10 = vpack.c.bf16 %v4391_v7, %v4371_v45  ;;  %v4012_v35 = vld [vmem:[#allocation6 + $0x210] sm:$0xff]   ;;  %v422_v45 = vpack.c.bf16 %v332_v42, %v4424_v52 }
  0x85   :  { %v373_v7 = vld [vmem:[#allocation2 + $0x131] sm:$0xff] }
  0x88   :  { %1126 = vmatmul.mubr.bf16.gmra.mrb[24].mxu0 %v4480_v33 }
  0x89   :  { %1133 = vmatprep.mubr.bf16.mxu0 %v4486_v15 }
  0x8b   :  { %1223 = vmatmul.mubr.bf16.gmra.mrb[24].mxu1 %v4496_v0 }
  0x8c   :  { %1230 = vmatprep.mubr.bf16.mxu1 %v456_v59 }
  0x90   :  { %1134 = vmatmul.mubr.bf16.gmra.mrb[28].mxu0 %v4500_v22 }
  0x91   :  { %1271 = vmatprep.mubr.bf16.mxu0 %v395_v41 }
  0x93   :  { %1231 = vmatmul.mubr.bf16.gmra.mrb[28].mxu1 %v4514_v62 }
  0x94   :  { %1368 = vmatprep.mubr.bf16.mxu1 %v4351_v11  ;;  %v413_v11 = vpack.c.bf16 %v4422_v50, %v4393_v8  ;;  %v460_v8 = vpack.c.bf16 %v373_v7, %v4488_v44 }
  0x98   :  { %1272 = vmatmul.mubr.bf16.vlgmr.msra.gmra.mrb[32].mxu0 %v394_v60  ;;  %v365_v60 = vld [vmem:[#allocation2 + $0x91] sm:$0xff] }
  0x99   :  { %3872 = vmatpush3.bf16.msra.mxu0 %v4010_v1  ;;  %1279 = vmatprep.mubr.bf16.mxu0 %v404_v10  ;;  %v424_v6 = vpack.c.bf16 %v365_v60, %v4385_v58  ;;  %v340_v58 = vld [vmem:[#allocation2 + $0x122] sm:$0xff] }
  0x9a   :  { %3873 = vmatprep.subr.bf16.mxu0 %v4011_v37  ;;  %v461_v30 = vpack.c.bf16 %v389_v29, %v340_v58 }
  0x9b   :  { %1369 = vmatmul.mubr.bf16.vlgmr.msra.gmra.mrb[32].mxu1 %v4366_v38  ;;  %v4015_v38 = vld [vmem:[#allocation6 + $0x228] sm:$0xff]  }
  0x9c   :  { %1376 = vmatprep.mubr.bf16.mxu1 %v4375_v46  ;;  %v431_v46 = vpack.c.bf16 %v4453_v14, %v4437_v23 }
  0x9d   :  { %3874 = vmatpush3.bf16.msra.mxu0 %v4011_v37 }
  0x9e   :  { %3875 = vmatprep.subr.bf16.mxu0 %v4012_v35 }
  0xa0   :  { %1280 = vmatmul.mubr.bf16.gmra.mrb[36].mxu0 %v403_v18  ;;  %v4017_v18 = vld [vmem:[#allocation6 + $0x238] sm:$0xff]  }
  0xa1   :  { %1287 = vmatprep.mubr.bf16.mxu0 %v413_v11  ;;  %3876 = vmatpush3.bf16.msra.mxu0 %v4012_v35 }
  0xa2   :  { %3877 = vmatprep.subr.bf16.mxu0 %v4013_v63 }
  0xa3   :  { %1377 = vmatmul.mubr.bf16.gmra.mrb[36].mxu1 %v4398_v13  ;;  %v381_v13 = vld [vmem:[#allocation2 + $0x92] sm:$0xff] }
  0xa4   :  { %1384 = vmatprep.mubr.bf16.mxu1 %v4402_v20  ;;  %v425_v20 = vpack.c.bf16 %v381_v13, %v332_v42 }
  0xa5   :  { %3878 = vmatpush3.bf16.msra.mxu0 %v4013_v63 }
  0xa6   :  { %3879 = vmatprep.subr.bf16.mxu0 %v4014_v51 }
  0xa8   :  { %1288 = vmatmul.mubr.bf16.gmra.mrb[40].mxu0 %v412_v43  ;;  %v440_v43 = vpack.c.bf16 %v4476_v5, %v4455_v17 }
  0xa9   :  { %1295 = vmatprep.mubr.bf16.mxu0 %v422_v45  ;;  %3880 = vmatpush3.bf16.msra.mxu0 %v4014_v51 }
  0xaa   :  { %3881 = vmatprep.subr.bf16.mxu0 %v4015_v38 }
  0xab   :  { %1385 = vmatmul.mubr.bf16.gmra.mrb[40].mxu1 %v4420_v49 }
  0xac   :  { %1392 = vmatprep.mubr.bf16.mxu1 %v424_v6 }
  0xad   :  { %3882 = vmatpush3.bf16.msra.mxu0 %v4015_v38 }
  0xae   :  { %3883 = vmatprep.subr.bf16.mxu0 %v4016_v61 }
  0xb0   :  { %1296 = vmatmul.mubr.bf16.gmra.mrb[44].mxu0 %v421_v4  ;;  %v458_v4 = vpack.c.bf16 %v340_v58, %v4504_v32 }
  0xb1   :  { %1303 = vmatprep.mubr.bf16.mxu0 %v431_v46  ;;  %3884 = vmatpush3.bf16.msra.mxu0 %v4016_v61 }
  0xb2   :  { %3885 = vmatprep.subr.bf16.mxu0 %v4017_v18 }
  0xb3   :  { %1393 = vmatmul.mubr.bf16.gmra.mrb[44].mxu1 %v423_v31 }
  0xb4   :  { %1400 = vmatprep.mubr.bf16.mxu1 %v4446_v36 }
  0xb5   :  { %3886 = vmatpush3.bf16.msra.mxu0 %v4017_v18 }
  0xb8   :  { %1304 = vmatmul.mubr.bf16.gmra.mrb[48].mxu0 %v430_v40 }
  0xb9   :  { %1311 = vmatprep.mubr.bf16.mxu0 %v440_v43 }
  0xbb   :  { %1401 = vmatmul.mubr.bf16.gmra.mrb[48].mxu1 %v4459_v24 }
  0xbc   :  { %1408 = vmatprep.mubr.bf16.mxu1 %v4463_v28 }
  0xc0   :  { %1312 = vmatmul.mubr.bf16.gmra.mrb[52].mxu0 %v439_v26 }
  0xc1   :  { %1319 = vmatprep.mubr.bf16.mxu0 %v449_v47 }
  0xc3   :  { %1409 = vmatmul.mubr.bf16.gmra.mrb[52].mxu1 %v4480_v33 }
  0xc4   :  { %1416 = vmatprep.mubr.bf16.mxu1 %v4486_v15 }
  0xc8   :  { %1320 = vmatmul.mubr.bf16.gmra.mrb[56].mxu0 %v448_v34 }
  0xc9   :  { %1327 = vmatprep.mubr.bf16.mxu0 %v458_v4 }
  0xcb   :  { %1417 = vmatmul.mubr.bf16.gmra.mrb[56].mxu1 %v4500_v22 }
  0xcc   :  { %1424 = vmatprep.mubr.bf16.mxu1 %v460_v8 }
  0xd0   :  { %1328 = vmatmul.mubr.bf16.gmra.mrb[60].mxu0 %v457_v3 }
  0xd1   :  { %3887 = vmatprep.mubr.bf16.mxu0 %v4383_v57  ;;  %v4578_v57 = vld [vmem:[%s5056_s2] ss:$0 sm:$0xff] }
  0xd3   :  { %1425 = vmatmul.mubr.bf16.gmra.mrb[60].mxu1 %v459_v9 }
  0xd8   :  { %3888 = vmatmul.mubr.bf16.vlgmr.msra.gmra.mrb[64].mxu0 %v4408_v27 }
  0xd9   :  { %3891 = vmatprep.mubr.bf16.mxu0 %v4433_v12 }
  0xe0   :  { %3892 = vmatmul.mubr.bf16.gmra.mrb[68].mxu0 %v425_v20 }
  0xe1   :  { %3895 = vmatprep.mubr.bf16.mxu0 %v4471_v56 }
  0xe8   :  { %3896 = vmatmul.mubr.bf16.gmra.mrb[72].mxu0 %v4496_v0 }
  0xe9   :  { %3899 = vmatprep.mubr.bf16.mxu0 %v4514_v62 }
  0xf0   :  { %3900 = vmatmul.mubr.bf16.gmra.mrb[76].mxu0 %v461_v30 }
 0x12b   :  { %v3343_v40 = vpop.f32.mrb[0].mxu0 }
 0x12c   :  { %v3344_v27 = vpop.f32.mrb[1].mxu0 }
 0x12d   :  { %v3345_v49 = vadd.f32 %v3344_v27, %v3343_v40  ;;  %v3346_v50 = vpop.f32.mrb[2].mxu0 }
 0x12e   :  { %v3347_v52 = vpop.f32.mrb[3].mxu0  ;;  %v3407_v12 = vpop.f32.mrb[0].mxu1 }
 0x12f   :  { %v1080_v55 = vadd.f32 %v3345_v49, %v4578_v57  ;;  %v3348_v16 = vadd.f32 %v3347_v52, %v3346_v50  ;;  %v3408_v23 = vpop.f32.mrb[1].mxu1 }
 0x130   :  { %v3409_v36 = vadd.f32 %v3408_v23, %v3407_v12  ;;  %v3410_v48 = vpop.f32.mrb[2].mxu1 }
 0x131   :  { %v1083_v26 = vadd.f32 %v3348_v16, %v4578_v57  ;;  %v3411_v14 = vpop.f32.mrb[3].mxu1 }
 0x132   :  { %v4582_v17 = vadd.f32 %v3409_v36, %v1080_v55  ;;  %v3412_v21 = vadd.f32 %v3411_v14, %v3410_v48 }
 0x133   :  { %v3349_v24 = vpop.f32.mrb[4].mxu0 }
 0x134   :  { %v3350_v28 = vpop.f32.mrb[5].mxu0  ;;  %v4584_v34 = vadd.f32 %v3412_v21, %v1083_v26 }
 0x135   :  { %v3351_v56 = vadd.f32 %v3350_v28, %v3349_v24  ;;  %v3352_v54 = vpop.f32.mrb[6].mxu0 }
 0x136   :  { %v3353_v5 = vpop.f32.mrb[7].mxu0  ;;  %v3413_v39 = vpop.f32.mrb[4].mxu1 }
 0x137   :  { %v1088_v33 = vadd.f32 %v3351_v56, %v4578_v57  ;;  %v3354_v15 = vadd.f32 %v3353_v5, %v3352_v54  ;;  %v3414_v44 = vpop.f32.mrb[5].mxu1 }
 0x138   :  { %v3415_v0 = vadd.f32 %v3414_v44, %v3413_v39  ;;  %v3416_v1 = vpop.f32.mrb[6].mxu1 }
 0x139   :  { %v1091_v3 = vadd.f32 %v3354_v15, %v4578_v57  ;;  %v3417_v2 = vpop.f32.mrb[7].mxu1 }
 0x13a   :  { %v4588_v22 = vadd.f32 %v3415_v0, %v1088_v33  ;;  %v3418_v25 = vadd.f32 %v3417_v2, %v3416_v1 }
 0x13b   :  { %v3355_v32 = vpop.f32.mrb[8].mxu0 }
 0x13c   :  { %v3356_v41 = vpop.f32.mrb[9].mxu0  ;;  %v4590_v53 = vadd.f32 %v3418_v25, %v1091_v3 }
 0x13d   :  { %v3357_v59 = vadd.f32 %v3356_v41, %v3355_v32  ;;  %v3358_v62 = vpop.f32.mrb[10].mxu0 }
 0x13e   :  { %v3359_v37 = vpop.f32.mrb[11].mxu0  ;;  %v3419_v35 = vpop.f32.mrb[8].mxu1 }
 0x13f   :  { %v1096_v10 = vadd.f32 %v3357_v59, %v4578_v57  ;;  %v3360_v63 = vadd.f32 %v3359_v37, %v3358_v62  ;;  %v3420_v11 = vpop.f32.mrb[9].mxu1 }
 0x140   :  { %v3421_v51 = vadd.f32 %v3420_v11, %v3419_v35  ;;  %v3422_v60 = vpop.f32.mrb[10].mxu1 }
 0x141   :  { %v1099_v42 = vadd.f32 %v3360_v63, %v4578_v57  ;;  %v3423_v38 = vpop.f32.mrb[11].mxu1 }
 0x142   :  { %v4594_v45 = vadd.f32 %v3421_v51, %v1096_v10  ;;  %v3424_v61 = vadd.f32 %v3423_v38, %v3422_v60 }
 0x143   :  { %v3361_v6 = vpop.f32.mrb[12].mxu0 }
 0x144   :  { %v3362_v18 = vpop.f32.mrb[13].mxu0  ;;  %v4596_v46 = vadd.f32 %v3424_v61, %v1099_v42 }
 0x145   :  { %v3363_v19 = vadd.f32 %v3362_v18, %v3361_v6  ;;  %v3364_v31 = vpop.f32.mrb[14].mxu0 }
 0x146   :  { %v3365_v43 = vpop.f32.mrb[15].mxu0  ;;  %v3425_v58 = vpop.f32.mrb[12].mxu1 }
 0x147   :  { %v1104_v47 = vadd.f32 %v3363_v19, %v4578_v57  ;;  %v3366_v4 = vadd.f32 %v3365_v43, %v3364_v31  ;;  %v3426_v7 = vpop.f32.mrb[13].mxu1 }
 0x148   :  { %v3427_v9 = vadd.f32 %v3426_v7, %v3425_v58  ;;  %v3428_v13 = vpop.f32.mrb[14].mxu1 }
 0x149   :  { %v1107_v8 = vadd.f32 %v3366_v4, %v4578_v57  ;;  %v3429_v20 = vpop.f32.mrb[15].mxu1 }
 0x14a   :  { %v4600_v29 = vadd.f32 %v3427_v9, %v1104_v47  ;;  %v3430_v30 = vadd.f32 %v3429_v20, %v3428_v13 }
 0x14b   :  { %v3367_v40 = vpop.f32.mrb[16].mxu0 }
 0x14c   :  { %v3368_v27 = vpop.f32.mrb[17].mxu0  ;;  %v4602_v49 = vadd.f32 %v3430_v30, %v1107_v8 }
 0x14d   :  { %v3369_v50 = vadd.f32 %v3368_v27, %v3367_v40  ;;  %v3370_v52 = vpop.f32.mrb[18].mxu0 }
 0x14e   :  { %v3371_v55 = vpop.f32.mrb[19].mxu0  ;;  %v3431_v16 = vpop.f32.mrb[16].mxu1 }
 0x14f   :  { %v1112_v12 = vadd.f32 %v3369_v50, %v4578_v57  ;;  %v3372_v23 = vadd.f32 %v3371_v55, %v3370_v52  ;;  %v3432_v26 = vpop.f32.mrb[17].mxu1 }
 0x150   :  { %v3433_v48 = vadd.f32 %v3432_v26, %v3431_v16  ;;  %v3434_v14 = vpop.f32.mrb[18].mxu1 }
 0x151   :  { %v1115_v36 = vadd.f32 %v3372_v23, %v4578_v57  ;;  %v3435_v21 = vpop.f32.mrb[19].mxu1 }
 0x152   :  { %v4606_v24 = vadd.f32 %v3433_v48, %v1112_v12  ;;  %v3436_v28 = vadd.f32 %v3435_v21, %v3434_v14 }
 0x153   :  { %v3373_v56 = vpop.f32.mrb[20].mxu0 }
 0x154   :  { %v3374_v54 = vpop.f32.mrb[21].mxu0  ;;  %v4608_v5 = vadd.f32 %v3436_v28, %v1115_v36 }
 0x155   :  { %v3375_v33 = vadd.f32 %v3374_v54, %v3373_v56  ;;  %v3376_v39 = vpop.f32.mrb[22].mxu0 }
 0x156   :  { %v3377_v15 = vpop.f32.mrb[23].mxu0  ;;  %v3437_v3 = vpop.f32.mrb[20].mxu1 }
 0x157   :  { %v1120_v44 = vadd.f32 %v3375_v33, %v4578_v57  ;;  %v3378_v0 = vadd.f32 %v3377_v15, %v3376_v39  ;;  %v3438_v1 = vpop.f32.mrb[21].mxu1 }
 0x158   :  { %v3439_v25 = vadd.f32 %v3438_v1, %v3437_v3  ;;  %v3440_v32 = vpop.f32.mrb[22].mxu1 }
 0x159   :  { %v1123_v2 = vadd.f32 %v3378_v0, %v4578_v57  ;;  %v3441_v41 = vpop.f32.mrb[23].mxu1 }
 0x15a   :  { %v4612_v59 = vadd.f32 %v3439_v25, %v1120_v44  ;;  %v3442_v62 = vadd.f32 %v3441_v41, %v3440_v32 }
 0x15b   :  { %v3379_v37 = vpop.f32.mrb[24].mxu0 }
 0x15c   :  { %v3380_v10 = vpop.f32.mrb[25].mxu0  ;;  %v4614_v35 = vadd.f32 %v3442_v62, %v1123_v2 }
 0x15d   :  { %v3381_v63 = vadd.f32 %v3380_v10, %v3379_v37  ;;  %v3382_v11 = vpop.f32.mrb[26].mxu0 }
 0x15e   :  { %v3383_v42 = vpop.f32.mrb[27].mxu0  ;;  %v3443_v60 = vpop.f32.mrb[24].mxu1 }
 0x15f   :  { %v1128_v51 = vadd.f32 %v3381_v63, %v4578_v57  ;;  %v3384_v38 = vadd.f32 %v3383_v42, %v3382_v11  ;;  %v3444_v61 = vpop.f32.mrb[25].mxu1 }
 0x160   :  { %v3445_v18 = vadd.f32 %v3444_v61, %v3443_v60  ;;  %v3446_v19 = vpop.f32.mrb[26].mxu1 }
 0x161   :  { %v1131_v6 = vadd.f32 %v3384_v38, %v4578_v57  ;;  %v3447_v31 = vpop.f32.mrb[27].mxu1 }
 0x162   :  { %v4618_v43 = vadd.f32 %v3445_v18, %v1128_v51  ;;  %v3448_v47 = vadd.f32 %v3447_v31, %v3446_v19 }
 0x163   :  { %v3385_v58 = vpop.f32.mrb[28].mxu0 }
 0x164   :  { %v3386_v4 = vpop.f32.mrb[29].mxu0  ;;  %v4620_v7 = vadd.f32 %v3448_v47, %v1131_v6 }
 0x165   :  { %v3387_v8 = vadd.f32 %v3386_v4, %v3385_v58  ;;  %v3388_v9 = vpop.f32.mrb[30].mxu0 }
 0x166   :  { %v3389_v13 = vpop.f32.mrb[31].mxu0  ;;  %v3449_v30 = vpop.f32.mrb[28].mxu1 }
 0x167   :  { %v1136_v20 = vadd.f32 %v3387_v8, %v4578_v57  ;;  %v3390_v40 = vadd.f32 %v3389_v13, %v3388_v9  ;;  %v3450_v27 = vpop.f32.mrb[29].mxu1 }
 0x168   :  { %v3451_v52 = vadd.f32 %v3450_v27, %v3449_v30  ;;  %v3452_v55 = vpop.f32.mrb[30].mxu1 }
 0x169   :  { %v1139_v50 = vadd.f32 %v3390_v40, %v4578_v57  ;;  %v3453_v12 = vpop.f32.mrb[31].mxu1 }
 0x16a   :  { %v4624_v16 = vadd.f32 %v3451_v52, %v1136_v20  ;;  %v3454_v23 = vadd.f32 %v3453_v12, %v3452_v55 }
 0x16b   :  { %v3471_v26 = vpop.f32.mrb[32].mxu0 }
 0x16c   :  { %v3472_v36 = vpop.f32.mrb[33].mxu0  ;;  %v4626_v48 = vadd.f32 %v3454_v23, %v1139_v50 }
 0x16d   :  { %v3473_v14 = vadd.f32 %v3472_v36, %v3471_v26  ;;  %v3474_v21 = vpop.f32.mrb[34].mxu0 }
 0x16e   :  { %v3475_v28 = vpop.f32.mrb[35].mxu0  ;;  %v3535_v54 = vpop.f32.mrb[32].mxu1 }
 0x16f   :  { %v1274_v56 = vadd.f32 %v3473_v14, %v4582_v17  ;;  %v3476_v33 = vadd.f32 %v3475_v28, %v3474_v21  ;;  %v3536_v39 = vpop.f32.mrb[33].mxu1 }
 0x170   :  { %v3537_v15 = vadd.f32 %v3536_v39, %v3535_v54  ;;  %v3538_v44 = vpop.f32.mrb[34].mxu1 }
 0x171   :  { %v1277_v57 = vadd.f32 %v3476_v33, %v4584_v34  ;;  %v3539_v3 = vpop.f32.mrb[35].mxu1 }
 0x172   :  { %v3540_v0 = vadd.f32 %v3539_v3, %v3538_v44  ;;  %v4630_v2 = vadd.f32 %v3537_v15, %v1274_v56 }
 0x173   :  { %v3477_v1 = vpop.f32.mrb[36].mxu0 }
 0x174   :  { %v3478_v25 = vpop.f32.mrb[37].mxu0  ;;  %v4632_v62 = vadd.f32 %v3540_v0, %v1277_v57 }
 0x175   :  { %v3479_v32 = vadd.f32 %v3478_v25, %v3477_v1  ;;  %v3480_v41 = vpop.f32.mrb[38].mxu0 }
 0x176   :  { %v3481_v37 = vpop.f32.mrb[39].mxu0  ;;  %v3541_v10 = vpop.f32.mrb[36].mxu1 }
 0x177   :  { %v1282_v17 = vadd.f32 %v3479_v32, %v4588_v22  ;;  %v3482_v63 = vadd.f32 %v3481_v37, %v3480_v41  ;;  %v3542_v11 = vpop.f32.mrb[37].mxu1 }
 0x178   :  { %v3543_v42 = vadd.f32 %v3542_v11, %v3541_v10  ;;  %v3544_v51 = vpop.f32.mrb[38].mxu1 }
 0x179   :  { %v1285_v34 = vadd.f32 %v3482_v63, %v4590_v53  ;;  %v3545_v60 = vpop.f32.mrb[39].mxu1 }
 0x17a   :  { %v3546_v38 = vadd.f32 %v3545_v60, %v3544_v51  ;;  %v4636_v6 = vadd.f32 %v3543_v42, %v1282_v17 }
 0x17b   :  { %v3483_v61 = vpop.f32.mrb[40].mxu0 }
 0x17c   :  { %v3484_v18 = vpop.f32.mrb[41].mxu0  ;;  %v4638_v47 = vadd.f32 %v3546_v38, %v1285_v34 }
 0x17d   :  { %v3485_v19 = vadd.f32 %v3484_v18, %v3483_v61  ;;  %v3486_v31 = vpop.f32.mrb[42].mxu0 }
 0x17e   :  { %v3487_v58 = vpop.f32.mrb[43].mxu0  ;;  %v3547_v4 = vpop.f32.mrb[40].mxu1 }
 0x17f   :  { %v1290_v22 = vadd.f32 %v3485_v19, %v4594_v45  ;;  %v3488_v8 = vadd.f32 %v3487_v58, %v3486_v31  ;;  %v3548_v9 = vpop.f32.mrb[41].mxu1  ;;  %v4018_v31 = vld [vmem:[#allocation8 + $0x40] sm:$0xff]  }
 0x180   :  { %v3549_v13 = vadd.f32 %v3548_v9, %v3547_v4  ;;  %v3550_v20 = vpop.f32.mrb[42].mxu1  ;;  %3599 = vmatprep.subr.bf16.mxu1 %v4018_v31 }
 0x181   :  { %v1293_v53 = vadd.f32 %v3488_v8, %v4596_v46  ;;  %v3551_v30 = vpop.f32.mrb[43].mxu1 }
 0x182   :  { %v3552_v40 = vadd.f32 %v3551_v30, %v3550_v20  ;;  %v4642_v50 = vadd.f32 %v3549_v13, %v1290_v22  ;;  %v4027_v22 = vld [vmem:[#allocation8 + $0xc0] sm:$0xff]  }
 0x183   :  { %v3489_v27 = vpop.f32.mrb[44].mxu0  ;;  %3663 = vmatprep.subr.bf16.mxu0 %v4027_v22  ;;  %v4041_v22 = vld [vmem:[#allocation8 + $0xa0] sm:$0xff]  }
 0x184   :  { %v3490_v52 = vpop.f32.mrb[45].mxu0  ;;  %v4644_v23 = vadd.f32 %v3552_v40, %v1293_v53  ;;  %v4029_v53 = vld [vmem:[#allocation8 + $0x80] sm:$0xff]  }
 0x185   :  { %v3491_v55 = vadd.f32 %v3490_v52, %v3489_v27  ;;  %v3492_v12 = vpop.f32.mrb[46].mxu0  ;;  %3664 = vmatpush3.bf16.msra.mxu0 %v4029_v53  ;;  %v4021_v52 = vld [vmem:[#allocation8 + $0x8] sm:$0xff]  }
 0x186   :  { %v3493_v26 = vpop.f32.mrb[47].mxu0  ;;  %v3553_v36 = vpop.f32.mrb[44].mxu1 }
 0x187   :  { %v1298_v45 = vadd.f32 %v3491_v55, %v4600_v29  ;;  %v3494_v14 = vadd.f32 %v3493_v26, %v3492_v12  ;;  %v3554_v21 = vpop.f32.mrb[45].mxu1  ;;  %v4030_v55 = vld [vmem:[#allocation8 + $0xc8] sm:$0xff]  }
 0x188   :  { %v3555_v28 = vadd.f32 %v3554_v21, %v3553_v36  ;;  %v3556_v56 = vpop.f32.mrb[46].mxu1  ;;  %3665 = vmatprep.subr.bf16.mxu0 %v4030_v55  ;;  %v4043_v55 = vld [vmem:[#allocation8 + $0xa8] sm:$0xff]  }
 0x189   :  { %v1301_v46 = vadd.f32 %v3494_v14, %v4602_v49  ;;  %v3557_v54 = vpop.f32.mrb[47].mxu1 }
 0x18a   :  { %v3558_v33 = vadd.f32 %v3557_v54, %v3556_v56  ;;  %v4648_v57 = vadd.f32 %v3555_v28, %v1298_v45  ;;  %v4022_v28 = vld [vmem:[#allocation8 + $0x50] sm:$0xff]  }
 0x18b   :  { %v3495_v39 = vpop.f32.mrb[48].mxu0  ;;  %v4023_v54 = vld [vmem:[#allocation8 + $0x10] sm:$0xff]  }
 0x18c   :  { %v3496_v15 = vpop.f32.mrb[49].mxu0  ;;  %v4650_v0 = vadd.f32 %v3558_v33, %v1301_v46  ;;  %v4033_v33 = vld [vmem:[#allocation8 + $0xd0] sm:$0xff]  }
 0x18d   :  { %v3497_v44 = vadd.f32 %v3496_v15, %v3495_v39  ;;  %v3498_v3 = vpop.f32.mrb[50].mxu0 }
 0x18e   :  { %v3499_v1 = vpop.f32.mrb[51].mxu0  ;;  %v3559_v25 = vpop.f32.mrb[48].mxu1 }
 0x18f   :  { %v1306_v29 = vadd.f32 %v3497_v44, %v4606_v24  ;;  %v3500_v32 = vadd.f32 %v3499_v1, %v3498_v3  ;;  %v3560_v41 = vpop.f32.mrb[49].mxu1  ;;  %v4035_v3 = vld [vmem:[#allocation8 + $0x90] sm:$0xff]  }
 0x190   :  { %v3561_v37 = vadd.f32 %v3560_v41, %v3559_v25  ;;  %v3562_v17 = vpop.f32.mrb[50].mxu1 }
 0x191   :  { %v1309_v49 = vadd.f32 %v3500_v32, %v4608_v5  ;;  %v3563_v10 = vpop.f32.mrb[51].mxu1  ;;  %v4019_v5 = vld [vmem:[#allocation8] sm:$0xff]  }
 0x192   :  { %v3564_v63 = vadd.f32 %v3563_v10, %v3562_v17  ;;  %v4654_v34 = vadd.f32 %v3561_v37, %v1306_v29  ;;  %3600 = vmatpush3.bf16.msra.mxu1 %v4019_v5  ;;  %v4036_v37 = vld [vmem:[#allocation8 + $0xd8] sm:$0xff]  }
 0x193   :  { %v3501_v11 = vpop.f32.mrb[52].mxu0 }
 0x194   :  { %v3502_v42 = vpop.f32.mrb[53].mxu0  ;;  %v4656_v38 = vadd.f32 %v3564_v63, %v1309_v49  ;;  %v4025_v49 = vld [vmem:[#allocation8 + $0x18] sm:$0xff]  }
 0x195   :  { %v3503_v51 = vadd.f32 %v3502_v42, %v3501_v11  ;;  %v3504_v60 = vpop.f32.mrb[54].mxu0 }
 0x196   :  { %v3505_v61 = vpop.f32.mrb[55].mxu0  ;;  %v3565_v18 = vpop.f32.mrb[52].mxu1 }
 0x197   :  { %v1314_v24 = vadd.f32 %v3503_v51, %v4612_v59  ;;  %v3506_v19 = vadd.f32 %v3505_v61, %v3504_v60  ;;  %v3566_v58 = vpop.f32.mrb[53].mxu1  ;;  %v4020_v59 = vld [vmem:[#allocation8 + $0x48] sm:$0xff]   ;;  %v4026_v61 = vld [vmem:[#allocation8 + $0x60] sm:$0xff]  }
 0x198   :  { %v3567_v8 = vadd.f32 %v3566_v58, %v3565_v18  ;;  %v3568_v9 = vpop.f32.mrb[54].mxu1  ;;  %3601 = vmatprep.subr.bf16.mxu1 %v4020_v59  ;;  %v4028_v18 = vld [vmem:[#allocation8 + $0x20] sm:$0xff]   ;;  %v4042_v59 = vld [vmem:[#allocation8 + $0xe8] sm:$0xff]  }
 0x199   :  { %v1317_v4 = vadd.f32 %v3506_v19, %v4614_v35  ;;  %v3569_v13 = vpop.f32.mrb[55].mxu1  ;;  %v4031_v35 = vld [vmem:[#allocation8 + $0x88] sm:$0xff]   ;;  %3602 = vmatpush3.bf16.msra.mxu1 %v4021_v52  ;;  %v4039_v19 = vld [vmem:[#allocation8 + $0xe0] sm:$0xff]  }
 0x19a   :  { %v3570_v20 = vadd.f32 %v3569_v13, %v3568_v9  ;;  %v4660_v40 = vadd.f32 %v3567_v8, %v1314_v24  ;;  %3666 = vmatpush3.bf16.msra.mxu0 %v4031_v35  ;;  %3603 = vmatprep.subr.bf16.mxu1 %v4022_v28  ;;  %v4048_v28 = vld [vmem:[#allocation8 + $0xf8] sm:$0xff]  }
 0x19b   :  { %v3507_v30 = vpop.f32.mrb[56].mxu0  ;;  %3667 = vmatprep.subr.bf16.mxu0 %v4033_v33 }
 0x19c   :  { %v3508_v27 = vpop.f32.mrb[57].mxu0  ;;  %v4662_v45 = vadd.f32 %v3570_v20, %v1317_v4 }
 0x19d   :  { %v3509_v12 = vadd.f32 %v3508_v27, %v3507_v30  ;;  %v3510_v26 = vpop.f32.mrb[58].mxu0  ;;  %3604 = vmatpush3.bf16.msra.mxu1 %v4023_v54  ;;  %v4034_v30 = vld [vmem:[#allocation8 + $0x28] sm:$0xff]  }
 0x19e   :  { %v3511_v36 = vpop.f32.mrb[59].mxu0  ;;  %v3571_v21 = vpop.f32.mrb[56].mxu1  ;;  %3668 = vmatpush3.bf16.msra.mxu0 %v4035_v3 }
 0x19f   :  { %v1322_v14 = vadd.f32 %v3509_v12, %v4618_v43  ;;  %v3512_v46 = vadd.f32 %v3511_v36, %v3510_v26  ;;  %v3572_v56 = vpop.f32.mrb[57].mxu1  ;;  %v4024_v43 = vld [vmem:[#allocation8 + $0x58] sm:$0xff]   ;;  %3669 = vmatprep.subr.bf16.mxu0 %v4036_v37  ;;  %v4040_v36 = vld [vmem:[#allocation8 + $0x30] sm:$0xff]  }
 0x1a0   :  { %v3573_v15 = vadd.f32 %v3572_v56, %v3571_v21  ;;  %v3574_v44 = vpop.f32.mrb[58].mxu1  ;;  %3605 = vmatprep.subr.bf16.mxu1 %v4024_v43  ;;  %v4045_v21 = vld [vmem:[#allocation8 + $0xf0] sm:$0xff]  }
 0x1a1   :  { %v1325_v39 = vadd.f32 %v3512_v46, %v4620_v7  ;;  %v3575_v1 = vpop.f32.mrb[59].mxu1  ;;  %v4037_v7 = vld [vmem:[#allocation8 + $0x98] sm:$0xff]   ;;  %3606 = vmatpush3.bf16.msra.mxu1 %v4025_v49 }
 0x1a2   :  { %v3576_v29 = vadd.f32 %v3575_v1, %v3574_v44  ;;  %v4666_v32 = vadd.f32 %v3573_v15, %v1322_v14  ;;  %3670 = vmatpush3.bf16.msra.mxu0 %v4037_v7  ;;  %3607 = vmatprep.subr.bf16.mxu1 %v4026_v61  ;;  %v4044_v14 = vld [vmem:[#allocation8 + $0x78] sm:$0xff]  }
 0x1a3   :  { %v3513_v25 = vpop.f32.mrb[60].mxu0  ;;  %3671 = vmatprep.subr.bf16.mxu0 %v4039_v19 }
 0x1a4   :  { %v3514_v41 = vpop.f32.mrb[61].mxu0  ;;  %v4668_v63 = vadd.f32 %v3576_v29, %v1325_v39 }
 0x1a5   :  { %v3515_v17 = vadd.f32 %v3514_v41, %v3513_v25  ;;  %v3516_v10 = vpop.f32.mrb[62].mxu0  ;;  %3608 = vmatpush3.bf16.msra.mxu1 %v4028_v18  ;;  %v4050_v41 = vld [vmem:[#allocation8 + $0x140] sm:$0xff]  }
 0x1a6   :  { %v3517_v11 = vpop.f32.mrb[63].mxu0  ;;  %v3577_v51 = vpop.f32.mrb[60].mxu1  ;;  %3672 = vmatpush3.bf16.msra.mxu0 %v4041_v22 }
 0x1a7   :  { %v1330_v42 = vadd.f32 %v3515_v17, %v4624_v16  ;;  %v3518_v60 = vadd.f32 %v3517_v11, %v3516_v10  ;;  %v3578_v24 = vpop.f32.mrb[61].mxu1  ;;  %v4032_v16 = vld [vmem:[#allocation8 + $0x68] sm:$0xff]   ;;  %3673 = vmatprep.subr.bf16.mxu0 %v4042_v59 }
 0x1a8   :  { %v3579_v58 = vadd.f32 %v3578_v24, %v3577_v51  ;;  %v3580_v5 = vpop.f32.mrb[62].mxu1  ;;  %3609 = vmatprep.subr.bf16.mxu1 %v4032_v16 }
 0x1a9   :  { %v1333_v31 = vadd.f32 %v3518_v60, %v4626_v48  ;;  %v3581_v4 = vpop.f32.mrb[63].mxu1  ;;  %3610 = vmatpush3.bf16.msra.mxu1 %v4034_v30 }
 0x1aa   :  { %v3582_v8 = vadd.f32 %v3581_v4, %v3580_v5  ;;  %v4672_v53 = vadd.f32 %v3579_v58, %v1330_v42  ;;  %3674 = vmatpush3.bf16.msra.mxu0 %v4043_v55 }
 0x1ab   :  { %v3889_v9 = vpop.f32.mrb[64].mxu0  ;;  %3675 = vmatprep.subr.bf16.mxu0 %v4045_v21 }
 0x1ac   :  { %v4675_v13 = vadd.f32 %v3889_v9, %v4636_v6  ;;  %v1467_v20 = vpop.f32.mrb[65].mxu0  ;;  %v1430_v52 = vadd.f32 %v3582_v8, %v1333_v31  ;;  %v4038_v6 = vld [vmem:[#allocation8 + $0x70] sm:$0xff]  }
 0x1ad   :  { %v4678_v48 = vadd.f32 %v1467_v20, %v4630_v2  ;;  %v3890_v27 = vpop.f32.mrb[66].mxu0  ;;  %v4047_v2 = vld [vmem:[#allocation8 + $0xb0] sm:$0xff]   ;;  %3611 = vmatprep.subr.bf16.mxu1 %v4038_v6 }
 0x1ae   :  { %v4681_v12 = vadd.f32 %v3890_v27, %v4638_v47  ;;  %v1470_v26 = vpop.f32.mrb[67].mxu0  ;;  %3612 = vmatpush3.bf16.msra.mxu1 %v4040_v36  ;;  %v4046_v47 = vld [vmem:[#allocation8 + $0x38] sm:$0xff]   ;;  %3676 = vmatpush3.bf16.msra.mxu0 %v4047_v2  ;;  %v4059_v27 = vld [vmem:[#allocation8 + $0x1c0] sm:$0xff]  }
 0x1af   :  { %v4684_v35 = vadd.f32 %v1470_v26, %v4632_v62  ;;  %3613 = vmatprep.subr.bf16.mxu1 %v4044_v14  ;;  %v4049_v62 = vld [vmem:[#allocation8 + $0xb8] sm:$0xff]   ;;  %3677 = vmatprep.subr.bf16.mxu0 %v4048_v28 }
 0x1b1   :  { %v1530_v46 = vadd.f32 %v4684_v35, %v4678_v48 }
 0x1b2   :  { %3614 = vmatpush3.bf16.msra.mxu1 %v4046_v47  ;;  %3678 = vmatpush3.bf16.msra.mxu0 %v4049_v62 }
 0x1b3   :  { %v1531_v56 = vadd.f32 %v1530_v46, %v4675_v13  ;;  %v3893_v54 = vpop.f32.mrb[68].mxu0  ;;  %3727 = vmatprep.subr.bf16.mxu1 %v4050_v41  ;;  %3791 = vmatprep.subr.bf16.mxu0 %v4059_v27 }
 0x1b4   :  { %v1492_v33 = vadd.f32 %v3893_v54, %v4648_v57  ;;  %v1483_v39 = vpop.f32.mrb[69].mxu0 }
 0x1b5   :  { %v1484_v15 = vadd.f32 %v1483_v39, %v4642_v50  ;;  %v1532_v44 = vadd.f32 %v1531_v56, %v4681_v12  ;;  %v3894_v3 = vpop.f32.mrb[70].mxu0 }
 0x1b6   :  { %v1495_v1 = vadd.f32 %v3894_v3, %v4650_v0  ;;  %v1486_v29 = vpop.f32.mrb[71].mxu0 }
 0x1b7   :  { %v1533_v25 = vadd.f32 %v1532_v44, %v1484_v15  ;;  %v1487_v43 = vadd.f32 %v1486_v29, %v4644_v23 }
 0x1b9   :  { %v1534_v49 = vadd.f32 %v1533_v25, %v1487_v43 }
 0x1bb   :  { %v1535_v37 = vadd.f32 %v1534_v49, %v1492_v33  ;;  %v3897_v57 = vpop.f32.mrb[72].mxu0 }
 0x1bc   :  { %v1508_v17 = vadd.f32 %v3897_v57, %v4660_v40  ;;  %v1499_v10 = vpop.f32.mrb[73].mxu0 }
 0x1bd   :  { %v1500_v50 = vadd.f32 %v1499_v10, %v4654_v34  ;;  %v1536_v7 = vadd.f32 %v1535_v37, %v1495_v1  ;;  %v3898_v11 = vpop.f32.mrb[74].mxu0 }
 0x1be   :  { %v1511_v0 = vadd.f32 %v3898_v11, %v4662_v45  ;;  %v1502_v42 = vpop.f32.mrb[75].mxu0 }
 0x1bf   :  { %v1537_v51 = vadd.f32 %v1536_v7, %v1500_v50  ;;  %v1503_v60 = vadd.f32 %v1502_v42, %v4656_v38 }
 0x1c1   :  { %v1538_v23 = vadd.f32 %v1537_v51, %v1503_v60 }
 0x1c3   :  { %v1539_v61 = vadd.f32 %v1538_v23, %v1508_v17  ;;  %v3901_v24 = vpop.f32.mrb[76].mxu0 }
 0x1c4   :  { %v1524_v18 = vadd.f32 %v3901_v24, %v4672_v53  ;;  %v1515_v19 = vpop.f32.mrb[77].mxu0 }
 0x1c5   :  { %v1516_v31 = vadd.f32 %v1515_v19, %v4666_v32  ;;  %v1540_v40 = vadd.f32 %v1539_v61, %v1511_v0  ;;  %v3902_v58 = vpop.f32.mrb[78].mxu0 }
 0x1c6   :  { %v1527_v5 = vadd.f32 %v3902_v58, %v1430_v52  ;;  %v1518_v34 = vpop.f32.mrb[79].mxu0 }
 0x1c7   :  { %v1541_v22 = vadd.f32 %v1540_v40, %v1516_v31  ;;  %v1519_v4 = vadd.f32 %v1518_v34, %v4668_v63 }
 0x1c9   :  { %v1542_v45 = vadd.f32 %v1541_v22, %v1519_v4 }
 0x1cb   :  { %v1543_v8 = vadd.f32 %v1542_v45, %v1524_v18 }
 0x1cd   :  { %v1544_v9 = vadd.f32 %v1543_v8, %v1527_v5 }
 0x1cf   :  { %v1545_v16 = vrot.slane %v1544_v9, 4 }
 0x1d1   :  { %v1546_v38 = vadd.f32 %v1545_v16, %v1544_v9 }
 0x1d3   :  { %v1547_v20 = vrot.slane %v1546_v38, 2 }
 0x1d5   :  { %v1548_v30 = vadd.f32 %v1547_v20, %v1546_v38 }
 0x1d7   :  { %v1549_v59 = vrot.slane %v1548_v30, 1 }
 0x1d9   :  { %v1550_v53 = vadd.f32 %v1549_v59, %v1548_v30 }
 0x1db   :  { %v1552_v55 = vmul.f32 0.0078125, %v1550_v53 }
 0x1dd   :  { %v1553_v32 = vsub.f32 %v4678_v48, %v1552_v55  ;;  %v1554_v52 = vsub.f32 %v4684_v35, %v1552_v55  ;;  %v1555_v26 = vsub.f32 %v4675_v13, %v1552_v55  ;;  %v1556_v63 = vsub.f32 %v4681_v12, %v1552_v55 }
 0x1de   :  { %v1557_v6 = vsub.f32 %v1484_v15, %v1552_v55  ;;  %v1558_v36 = vsub.f32 %v1487_v43, %v1552_v55  ;;  %v1559_v14 = vsub.f32 %v1492_v33, %v1552_v55  ;;  %v1560_v21 = vsub.f32 %v1495_v1, %v1552_v55 }
 0x1df   :  { %v1561_v2 = vsub.f32 %v1500_v50, %v1552_v55  ;;  %v1562_v46 = vsub.f32 %v1503_v60, %v1552_v55  ;;  %v1563_v28 = vsub.f32 %v1508_v17, %v1552_v55  ;;  %v1564_v47 = vsub.f32 %v1511_v0, %v1552_v55 }
 0x1e0   :  { %v1565_v56 = vsub.f32 %v1516_v31, %v1552_v55  ;;  %v1566_v54 = vsub.f32 %v1519_v4, %v1552_v55  ;;  %v1567_v62 = vsub.f32 %v1524_v18, %v1552_v55  ;;  %v1568_v39 = vsub.f32 %v1527_v5, %v1552_v55 }
 0x1e1   :  { %v1569_v44 = vmul.f32 %v1553_v32, %v1553_v32  ;;  %v1570_v48 = vmul.f32 %v1554_v52, %v1554_v52  ;;  %v1571_v3 = vmul.f32 %v1555_v26, %v1555_v26  ;;  %v1572_v29 = vmul.f32 %v1556_v63, %v1556_v63 }
 0x1e2   :  { %v1573_v25 = vmul.f32 %v1557_v6, %v1557_v6  ;;  %v1574_v15 = vmul.f32 %v1558_v36, %v1558_v36  ;;  %v1575_v33 = vmul.f32 %v1559_v14, %v1559_v14  ;;  %v1576_v41 = vmul.f32 %v1560_v21, %v1560_v21 }
 0x1e3   :  { %v1585_v35 = vadd.f32 %v1570_v48, %v1569_v44  ;;  %v1577_v37 = vmul.f32 %v1561_v2, %v1561_v2  ;;  %v1578_v17 = vmul.f32 %v1562_v46, %v1562_v46  ;;  %v1579_v50 = vmul.f32 %v1563_v28, %v1563_v28  ;;  %v3250_v44 = vld [vmem:[%s5057_s3] ss:$0 sm:$0xff] }
 0x1e4   :  { %v1580_v11 = vmul.f32 %v1564_v47, %v1564_v47  ;;  %v1581_v42 = vmul.f32 %v1565_v56, %v1565_v56  ;;  %v1582_v60 = vmul.f32 %v1566_v54, %v1566_v54  ;;  %v1583_v61 = vmul.f32 %v1567_v62, %v1567_v62 }
 0x1e5   :  { %v1586_v13 = vadd.f32 %v1585_v35, %v1571_v3  ;;  %v1584_v18 = vmul.f32 %v1568_v39, %v1568_v39 }
 0x1e7   :  { %v1587_v12 = vadd.f32 %v1586_v13, %v1572_v29 }
 0x1e9   :  { %v1588_v43 = vadd.f32 %v1587_v12, %v1573_v25 }
 0x1eb   :  { %v1589_v1 = vadd.f32 %v1588_v43, %v1574_v15  ;;  %v3251_v43 = vld [vmem:[%s5058_s4] ss:$0 sm:$0xff] }
 0x1ed   :  { %v1590_v49 = vadd.f32 %v1589_v1, %v1575_v33 }
 0x1ef   :  { %v1591_v57 = vadd.f32 %v1590_v49, %v1576_v41 }
 0x1f1   :  { %v1592_v10 = vadd.f32 %v1591_v57, %v1577_v37 }
 0x1f3   :  { %v1593_v7 = vadd.f32 %v1592_v10, %v1578_v17 }
 0x1f5   :  { %v1594_v0 = vadd.f32 %v1593_v7, %v1579_v50 }
 0x1f7   :  { %v1595_v51 = vadd.f32 %v1594_v0, %v1580_v11 }
 0x1f9   :  { %v1596_v23 = vadd.f32 %v1595_v51, %v1581_v42 }
 0x1fb   :  { %v1597_v24 = vadd.f32 %v1596_v23, %v1582_v60 }
 0x1fd   :  { %v1598_v19 = vadd.f32 %v1597_v24, %v1583_v61 }
 0x1ff   :  { %v1599_v31 = vadd.f32 %v1598_v19, %v1584_v18 }
 0x201   :  { %v1600_v40 = vrot.slane %v1599_v31, 4 }
 0x203   :  { %v1601_v58 = vadd.f32 %v1600_v40, %v1599_v31 }
 0x205   :  { %v1602_v5 = vrot.slane %v1601_v58, 2 }
 0x207   :  { %v1603_v34 = vadd.f32 %v1602_v5, %v1601_v58 }
 0x209   :  { %v1604_v22 = vrot.slane %v1603_v34, 1 }
 0x20b   :  { %v1605_v4 = vadd.f32 %v1604_v22, %v1603_v34  ;;  %v1719_v34 = vld [vmem:[#allocation2 + $0x1] sm:$0xff] }
 0x20d   :  { %v1606_v45 = vmul.f32 0.0078125, %v1605_v4 }
 0x20f   :  { %v1607_v8 = vadd.f32 1e-05, %v1606_v45 }
 0x211   :  { %4090 = vrsqrt.f32 %v1607_v8 }
 0x21b   :  { %v4091_v9 = vpop.eup %4090 }
 0x21c   :  { %v1609_v16 = vmul.f32 %v4091_v9, %v1553_v32  ;;  %v1610_v38 = vmul.f32 %v4091_v9, %v1554_v52  ;;  %v1611_v20 = vmul.f32 %v4091_v9, %v1555_v26  ;;  %v1612_v30 = vmul.f32 %v4091_v9, %v1556_v63 }
 0x21d   :  { %v1613_v59 = vmul.f32 %v4091_v9, %v1557_v6  ;;  %v1614_v27 = vmul.f32 %v4091_v9, %v1558_v36  ;;  %v1615_v53 = vmul.f32 %v4091_v9, %v1559_v14  ;;  %v1616_v55 = vmul.f32 %v4091_v9, %v1560_v21 }
 0x21e   :  { %v1617_v48 = vmul.f32 %v4091_v9, %v1561_v2  ;;  %v1618_v3 = vmul.f32 %v4091_v9, %v1562_v46  ;;  %v1619_v35 = vmul.f32 %v4091_v9, %v1563_v28  ;;  %v1620_v29 = vmul.f32 %v4091_v9, %v1564_v47 }
 0x21f   :  { %v1621_v13 = vmul.f32 %v4091_v9, %v1565_v56  ;;  %v1622_v25 = vmul.f32 %v4091_v9, %v1566_v54  ;;  %v1623_v12 = vmul.f32 %v4091_v9, %v1567_v62  ;;  %v1624_v15 = vmul.f32 %v4091_v9, %v1568_v39 }
 0x220   :  { %v1632_v32 = vmul.f32 %v3250_v44, %v1609_v16  ;;  %v1633_v52 = vmul.f32 %v3250_v44, %v1610_v38  ;;  %v1634_v26 = vmul.f32 %v3250_v44, %v1611_v20  ;;  %v1635_v63 = vmul.f32 %v3250_v44, %v1612_v30 }
 0x221   :  { %v1636_v6 = vmul.f32 %v3250_v44, %v1613_v59  ;;  %v1637_v36 = vmul.f32 %v3250_v44, %v1614_v27  ;;  %v1638_v14 = vmul.f32 %v3250_v44, %v1615_v53  ;;  %v1639_v21 = vmul.f32 %v3250_v44, %v1616_v55 }
 0x222   :  { %v1640_v2 = vmul.f32 %v3250_v44, %v1617_v48  ;;  %v1641_v46 = vmul.f32 %v3250_v44, %v1618_v3  ;;  %v1642_v28 = vmul.f32 %v3250_v44, %v1619_v35  ;;  %v1643_v47 = vmul.f32 %v3250_v44, %v1620_v29 }
 0x223   :  { %v1644_v56 = vmul.f32 %v3250_v44, %v1621_v13  ;;  %v1645_v54 = vmul.f32 %v3250_v44, %v1622_v25  ;;  %v1646_v62 = vmul.f32 %v3250_v44, %v1623_v12  ;;  %v1647_v39 = vmul.f32 %v3250_v44, %v1624_v15  ;;  %v1735_v13 = vld [vmem:[#allocation2 + $0x2] sm:$0xff] }
 0x224   :  { %v1655_v33 = vadd.f32 %v3251_v43, %v1632_v32  ;;  %v1656_v1 = vadd.f32 %v3251_v43, %v1633_v52  ;;  %v1657_v41 = vadd.f32 %v3251_v43, %v1634_v26  ;;  %v1658_v49 = vadd.f32 %v3251_v43, %v1635_v63 }
 0x225   :  { %v1659_v37 = vadd.f32 %v3251_v43, %v1636_v6  ;;  %v1660_v57 = vadd.f32 %v3251_v43, %v1637_v36  ;;  %v1661_v17 = vadd.f32 %v3251_v43, %v1638_v14  ;;  %v1662_v10 = vadd.f32 %v3251_v43, %v1639_v21  ;;  %v4783_v6 = vld [vmem:[#allocation2] sm:$0xff] }
 0x226   :  { %v1663_v50 = vadd.f32 %v3251_v43, %v1640_v2  ;;  %v1664_v7 = vadd.f32 %v3251_v43, %v1641_v46  ;;  %v1665_v11 = vadd.f32 %v3251_v43, %v1642_v28  ;;  %v1666_v0 = vadd.f32 %v3251_v43, %v1643_v47  ;;  %v4051_v2 = vld [vmem:[#allocation8 + $0x100] sm:$0xff]   ;;  %v4052_v46 = vld [vmem:[#allocation8 + $0x148] sm:$0xff]  }
 0x227   :  { %v1667_v42 = vadd.f32 %v3251_v43, %v1644_v56  ;;  %v1668_v51 = vadd.f32 %v3251_v43, %v1645_v54  ;;  %v1669_v60 = vadd.f32 %v3251_v43, %v1646_v62  ;;  %v1670_v23 = vadd.f32 %v3251_v43, %v1647_v39  ;;  %v4061_v28 = vld [vmem:[#allocation8 + $0x180] sm:$0xff]   ;;  %v4062_v56 = vld [vmem:[#allocation8 + $0x1c8] sm:$0xff]   ;;  %v4054_v62 = vld [vmem:[#allocation8 + $0x150] sm:$0xff]  }
 0x228   :  { %v4711_v61 = vmax.f32 %v1655_v33, 0.0  ;;  %v4713_v24 = vmax.f32 %v1656_v1, 0.0  ;;  %v4715_v18 = vmax.f32 %v1657_v41, 0.0  ;;  %v4717_v19 = vmax.f32 %v1658_v49, 0.0  ;;  %v4053_v54 = vld [vmem:[#allocation8 + $0x108] sm:$0xff]   ;;  %v4065_v41 = vld [vmem:[#allocation8 + $0x1d0] sm:$0xff]  }
 0x229   :  { %v4719_v31 = vmax.f32 %v1659_v37, 0.0  ;;  %v4721_v40 = vmax.f32 %v1660_v57, 0.0  ;;  %v4723_v58 = vmax.f32 %v1661_v17, 0.0  ;;  %v4725_v5 = vmax.f32 %v1662_v10, 0.0  ;;  %v4063_v39 = vld [vmem:[#allocation8 + $0x188] sm:$0xff]   ;;  %v4055_v17 = vld [vmem:[#allocation8 + $0x110] sm:$0xff]  }
 0x22a   :  { %v4727_v22 = vmax.f32 %v1663_v50, 0.0  ;;  %v4729_v4 = vmax.f32 %v1664_v7, 0.0  ;;  %v4731_v45 = vmax.f32 %v1665_v11, 0.0  ;;  %v4733_v8 = vmax.f32 %v1666_v0, 0.0  ;;  %1687 = vst [vmem:[#allocation2 + $0x11] sm:$0xff] %v4711_v61  ;;  %1688 = vst [vmem:[#allocation2 + $0x21] sm:$0xff] %v4713_v24 }
 0x22b   :  { %1689 = vst [vmem:[#allocation2 + $0x31] sm:$0xff] %v4715_v18  ;;  %1690 = vst [vmem:[#allocation2 + $0x41] sm:$0xff] %v4717_v19  ;;  %v1683_v9 = vmax.f32 %v1667_v42, 0.0  ;;  %v1684_v16 = vmax.f32 %v1668_v51, 0.0  ;;  %v1685_v38 = vmax.f32 %v1669_v60, 0.0  ;;  %v1686_v20 = vmax.f32 %v1670_v23, 0.0 }
 0x22c   :  { %1691 = vst [vmem:[#allocation2 + $0x51] sm:$0xff] %v4719_v31  ;;  %1692 = vst [vmem:[#allocation2 + $0x61] sm:$0xff] %v4721_v40  ;;  %v1848_v30 = vpack.c.bf16 %v4711_v61, %v1719_v34  ;;  %v4750_v59 = vpack.c.bf16 %v4715_v18, %v4713_v24  ;;  %v4754_v27 = vpack.c.bf16 %v4719_v31, %v4717_v19  ;;  %v4056_v50 = vld [vmem:[#allocation8 + $0x158] sm:$0xff]   ;;  %v4067_v7 = vld [vmem:[#allocation8 + $0x190] sm:$0xff]  }
 0x22d   :  { %1693 = vst [vmem:[#allocation2 + $0x71] sm:$0xff] %v4723_v58  ;;  %1694 = vst [vmem:[#allocation2 + $0x81] sm:$0xff] %v4725_v5  ;;  %v4758_v53 = vpack.c.bf16 %v4723_v58, %v4721_v40  ;;  %v4762_v55 = vpack.c.bf16 %v4731_v45, %v4729_v4  ;;  %v4765_v44 = vpack.c.bf16 %v1683_v9, %v4733_v8  ;;  %v4068_v0 = vld [vmem:[#allocation8 + $0x1d8] sm:$0xff]   ;;  %v4058_v51 = vld [vmem:[#allocation8 + $0x160] sm:$0xff]  }
 0x22e   :  { %1695 = vst [vmem:[#allocation2 + $0xb1] sm:$0xff] %v4727_v22  ;;  %1696 = vst [vmem:[#allocation2 + $0xc1] sm:$0xff] %v4729_v4  ;;  %v4767_v48 = vpack.c.bf16 %v1685_v38, %v1684_v16  ;;  %2534 = vmatprep.mubr.bf16.mxu1 %v1848_v30  ;;  %v1851_v3 = vpack.c.bf16 %v4713_v24, %v4711_v61  ;;  %v1860_v35 = vpack.c.bf16 %v4717_v19, %v4715_v18  ;;  %v4057_v42 = vld [vmem:[#allocation8 + $0x118] sm:$0xff]   ;;  %v4060_v30 = vld [vmem:[#allocation8 + $0x120] sm:$0xff]  }
 0x22f   :  { %1697 = vst [vmem:[#allocation2 + $0xd1] sm:$0xff] %v4731_v45  ;;  %1698 = vst [vmem:[#allocation2 + $0xe1] sm:$0xff] %v4733_v8  ;;  %v1869_v29 = vpack.c.bf16 %v4721_v40, %v4719_v31  ;;  %v1878_v25 = vpack.c.bf16 %v4725_v5, %v4723_v58  ;;  %v1887_v12 = vpack.c.bf16 %v4729_v4, %v4727_v22  ;;  %v4069_v60 = vld [vmem:[#allocation8 + $0x198] sm:$0xff]   ;;  %v4086_v61 = vld [vmem:[#allocation8 + $0x220] sm:$0xff]  }
 0x230   :  { %1699 = vst [vmem:[#allocation2 + $0xf1] sm:$0xff] %v1683_v9  ;;  %1700 = vst [vmem:[#allocation2 + $0x101] sm:$0xff] %v1684_v16  ;;  %v1896_v15 = vpack.c.bf16 %v4733_v8, %v4731_v45  ;;  %v4071_v9 = vld [vmem:[#allocation8 + $0x1e0] sm:$0xff]   ;;  %v4088_v19 = vld [vmem:[#allocation8 + $0x230] sm:$0xff]  }
 0x231   :  { %1701 = vst [vmem:[#allocation2 + $0x111] sm:$0xff] %v1685_v38  ;;  %1702 = vst [vmem:[#allocation2 + $0x121] sm:$0xff] %v1686_v20  ;;  %v1751_v32 = vld [vmem:[#allocation2 + $0x10] sm:$0xff]  ;;  %v1752_v52 = vld [vmem:[#allocation2 + $0x20] sm:$0xff] }
 0x232   :  { %v4781_v26 = vld [vmem:[#allocation2 + $0x12] sm:$0xff]  ;;  %v1850_v63 = vpack.c.bf16 %v1752_v52, %v1751_v32  ;;  %v1847_v36 = vpack.c.bf16 %v1751_v32, %v4783_v6  ;;  %v1754_v43 = vld [vmem:[#allocation2 + $0x40] sm:$0xff]  ;;  %v4064_v32 = vld [vmem:[#allocation8 + $0x168] sm:$0xff]  }
 0x233   :  { %v1849_v14 = vpack.c.bf16 %v4781_v26, %v1735_v13  ;;  %v1753_v21 = vld [vmem:[#allocation2 + $0x30] sm:$0xff]  ;;  %v4788_v33 = vld [vmem:[#allocation2 + $0x22] sm:$0xff] }
 0x234   :  { %2631 = vmatprep.mubr.bf16.mxu0 %v1850_v63  ;;  %2535 = vmatmul.mubr.bf16.vlgmr.msra.gmra.mrb[64].mxu1 %v1847_v36  ;;  %v1859_v47 = vpack.c.bf16 %v1754_v43, %v1753_v21  ;;  %v4790_v1 = vld [vmem:[#allocation2 + $0x32] sm:$0xff]  ;;  %v1756_v37 = vld [vmem:[#allocation2 + $0x60] sm:$0xff]  ;;  %v4792_v57 = vpack.c.bf16 %v1753_v21, %v1752_v52  ;;  %v4074_v36 = vld [vmem:[#allocation8 + $0x1e8] sm:$0xff]  }
 0x235   :  { %2632 = vmatmul.mubr.bf16.vlgmr.msra.gmra.mrb[80].mxu0 %v1849_v14  ;;  %2542 = vmatprep.mubr.bf16.mxu1 %v4750_v59  ;;  %v1755_v49 = vld [vmem:[#allocation2 + $0x50] sm:$0xff]  ;;  %v4796_v10 = vpack.c.bf16 %v4790_v1, %v4788_v33  ;;  %v4801_v23 = vld [vmem:[#allocation2 + $0x42] sm:$0xff] }
 0x236   :  { %2639 = vmatprep.mubr.bf16.mxu0 %v1859_v47  ;;  %3728 = vmatpush3.bf16.msra.mxu1 %v4051_v2  ;;  %v1868_v11 = vpack.c.bf16 %v1756_v37, %v1755_v49  ;;  %v4803_v34 = vld [vmem:[#allocation2 + $0x52] sm:$0xff]  ;;  %v4805_v38 = vld [vmem:[#allocation2 + $0x80] sm:$0xff]  ;;  %v4807_v20 = vpack.c.bf16 %v1755_v49, %v1754_v43  ;;  %v4066_v14 = vld [vmem:[#allocation8 + $0x128] sm:$0xff]  }
 0x237   :  { %3729 = vmatprep.subr.bf16.mxu1 %v4052_v46  ;;  %3792 = vmatpush3.bf16.msra.mxu0 %v4061_v28  ;;  %v1757_v16 = vld [vmem:[#allocation2 + $0x70] sm:$0xff]  ;;  %v4811_v13 = vpack.c.bf16 %v4803_v34, %v4801_v23  ;;  %v4073_v52 = vld [vmem:[#allocation8 + $0x1a0] sm:$0xff]   ;;  %v4075_v2 = vld [vmem:[#allocation8 + $0x1a8] sm:$0xff]  }
 0x238   :  { %3793 = vmatprep.subr.bf16.mxu0 %v4062_v56  ;;  %v1877_v63 = vpack.c.bf16 %v4805_v38, %v1757_v16  ;;  %v1727_v21 = vld [vmem:[#allocation2 + $0xa1] sm:$0xff]  ;;  %v4070_v43 = vld [vmem:[#allocation8 + $0x170] sm:$0xff]  }
 0x239   :  { %v4817_v46 = vld [vmem:[#allocation2 + $0x62] sm:$0xff]  ;;  %v4819_v28 = vld [vmem:[#allocation2 + $0x72] sm:$0xff]  ;;  %v1884_v49 = vpack.c.bf16 %v4727_v22, %v1727_v21 }
 0x23a   :  { %3730 = vmatpush3.bf16.msra.mxu1 %v4053_v54  ;;  %v4077_v47 = vld [vmem:[#allocation8 + $0x1f0] sm:$0xff]   ;;  %v1760_v54 = vld [vmem:[#allocation2 + $0xc0] sm:$0xff] }
 0x23b   :  { %3731 = vmatprep.subr.bf16.mxu1 %v4054_v62  ;;  %3794 = vmatpush3.bf16.msra.mxu0 %v4063_v39  ;;  %v1759_v56 = vld [vmem:[#allocation2 + $0xb0] sm:$0xff]  ;;  %v4821_v62 = vpack.c.bf16 %v1757_v16, %v1756_v37  ;;  %v4078_v37 = vld [vmem:[#allocation8 + $0x138] sm:$0xff]   ;;  %v1762_v16 = vld [vmem:[#allocation2 + $0xe0] sm:$0xff] }
 0x23c   :  { %2543 = vmatmul.mubr.bf16.gmra.mrb[68].mxu1 %v4792_v57  ;;  %3795 = vmatprep.subr.bf16.mxu0 %v4065_v41  ;;  %v4072_v39 = vld [vmem:[#allocation8 + $0x130] sm:$0xff]   ;;  %v4825_v41 = vpack.c.bf16 %v4819_v28, %v4817_v46  ;;  %v1764_v21 = vld [vmem:[#allocation2 + $0x100] sm:$0xff] }
 0x23d   :  { %2640 = vmatmul.mubr.bf16.gmra.mrb[84].mxu0 %v4796_v10  ;;  %2550 = vmatprep.mubr.bf16.mxu1 %v4754_v27  ;;  %v1790_v24 = vld [vmem:[#allocation2 + $0x82] sm:$0xff]  ;;  %v1828_v58 = vld [vmem:[#allocation2 + $0x111] sm:$0xff] }
 0x23e   :  { %2647 = vmatprep.mubr.bf16.mxu0 %v1868_v11  ;;  %3732 = vmatpush3.bf16.msra.mxu1 %v4055_v17  ;;  %v4076_v17 = vld [vmem:[#allocation8 + $0x178] sm:$0xff]   ;;  %v1827_v40 = vld [vmem:[#allocation2 + $0x101] sm:$0xff] }
 0x23f   :  { %3733 = vmatprep.subr.bf16.mxu1 %v4056_v50  ;;  %3796 = vmatpush3.bf16.msra.mxu0 %v4067_v7  ;;  %v4079_v50 = vld [vmem:[#allocation8 + $0x1b0] sm:$0xff]   ;;  %v1886_v7 = vpack.c.bf16 %v1760_v54, %v1759_v56  ;;  %v4080_v11 = vld [vmem:[#allocation8 + $0x1f8] sm:$0xff]   ;;  %v1798_v4 = vld [vmem:[#allocation2 + $0x122] sm:$0xff] }
 0x240   :  { %3797 = vmatprep.subr.bf16.mxu0 %v4068_v0  ;;  %v4081_v0 = vld [vmem:[#allocation8 + $0x1b8] sm:$0xff]  }
 0x241   :  { %v1779_v22 = vld [vmem:[#allocation2 + $0xf1] sm:$0xff] }
 0x242   :  { %3734 = vmatpush3.bf16.msra.mxu1 %v4057_v42  ;;  %v4082_v42 = vld [vmem:[#allocation8 + $0x200] sm:$0xff]  }
 0x243   :  { %3735 = vmatprep.subr.bf16.mxu1 %v4058_v51  ;;  %3798 = vmatpush3.bf16.msra.mxu0 %v4069_v60  ;;  %v1743_v51 = vld [vmem:[#allocation2 + $0xa2] sm:$0xff]  ;;  %v4830_v60 = vld [vmem:[#allocation2 + $0xb2] sm:$0xff] }
 0x244   :  { %2551 = vmatmul.mubr.bf16.gmra.mrb[72].mxu1 %v4807_v20  ;;  %3799 = vmatprep.subr.bf16.mxu0 %v4071_v9  ;;  %v1761_v9 = vld [vmem:[#allocation2 + $0xd0] sm:$0xff] }
 0x245   :  { %2648 = vmatmul.mubr.bf16.gmra.mrb[88].mxu0 %v4811_v13  ;;  %2558 = vmatprep.mubr.bf16.mxu1 %v4758_v53 }
 0x246   :  { %2655 = vmatprep.mubr.bf16.mxu0 %v1877_v63  ;;  %3736 = vmatpush3.bf16.msra.mxu1 %v4060_v30  ;;  %v1883_v30 = vpack.c.bf16 %v1759_v56, %v4783_v6  ;;  %v4835_v63 = vld [vmem:[#allocation2 + $0xc2] sm:$0xff] }
 0x247   :  { %3737 = vmatprep.subr.bf16.mxu1 %v4064_v32  ;;  %3800 = vmatpush3.bf16.msra.mxu0 %v4073_v52  ;;  %v1885_v32 = vpack.c.bf16 %v4830_v60, %v1743_v51  ;;  %v1895_v52 = vpack.c.bf16 %v1762_v16, %v1761_v9  ;;  %v4848_v56 = vld [vmem:[#allocation2 + $0xe2] sm:$0xff] }
 0x248   :  { %3801 = vmatprep.subr.bf16.mxu0 %v4074_v36  ;;  %v4837_v36 = vld [vmem:[#allocation2 + $0xd2] sm:$0xff] }
 0x249   :  { %v1897_v31 = vpack.c.bf16 %v4848_v56, %v4837_v36 }
 0x24a   :  { %3738 = vmatpush3.bf16.msra.mxu1 %v4066_v14  ;;  %v1763_v14 = vld [vmem:[#allocation2 + $0xf0] sm:$0xff] }
 0x24b   :  { %3739 = vmatprep.subr.bf16.mxu1 %v4070_v43  ;;  %3802 = vmatpush3.bf16.msra.mxu0 %v4075_v2  ;;  %v4839_v43 = vpack.c.bf16 %v1761_v9, %v1760_v54  ;;  %v4843_v2 = vpack.c.bf16 %v4837_v36, %v4835_v63  ;;  %v4854_v54 = vpack.c.bf16 %v1763_v14, %v1762_v16  ;;  %v4083_v16 = vld [vmem:[#allocation8 + $0x208] sm:$0xff]  }
 0x24c   :  { %2559 = vmatmul.mubr.bf16.gmra.mrb[76].mxu1 %v4821_v62  ;;  %3803 = vmatprep.subr.bf16.mxu0 %v4077_v47  ;;  %v1904_v47 = vpack.c.bf16 %v1764_v21, %v1763_v14  ;;  %v1852_v9 = vpack.c.bf16 %v4788_v33, %v4781_v26  ;;  %v4084_v26 = vld [vmem:[#allocation8 + $0x210] sm:$0xff]   ;;  %v4085_v33 = vld [vmem:[#allocation8 + $0x218] sm:$0xff]  }
 0x24d   :  { %2656 = vmatmul.mubr.bf16.gmra.mrb[92].mxu0 %v4825_v41  ;;  %2566 = vmatprep.mubr.bf16.mxu1 %v1884_v49  ;;  %v1765_v49 = vld [vmem:[#allocation2 + $0x110] sm:$0xff] }
 0x24e   :  { %2663 = vmatprep.mubr.bf16.mxu0 %v1886_v7  ;;  %3740 = vmatpush3.bf16.msra.mxu1 %v4072_v39  ;;  %v4850_v39 = vld [vmem:[#allocation2 + $0xf2] sm:$0xff] }
 0x24f   :  { %3741 = vmatprep.subr.bf16.mxu1 %v4076_v17  ;;  %3804 = vmatpush3.bf16.msra.mxu0 %v4079_v50  ;;  %v4852_v17 = vld [vmem:[#allocation2 + $0x120] sm:$0xff]  ;;  %v4858_v50 = vpack.c.bf16 %v4850_v39, %v4848_v56 }
 0x250   :  { %3805 = vmatprep.subr.bf16.mxu0 %v4080_v11  ;;  %v1913_v7 = vpack.c.bf16 %v4852_v17, %v1765_v49  ;;  %v4864_v11 = vld [vmem:[#allocation2 + $0x102] sm:$0xff]  ;;  %v1916_v8 = vpack.c.bf16 %v4783_v6, %v4852_v17 }
 0x252   :  { %3742 = vmatpush3.bf16.msra.mxu1 %v4078_v37  ;;  %v4866_v37 = vld [vmem:[#allocation2 + $0x112] sm:$0xff] }
 0x253   :  { %3806 = vmatpush3.bf16.msra.mxu0 %v4081_v0  ;;  %3903 = vmatprep.subr.bf16.mxu1 %v4082_v42  ;;  %v4868_v0 = vpack.c.bf16 %v1765_v49, %v1764_v21  ;;  %v4872_v51 = vpack.c.bf16 %v4866_v37, %v4864_v11 }
 0x254   :  { %2567 = vmatmul.mubr.bf16.gmra.mrb[80].mxu1 %v1883_v30 }
 0x255   :  { %2664 = vmatmul.mubr.bf16.gmra.mrb[96].mxu0 %v1885_v32  ;;  %2574 = vmatprep.mubr.bf16.mxu1 %v4762_v55 }
 0x256   :  { %2671 = vmatprep.mubr.bf16.mxu0 %v1895_v52 }
 0x25c   :  { %2575 = vmatmul.mubr.bf16.gmra.mrb[84].mxu1 %v4839_v43 }
 0x25d   :  { %2672 = vmatmul.mubr.bf16.gmra.mrb[100].mxu0 %v4843_v2  ;;  %2582 = vmatprep.mubr.bf16.mxu1 %v4765_v44 }
 0x25e   :  { %2679 = vmatprep.mubr.bf16.mxu0 %v1904_v47 }
 0x264   :  { %2583 = vmatmul.mubr.bf16.gmra.mrb[88].mxu1 %v4854_v54 }
 0x265   :  { %2680 = vmatmul.mubr.bf16.gmra.mrb[104].mxu0 %v4858_v50  ;;  %2590 = vmatprep.mubr.bf16.mxu1 %v4767_v48  ;;  %v1861_v48 = vpack.c.bf16 %v4801_v23, %v4790_v1  ;;  %v4087_v1 = vld [vmem:[#allocation8 + $0x228] sm:$0xff]  }
 0x266   :  { %2687 = vmatprep.mubr.bf16.mxu0 %v1913_v7 }
 0x26c   :  { %2591 = vmatmul.mubr.bf16.gmra.mrb[92].mxu1 %v4868_v0 }
 0x26d   :  { %2688 = vmatmul.mubr.bf16.gmra.mrb[108].mxu0 %v4872_v51  ;;  %2728 = vmatprep.mubr.bf16.mxu1 %v1852_v9 }
 0x26e   :  { %2825 = vmatprep.mubr.bf16.mxu0 %v4750_v59  ;;  %v1870_v59 = vpack.c.bf16 %v4817_v46, %v4803_v34 }
 0x274   :  { %2729 = vmatmul.mubr.bf16.vlgmr.msra.gmra.mrb[96].mxu1 %v1851_v3  ;;  %v1879_v3 = vpack.c.bf16 %v1790_v24, %v4819_v28 }
 0x275   :  { %2826 = vmatmul.mubr.bf16.vlgmr.msra.gmra.mrb[112].mxu0 %v4792_v57  ;;  %2736 = vmatprep.mubr.bf16.mxu1 %v1861_v48  ;;  %v4089_v57 = vld [vmem:[#allocation8 + $0x238] sm:$0xff]  }
 0x276   :  { %2833 = vmatprep.mubr.bf16.mxu0 %v4754_v27  ;;  %3904 = vmatpush3.bf16.msra.mxu1 %v4082_v42  ;;  %v1822_v27 = vld [vmem:[#allocation2 + $0x91] sm:$0xff] }
 0x277   :  { %3905 = vmatprep.subr.bf16.mxu1 %v4083_v16  ;;  %v1881_v18 = vpack.c.bf16 %v1822_v27, %v4725_v5  ;;  %v1906_v5 = vpack.c.bf16 %v4864_v11, %v4850_v39 }
 0x27a   :  { %3906 = vmatpush3.bf16.msra.mxu1 %v4083_v16 }
 0x27b   :  { %3907 = vmatprep.subr.bf16.mxu1 %v4084_v26 }
 0x27c   :  { %2737 = vmatmul.mubr.bf16.gmra.mrb[100].mxu1 %v1860_v35  ;;  %v1888_v35 = vpack.c.bf16 %v4835_v63, %v4830_v60 }
 0x27d   :  { %2834 = vmatmul.mubr.bf16.gmra.mrb[116].mxu0 %v4807_v20  ;;  %2744 = vmatprep.mubr.bf16.mxu1 %v1870_v59 }
 0x27e   :  { %2841 = vmatprep.mubr.bf16.mxu0 %v4758_v53  ;;  %3908 = vmatpush3.bf16.msra.mxu1 %v4084_v26  ;;  %v1880_v53 = vpack.c.bf16 %v4783_v6, %v4805_v38  ;;  %v1846_v38 = vld [vmem:[#allocation2 + $0x132] sm:$0xff] }
 0x27f   :  { %3909 = vmatprep.subr.bf16.mxu1 %v4085_v33  ;;  %v1918_v20 = vpack.c.bf16 %v1846_v38, %v1798_v4 }
 0x282   :  { %3910 = vmatpush3.bf16.msra.mxu1 %v4085_v33 }
 0x283   :  { %3911 = vmatprep.subr.bf16.mxu1 %v4086_v61 }
 0x284   :  { %2745 = vmatmul.mubr.bf16.gmra.mrb[104].mxu1 %v1869_v29  ;;  %v1829_v29 = vld [vmem:[#allocation2 + $0x121] sm:$0xff] }
 0x285   :  { %2842 = vmatmul.mubr.bf16.gmra.mrb[120].mxu0 %v4821_v62  ;;  %2752 = vmatprep.mubr.bf16.mxu1 %v1879_v3  ;;  %v1914_v45 = vpack.c.bf16 %v1829_v29, %v1828_v58 }
 0x286   :  { %2849 = vmatprep.mubr.bf16.mxu0 %v1881_v18  ;;  %3912 = vmatpush3.bf16.msra.mxu1 %v4086_v61 }
 0x287   :  { %3913 = vmatprep.subr.bf16.mxu1 %v4087_v1 }
 0x28a   :  { %3914 = vmatpush3.bf16.msra.mxu1 %v4087_v1 }
 0x28b   :  { %3915 = vmatprep.subr.bf16.mxu1 %v4088_v19 }
 0x28c   :  { %2753 = vmatmul.mubr.bf16.gmra.mrb[108].mxu1 %v1878_v25  ;;  %v1830_v25 = vld [vmem:[#allocation2 + $0x131] sm:$0xff] }
 0x28d   :  { %2850 = vmatmul.mubr.bf16.gmra.mrb[124].mxu0 %v1880_v53  ;;  %2760 = vmatprep.mubr.bf16.mxu1 %v1888_v35  ;;  %v1917_v23 = vpack.c.bf16 %v1830_v25, %v1829_v29 }
 0x28e   :  { %2857 = vmatprep.mubr.bf16.mxu0 %v4762_v55  ;;  %3916 = vmatpush3.bf16.msra.mxu1 %v4088_v19  ;;  %v1908_v55 = vpack.c.bf16 %v1828_v58, %v1827_v40 }
 0x28f   :  { %3917 = vmatprep.subr.bf16.mxu1 %v4089_v57 }
 0x292   :  { %3918 = vmatpush3.bf16.msra.mxu1 %v4089_v57 }
 0x294   :  { %2761 = vmatmul.mubr.bf16.gmra.mrb[112].mxu1 %v1887_v12  ;;  %v1905_v12 = vpack.c.bf16 %v1827_v40, %v1779_v22 }
 0x295   :  { %2858 = vmatmul.mubr.bf16.gmra.mrb[128].mxu0 %v4839_v43  ;;  %2768 = vmatprep.mubr.bf16.mxu1 %v1897_v31 }
 0x296   :  { %2865 = vmatprep.mubr.bf16.mxu0 %v4765_v44  ;;  %v1915_v44 = vpack.c.bf16 %v1798_v4, %v4866_v37 }
 0x29c   :  { %2769 = vmatmul.mubr.bf16.gmra.mrb[116].mxu1 %v1896_v15  ;;  %v1838_v15 = vld [vmem:[#allocation2 + $0x92] sm:$0xff] }
 0x29d   :  { %2866 = vmatmul.mubr.bf16.gmra.mrb[132].mxu0 %v4854_v54  ;;  %2776 = vmatprep.mubr.bf16.mxu1 %v1906_v5  ;;  %v1882_v34 = vpack.c.bf16 %v1838_v15, %v1790_v24 }
 0x29e   :  { %2873 = vmatprep.mubr.bf16.mxu0 %v1908_v55 }
 0x2a4   :  { %2777 = vmatmul.mubr.bf16.gmra.mrb[120].mxu1 %v1905_v12 }
 0x2a5   :  { %2874 = vmatmul.mubr.bf16.gmra.mrb[136].mxu0 %v4868_v0  ;;  %2784 = vmatprep.mubr.bf16.mxu1 %v1915_v44 }
 0x2a6   :  { %2881 = vmatprep.mubr.bf16.mxu0 %v1917_v23 }
 0x2ac   :  { %2785 = vmatmul.mubr.bf16.gmra.mrb[124].mxu1 %v1914_v45 }
 0x2ad   :  { %2882 = vmatmul.mubr.bf16.gmra.mrb[140].mxu0 %v1916_v8  ;;  %3919 = vmatprep.mubr.bf16.mxu1 %v4796_v10  ;;  %v4933_v10 = vld [vmem:[%s5060_s6] ss:$0 sm:$0xff] }
 0x2b4   :  { %3920 = vmatmul.mubr.bf16.vlgmr.msra.gmra.mrb[128].mxu1 %v4811_v13 }
 0x2b5   :  { %3923 = vmatprep.mubr.bf16.mxu1 %v4825_v41 }
 0x2bc   :  { %3924 = vmatmul.mubr.bf16.gmra.mrb[132].mxu1 %v1882_v34 }
 0x2bd   :  { %3927 = vmatprep.mubr.bf16.mxu1 %v4843_v2 }
 0x2c4   :  { %3928 = vmatmul.mubr.bf16.gmra.mrb[136].mxu1 %v4858_v50 }
 0x2c5   :  { %3931 = vmatprep.mubr.bf16.mxu1 %v4872_v51 }
 0x2cc   :  { %3932 = vmatmul.mubr.bf16.gmra.mrb[140].mxu1 %v1918_v20 }
 0x307   :  { %v3615_v6 = vpop.f32.mrb[64].mxu1 }
 0x308   :  { %v3679_v46 = vpop.f32.mrb[80].mxu0  ;;  %v3616_v13 = vpop.f32.mrb[65].mxu1 }
 0x309   :  { %v3617_v28 = vadd.f32 %v3616_v13, %v3615_v6  ;;  %v3680_v62 = vpop.f32.mrb[81].mxu0  ;;  %v3618_v41 = vpop.f32.mrb[66].mxu1 }
 0x30a   :  { %v3681_v42 = vadd.f32 %v3680_v62, %v3679_v46  ;;  %v3682_v60 = vpop.f32.mrb[82].mxu0  ;;  %v3619_v30 = vpop.f32.mrb[67].mxu1 }
 0x30b   :  { %v2537_v32 = vadd.f32 %v3617_v28, %v4933_v10  ;;  %v3620_v52 = vadd.f32 %v3619_v30, %v3618_v41  ;;  %v3683_v63 = vpop.f32.mrb[83].mxu0 }
 0x30c   :  { %v3684_v36 = vadd.f32 %v3683_v63, %v3682_v60 }
 0x30d   :  { %v4936_v14 = vadd.f32 %v3681_v42, %v2537_v32  ;;  %v2540_v21 = vadd.f32 %v3620_v52, %v4933_v10 }
 0x30f   :  { %v4939_v43 = vadd.f32 %v3684_v36, %v2540_v21  ;;  %v3621_v2 = vpop.f32.mrb[68].mxu1 }
 0x310   :  { %v3685_v47 = vpop.f32.mrb[84].mxu0  ;;  %v3622_v56 = vpop.f32.mrb[69].mxu1 }
 0x311   :  { %v3623_v39 = vadd.f32 %v3622_v56, %v3621_v2  ;;  %v3686_v49 = vpop.f32.mrb[85].mxu0  ;;  %v3624_v17 = vpop.f32.mrb[70].mxu1 }
 0x312   :  { %v3687_v54 = vadd.f32 %v3686_v49, %v3685_v47  ;;  %v3688_v50 = vpop.f32.mrb[86].mxu0  ;;  %v3625_v7 = vpop.f32.mrb[71].mxu1 }
 0x313   :  { %v2545_v11 = vadd.f32 %v3623_v39, %v4933_v10  ;;  %v3626_v37 = vadd.f32 %v3625_v7, %v3624_v17  ;;  %v3689_v0 = vpop.f32.mrb[87].mxu0 }
 0x314   :  { %v3690_v51 = vadd.f32 %v3689_v0, %v3688_v50 }
 0x315   :  { %v4942_v9 = vadd.f32 %v3687_v54, %v2545_v11  ;;  %v2548_v48 = vadd.f32 %v3626_v37, %v4933_v10 }
 0x317   :  { %v4945_v16 = vadd.f32 %v3690_v51, %v2548_v48  ;;  %v3627_v26 = vpop.f32.mrb[72].mxu1 }
 0x318   :  { %v3691_v59 = vpop.f32.mrb[88].mxu0  ;;  %v3628_v33 = vpop.f32.mrb[73].mxu1 }
 0x319   :  { %v3629_v61 = vadd.f32 %v3628_v33, %v3627_v26  ;;  %v3692_v24 = vpop.f32.mrb[89].mxu0  ;;  %v3630_v27 = vpop.f32.mrb[74].mxu1 }
 0x31a   :  { %v3693_v3 = vadd.f32 %v3692_v24, %v3691_v59  ;;  %v3694_v1 = vpop.f32.mrb[90].mxu0  ;;  %v3631_v18 = vpop.f32.mrb[75].mxu1 }
 0x31b   :  { %v2553_v19 = vadd.f32 %v3629_v61, %v4933_v10  ;;  %v3632_v53 = vadd.f32 %v3631_v18, %v3630_v27  ;;  %v3695_v35 = vpop.f32.mrb[91].mxu0 }
 0x31c   :  { %v3696_v57 = vadd.f32 %v3695_v35, %v3694_v1 }
 0x31d   :  { %v4948_v31 = vadd.f32 %v3693_v3, %v2553_v19  ;;  %v2556_v40 = vadd.f32 %v3632_v53, %v4933_v10 }
 0x31f   :  { %v4951_v58 = vadd.f32 %v3696_v57, %v2556_v40  ;;  %v3633_v5 = vpop.f32.mrb[76].mxu1 }
 0x320   :  { %v3697_v55 = vpop.f32.mrb[92].mxu0  ;;  %v3634_v22 = vpop.f32.mrb[77].mxu1 }
 0x321   :  { %v3635_v4 = vadd.f32 %v3634_v22, %v3633_v5  ;;  %v3698_v29 = vpop.f32.mrb[93].mxu0  ;;  %v3636_v25 = vpop.f32.mrb[78].mxu1 }
 0x322   :  { %v3699_v12 = vadd.f32 %v3698_v29, %v3697_v55  ;;  %v3700_v44 = vpop.f32.mrb[94].mxu0  ;;  %v3637_v23 = vpop.f32.mrb[79].mxu1 }
 0x323   :  { %v2561_v45 = vadd.f32 %v3635_v4, %v4933_v10  ;;  %v3638_v8 = vadd.f32 %v3637_v23, %v3636_v25  ;;  %v3701_v15 = vpop.f32.mrb[95].mxu0 }
 0x324   :  { %v3702_v34 = vadd.f32 %v3701_v15, %v3700_v44 }
 0x325   :  { %v4954_v38 = vadd.f32 %v3699_v12, %v2561_v45  ;;  %v2564_v20 = vadd.f32 %v3638_v8, %v4933_v10 }
 0x327   :  { %v4957_v6 = vadd.f32 %v3702_v34, %v2564_v20  ;;  %v3639_v46 = vpop.f32.mrb[80].mxu1 }
 0x328   :  { %v3703_v13 = vpop.f32.mrb[96].mxu0  ;;  %v3640_v28 = vpop.f32.mrb[81].mxu1 }
 0x329   :  { %v3641_v62 = vadd.f32 %v3640_v28, %v3639_v46  ;;  %v3704_v41 = vpop.f32.mrb[97].mxu0  ;;  %v3642_v42 = vpop.f32.mrb[82].mxu1 }
 0x32a   :  { %v3705_v60 = vadd.f32 %v3704_v41, %v3703_v13  ;;  %v3706_v30 = vpop.f32.mrb[98].mxu0  ;;  %v3643_v32 = vpop.f32.mrb[83].mxu1 }
 0x32b   :  { %v2569_v52 = vadd.f32 %v3641_v62, %v4933_v10  ;;  %v3644_v63 = vadd.f32 %v3643_v32, %v3642_v42  ;;  %v3707_v36 = vpop.f32.mrb[99].mxu0 }
 0x32c   :  { %v3708_v21 = vadd.f32 %v3707_v36, %v3706_v30 }
 0x32d   :  { %v4960_v2 = vadd.f32 %v3705_v60, %v2569_v52  ;;  %v2572_v47 = vadd.f32 %v3644_v63, %v4933_v10 }
 0x32f   :  { %v4963_v56 = vadd.f32 %v3708_v21, %v2572_v47  ;;  %v3645_v39 = vpop.f32.mrb[84].mxu1 }
 0x330   :  { %v3709_v49 = vpop.f32.mrb[100].mxu0  ;;  %v3646_v17 = vpop.f32.mrb[85].mxu1 }
 0x331   :  { %v3647_v54 = vadd.f32 %v3646_v17, %v3645_v39  ;;  %v3710_v50 = vpop.f32.mrb[101].mxu0  ;;  %v3648_v7 = vpop.f32.mrb[86].mxu1 }
 0x332   :  { %v3711_v11 = vadd.f32 %v3710_v50, %v3709_v49  ;;  %v3712_v37 = vpop.f32.mrb[102].mxu0  ;;  %v3649_v0 = vpop.f32.mrb[87].mxu1 }
 0x333   :  { %v2577_v51 = vadd.f32 %v3647_v54, %v4933_v10  ;;  %v3650_v48 = vadd.f32 %v3649_v0, %v3648_v7  ;;  %v3713_v26 = vpop.f32.mrb[103].mxu0 }
 0x334   :  { %v3714_v59 = vadd.f32 %v3713_v26, %v3712_v37 }
 0x335   :  { %v4966_v33 = vadd.f32 %v3711_v11, %v2577_v51  ;;  %v2580_v61 = vadd.f32 %v3650_v48, %v4933_v10 }
 0x337   :  { %v4969_v24 = vadd.f32 %v3714_v59, %v2580_v61  ;;  %v3651_v27 = vpop.f32.mrb[88].mxu1 }
 0x338   :  { %v3715_v3 = vpop.f32.mrb[104].mxu0  ;;  %v3652_v1 = vpop.f32.mrb[89].mxu1 }
 0x339   :  { %v3653_v18 = vadd.f32 %v3652_v1, %v3651_v27  ;;  %v3716_v19 = vpop.f32.mrb[105].mxu0  ;;  %v3654_v53 = vpop.f32.mrb[90].mxu1 }
 0x33a   :  { %v3717_v35 = vadd.f32 %v3716_v19, %v3715_v3  ;;  %v3718_v57 = vpop.f32.mrb[106].mxu0  ;;  %v3655_v40 = vpop.f32.mrb[91].mxu1 }
 0x33b   :  { %v2585_v5 = vadd.f32 %v3653_v18, %v4933_v10  ;;  %v3656_v55 = vadd.f32 %v3655_v40, %v3654_v53  ;;  %v3719_v22 = vpop.f32.mrb[107].mxu0 }
 0x33c   :  { %v3720_v4 = vadd.f32 %v3719_v22, %v3718_v57 }
 0x33d   :  { %v4972_v29 = vadd.f32 %v3717_v35, %v2585_v5  ;;  %v2588_v25 = vadd.f32 %v3656_v55, %v4933_v10 }
 0x33f   :  { %v4975_v12 = vadd.f32 %v3720_v4, %v2588_v25  ;;  %v3657_v44 = vpop.f32.mrb[92].mxu1 }
 0x340   :  { %v3721_v23 = vpop.f32.mrb[108].mxu0  ;;  %v3658_v45 = vpop.f32.mrb[93].mxu1 }
 0x341   :  { %v3659_v8 = vadd.f32 %v3658_v45, %v3657_v44  ;;  %v3722_v15 = vpop.f32.mrb[109].mxu0  ;;  %v3660_v34 = vpop.f32.mrb[94].mxu1 }
 0x342   :  { %v3723_v20 = vadd.f32 %v3722_v15, %v3721_v23  ;;  %v3724_v46 = vpop.f32.mrb[110].mxu0  ;;  %v3661_v13 = vpop.f32.mrb[95].mxu1 }
 0x343   :  { %v2593_v28 = vadd.f32 %v3659_v8, %v4933_v10  ;;  %v3662_v62 = vadd.f32 %v3661_v13, %v3660_v34  ;;  %v3725_v41 = vpop.f32.mrb[111].mxu0 }
 0x344   :  { %v3726_v42 = vadd.f32 %v3725_v41, %v3724_v46 }
 0x345   :  { %v4978_v60 = vadd.f32 %v3723_v20, %v2593_v28  ;;  %v2596_v30 = vadd.f32 %v3662_v62, %v4933_v10 }
 0x347   :  { %v4981_v32 = vadd.f32 %v3726_v42, %v2596_v30  ;;  %v3743_v52 = vpop.f32.mrb[96].mxu1 }
 0x348   :  { %v3807_v63 = vpop.f32.mrb[112].mxu0  ;;  %v3744_v36 = vpop.f32.mrb[97].mxu1 }
 0x349   :  { %v3745_v21 = vadd.f32 %v3744_v36, %v3743_v52  ;;  %v3808_v47 = vpop.f32.mrb[113].mxu0  ;;  %v3746_v39 = vpop.f32.mrb[98].mxu1 }
 0x34a   :  { %v3809_v49 = vadd.f32 %v3808_v47, %v3807_v63  ;;  %v3810_v17 = vpop.f32.mrb[114].mxu0  ;;  %v3747_v54 = vpop.f32.mrb[99].mxu1 }
 0x34b   :  { %v2731_v50 = vadd.f32 %v3745_v21, %v4936_v14  ;;  %v3748_v7 = vadd.f32 %v3747_v54, %v3746_v39  ;;  %v3811_v11 = vpop.f32.mrb[115].mxu0 }
 0x34c   :  { %v3812_v37 = vadd.f32 %v3811_v11, %v3810_v17 }
 0x34d   :  { %v2734_v0 = vadd.f32 %v3748_v7, %v4939_v43  ;;  %v4985_v51 = vadd.f32 %v3809_v49, %v2731_v50 }
 0x34f   :  { %v3749_v10 = vpop.f32.mrb[100].mxu1  ;;  %v4987_v48 = vadd.f32 %v3812_v37, %v2734_v0 }
 0x350   :  { %v3813_v26 = vpop.f32.mrb[116].mxu0  ;;  %v3750_v59 = vpop.f32.mrb[101].mxu1 }
 0x351   :  { %v3751_v61 = vadd.f32 %v3750_v59, %v3749_v10  ;;  %v3814_v27 = vpop.f32.mrb[117].mxu0  ;;  %v3752_v3 = vpop.f32.mrb[102].mxu1 }
 0x352   :  { %v3815_v1 = vadd.f32 %v3814_v27, %v3813_v26  ;;  %v3816_v18 = vpop.f32.mrb[118].mxu0  ;;  %v3753_v19 = vpop.f32.mrb[103].mxu1 }
 0x353   :  { %v2739_v14 = vadd.f32 %v3751_v61, %v4942_v9  ;;  %v3754_v53 = vadd.f32 %v3753_v19, %v3752_v3  ;;  %v3817_v35 = vpop.f32.mrb[119].mxu0 }
 0x354   :  { %v3818_v57 = vadd.f32 %v3817_v35, %v3816_v18 }
 0x355   :  { %v2742_v43 = vadd.f32 %v3754_v53, %v4945_v16  ;;  %v4991_v40 = vadd.f32 %v3815_v1, %v2739_v14 }
 0x357   :  { %v3755_v5 = vpop.f32.mrb[104].mxu1  ;;  %v4993_v55 = vadd.f32 %v3818_v57, %v2742_v43 }
 0x358   :  { %v3819_v22 = vpop.f32.mrb[120].mxu0  ;;  %v3756_v4 = vpop.f32.mrb[105].mxu1 }
 0x359   :  { %v3757_v25 = vadd.f32 %v3756_v4, %v3755_v5  ;;  %v3820_v44 = vpop.f32.mrb[121].mxu0  ;;  %v3758_v23 = vpop.f32.mrb[106].mxu1 }
 0x35a   :  { %v3821_v45 = vadd.f32 %v3820_v44, %v3819_v22  ;;  %v3822_v8 = vpop.f32.mrb[122].mxu0  ;;  %v3759_v15 = vpop.f32.mrb[107].mxu1 }
 0x35b   :  { %v2747_v9 = vadd.f32 %v3757_v25, %v4948_v31  ;;  %v3760_v34 = vadd.f32 %v3759_v15, %v3758_v23  ;;  %v3823_v20 = vpop.f32.mrb[123].mxu0 }
 0x35c   :  { %v3824_v46 = vadd.f32 %v3823_v20, %v3822_v8 }
 0x35d   :  { %v2750_v16 = vadd.f32 %v3760_v34, %v4951_v58  ;;  %v4997_v13 = vadd.f32 %v3821_v45, %v2747_v9 }
 0x35f   :  { %v3761_v28 = vpop.f32.mrb[108].mxu1  ;;  %v4999_v62 = vadd.f32 %v3824_v46, %v2750_v16 }
 0x360   :  { %v3825_v41 = vpop.f32.mrb[124].mxu0  ;;  %v3762_v42 = vpop.f32.mrb[109].mxu1 }
 0x361   :  { %v3763_v30 = vadd.f32 %v3762_v42, %v3761_v28  ;;  %v3826_v52 = vpop.f32.mrb[125].mxu0  ;;  %v3764_v63 = vpop.f32.mrb[110].mxu1 }
 0x362   :  { %v3827_v36 = vadd.f32 %v3826_v52, %v3825_v41  ;;  %v3828_v21 = vpop.f32.mrb[126].mxu0  ;;  %v3765_v47 = vpop.f32.mrb[111].mxu1 }
 0x363   :  { %v2755_v31 = vadd.f32 %v3763_v30, %v4954_v38  ;;  %v3766_v39 = vadd.f32 %v3765_v47, %v3764_v63  ;;  %v3829_v49 = vpop.f32.mrb[127].mxu0 }
 0x364   :  { %v3830_v17 = vadd.f32 %v3829_v49, %v3828_v21 }
 0x365   :  { %v2758_v58 = vadd.f32 %v3766_v39, %v4957_v6  ;;  %v5003_v54 = vadd.f32 %v3827_v36, %v2755_v31 }
 0x367   :  { %v3767_v50 = vpop.f32.mrb[112].mxu1  ;;  %v5005_v7 = vadd.f32 %v3830_v17, %v2758_v58 }
 0x368   :  { %v3831_v11 = vpop.f32.mrb[128].mxu0  ;;  %v3768_v37 = vpop.f32.mrb[113].mxu1 }
 0x369   :  { %v3769_v0 = vadd.f32 %v3768_v37, %v3767_v50  ;;  %v3832_v10 = vpop.f32.mrb[129].mxu0  ;;  %v3770_v26 = vpop.f32.mrb[114].mxu1 }
 0x36a   :  { %v3833_v59 = vadd.f32 %v3832_v10, %v3831_v11  ;;  %v3834_v61 = vpop.f32.mrb[130].mxu0  ;;  %v3771_v27 = vpop.f32.mrb[115].mxu1 }
 0x36b   :  { %v2763_v38 = vadd.f32 %v3769_v0, %v4960_v2  ;;  %v3772_v3 = vadd.f32 %v3771_v27, %v3770_v26  ;;  %v3835_v1 = vpop.f32.mrb[131].mxu0 }
 0x36c   :  { %v3836_v18 = vadd.f32 %v3835_v1, %v3834_v61 }
 0x36d   :  { %v2766_v6 = vadd.f32 %v3772_v3, %v4963_v56  ;;  %v5009_v19 = vadd.f32 %v3833_v59, %v2763_v38 }
 0x36f   :  { %v3773_v14 = vpop.f32.mrb[116].mxu1  ;;  %v5011_v53 = vadd.f32 %v3836_v18, %v2766_v6 }
 0x370   :  { %v3837_v35 = vpop.f32.mrb[132].mxu0  ;;  %v3774_v57 = vpop.f32.mrb[117].mxu1 }
 0x371   :  { %v3775_v43 = vadd.f32 %v3774_v57, %v3773_v14  ;;  %v3838_v5 = vpop.f32.mrb[133].mxu0  ;;  %v3776_v22 = vpop.f32.mrb[118].mxu1 }
 0x372   :  { %v3839_v4 = vadd.f32 %v3838_v5, %v3837_v35  ;;  %v3840_v25 = vpop.f32.mrb[134].mxu0  ;;  %v3777_v44 = vpop.f32.mrb[119].mxu1 }
 0x373   :  { %v2771_v2 = vadd.f32 %v3775_v43, %v4966_v33  ;;  %v3778_v23 = vadd.f32 %v3777_v44, %v3776_v22  ;;  %v3841_v45 = vpop.f32.mrb[135].mxu0 }
 0x374   :  { %v3842_v8 = vadd.f32 %v3841_v45, %v3840_v25 }
 0x375   :  { %v2774_v56 = vadd.f32 %v3778_v23, %v4969_v24  ;;  %v2868_v15 = vadd.f32 %v3839_v4, %v2771_v2 }
 0x377   :  { %v3779_v9 = vpop.f32.mrb[120].mxu1  ;;  %v2871_v34 = vadd.f32 %v3842_v8, %v2774_v56 }
 0x378   :  { %v3843_v20 = vpop.f32.mrb[136].mxu0  ;;  %v3780_v46 = vpop.f32.mrb[121].mxu1 }
 0x379   :  { %v3781_v16 = vadd.f32 %v3780_v46, %v3779_v9  ;;  %v3844_v28 = vpop.f32.mrb[137].mxu0  ;;  %v3782_v41 = vpop.f32.mrb[122].mxu1 }
 0x37a   :  { %v3845_v42 = vadd.f32 %v3844_v28, %v3843_v20  ;;  %v3846_v30 = vpop.f32.mrb[138].mxu0  ;;  %v3783_v52 = vpop.f32.mrb[123].mxu1 }
 0x37b   :  { %v2779_v63 = vadd.f32 %v3781_v16, %v4972_v29  ;;  %v3784_v36 = vadd.f32 %v3783_v52, %v3782_v41  ;;  %v3847_v33 = vpop.f32.mrb[139].mxu0 }
 0x37c   :  { %v3848_v21 = vadd.f32 %v3847_v33, %v3846_v30 }
 0x37d   :  { %v2782_v47 = vadd.f32 %v3784_v36, %v4975_v12  ;;  %v2876_v31 = vadd.f32 %v3845_v42, %v2779_v63 }
 0x37f   :  { %v3785_v24 = vpop.f32.mrb[124].mxu1  ;;  %v2879_v39 = vadd.f32 %v3848_v21, %v2782_v47 }
 0x380   :  { %v3849_v49 = vpop.f32.mrb[140].mxu0  ;;  %v3786_v17 = vpop.f32.mrb[125].mxu1 }
 0x381   :  { %v3787_v58 = vadd.f32 %v3786_v17, %v3785_v24  ;;  %v3850_v50 = vpop.f32.mrb[141].mxu0  ;;  %v3788_v11 = vpop.f32.mrb[126].mxu1 }
 0x382   :  { %v3851_v37 = vadd.f32 %v3850_v50, %v3849_v49  ;;  %v3852_v0 = vpop.f32.mrb[142].mxu0  ;;  %v3789_v10 = vpop.f32.mrb[127].mxu1 }
 0x383   :  { %v2787_v26 = vadd.f32 %v3787_v58, %v4978_v60  ;;  %v3790_v59 = vadd.f32 %v3789_v10, %v3788_v11  ;;  %v3853_v29 = vpop.f32.mrb[143].mxu0 }
 0x384   :  { %v3854_v61 = vadd.f32 %v3853_v29, %v3852_v0 }
 0x385   :  { %v2790_v27 = vadd.f32 %v3790_v59, %v4981_v32  ;;  %v2884_v38 = vadd.f32 %v3851_v37, %v2787_v26 }
 0x387   :  { %v3921_v12 = vpop.f32.mrb[128].mxu1  ;;  %v2887_v3 = vadd.f32 %v3854_v61, %v2790_v27 }
 0x388   :  { %v2933_v1 = vadd.f32 %v3921_v12, %v4991_v40  ;;  %v2924_v18 = vpop.f32.mrb[129].mxu1 }
 0x389   :  { %v2925_v6 = vadd.f32 %v2924_v18, %v4985_v51  ;;  %v3922_v14 = vpop.f32.mrb[130].mxu1 }
 0x38a   :  { %v2936_v35 = vadd.f32 %v3922_v14, %v4993_v55  ;;  %v2927_v57 = vpop.f32.mrb[131].mxu1 }
 0x38b   :  { %v2928_v43 = vadd.f32 %v2927_v57, %v4987_v48 }
 0x38d   :  { %v2987_v60 = vadd.f32 %v2928_v43, %v2925_v6 }
 0x38f   :  { %v2988_v5 = vadd.f32 %v2987_v60, %v2933_v1  ;;  %v3925_v22 = vpop.f32.mrb[132].mxu1 }
 0x390   :  { %v2949_v4 = vadd.f32 %v3925_v22, %v5003_v54  ;;  %v2940_v32 = vpop.f32.mrb[133].mxu1 }
 0x391   :  { %v2941_v25 = vadd.f32 %v2940_v32, %v4997_v13  ;;  %v2989_v44 = vadd.f32 %v2988_v5, %v2936_v35  ;;  %v3926_v2 = vpop.f32.mrb[134].mxu1 }
 0x392   :  { %v2952_v40 = vadd.f32 %v3926_v2, %v5005_v7  ;;  %v2943_v23 = vpop.f32.mrb[135].mxu1 }
 0x393   :  { %v2990_v51 = vadd.f32 %v2989_v44, %v2941_v25  ;;  %v2944_v45 = vadd.f32 %v2943_v23, %v4999_v62 }
 0x395   :  { %v2991_v55 = vadd.f32 %v2990_v51, %v2944_v45 }
 0x397   :  { %v2992_v8 = vadd.f32 %v2991_v55, %v2949_v4  ;;  %v3929_v56 = vpop.f32.mrb[136].mxu1 }
 0x398   :  { %v2965_v48 = vadd.f32 %v3929_v56, %v2868_v15  ;;  %v2956_v9 = vpop.f32.mrb[137].mxu1 }
 0x399   :  { %v2957_v20 = vadd.f32 %v2956_v9, %v5009_v19  ;;  %v2993_v46 = vadd.f32 %v2992_v8, %v2952_v40  ;;  %v3930_v54 = vpop.f32.mrb[138].mxu1 }
 0x39a   :  { %v2968_v16 = vadd.f32 %v3930_v54, %v2871_v34  ;;  %v2959_v28 = vpop.f32.mrb[139].mxu1 }
 0x39b   :  { %v2994_v13 = vadd.f32 %v2993_v46, %v2957_v20  ;;  %v2960_v41 = vadd.f32 %v2959_v28, %v5011_v53 }
 0x39d   :  { %v2995_v42 = vadd.f32 %v2994_v13, %v2960_v41 }
 0x39f   :  { %v2996_v7 = vadd.f32 %v2995_v42, %v2965_v48  ;;  %v3933_v30 = vpop.f32.mrb[140].mxu1 }
 0x3a0   :  { %v2981_v52 = vadd.f32 %v3933_v30, %v2884_v38  ;;  %v2972_v63 = vpop.f32.mrb[141].mxu1 }
 0x3a1   :  { %v2973_v62 = vadd.f32 %v2972_v63, %v2876_v31  ;;  %v2997_v36 = vadd.f32 %v2996_v7, %v2968_v16  ;;  %v3934_v33 = vpop.f32.mrb[142].mxu1 }
 0x3a2   :  { %v2984_v21 = vadd.f32 %v3934_v33, %v2887_v3  ;;  %v2975_v15 = vpop.f32.mrb[143].mxu1 }
 0x3a3   :  { %v2998_v47 = vadd.f32 %v2997_v36, %v2973_v62  ;;  %v2976_v24 = vadd.f32 %v2975_v15, %v2879_v39 }
 0x3a5   :  { %v2999_v19 = vadd.f32 %v2998_v47, %v2976_v24 }
 0x3a7   :  { %v3000_v49 = vadd.f32 %v2999_v19, %v2981_v52 }
 0x3a9   :  { %v3001_v17 = vadd.f32 %v3000_v49, %v2984_v21 }
 0x3ab   :  { %v3002_v34 = vrot.slane %v3001_v17, 4 }
 0x3ad   :  { %v3003_v58 = vadd.f32 %v3002_v34, %v3001_v17 }
 0x3af   :  { %v3004_v50 = vrot.slane %v3003_v58, 2 }
 0x3b1   :  { %v3005_v11 = vadd.f32 %v3004_v50, %v3003_v58 }
 0x3b3   :  { %v3006_v53 = vrot.slane %v3005_v11, 1 }
 0x3b5   :  { %v3007_v37 = vadd.f32 %v3006_v53, %v3005_v11 }
 0x3b7   :  { %v3008_v0 = vmul.f32 0.0078125, %v3007_v37 }
 0x3b9   :  { %v3009_v10 = vsub.f32 %v2925_v6, %v3008_v0  ;;  %v3010_v26 = vsub.f32 %v2928_v43, %v3008_v0  ;;  %v3011_v59 = vsub.f32 %v2933_v1, %v3008_v0  ;;  %v3012_v31 = vsub.f32 %v2936_v35, %v3008_v0 }
 0x3ba   :  { %v3013_v29 = vsub.f32 %v2941_v25, %v3008_v0  ;;  %v3014_v61 = vsub.f32 %v2944_v45, %v3008_v0  ;;  %v3015_v27 = vsub.f32 %v2949_v4, %v3008_v0  ;;  %v3016_v38 = vsub.f32 %v2952_v40, %v3008_v0 }
 0x3bb   :  { %v3017_v12 = vsub.f32 %v2957_v20, %v3008_v0  ;;  %v3018_v39 = vsub.f32 %v2960_v41, %v3008_v0  ;;  %v3019_v3 = vsub.f32 %v2965_v48, %v3008_v0  ;;  %v3020_v18 = vsub.f32 %v2968_v16, %v3008_v0 }
 0x3bc   :  { %v3021_v14 = vsub.f32 %v2973_v62, %v3008_v0  ;;  %v3022_v57 = vsub.f32 %v2976_v24, %v3008_v0  ;;  %v3023_v60 = vsub.f32 %v2981_v52, %v3008_v0  ;;  %v3024_v5 = vsub.f32 %v2984_v21, %v3008_v0 }
 0x3bd   :  { %v3025_v22 = vmul.f32 %v3009_v10, %v3009_v10  ;;  %v3026_v32 = vmul.f32 %v3010_v26, %v3010_v26  ;;  %v3027_v44 = vmul.f32 %v3011_v59, %v3011_v59  ;;  %v3028_v6 = vmul.f32 %v3012_v31, %v3012_v31 }
 0x3be   :  { %v3029_v1 = vmul.f32 %v3013_v29, %v3013_v29  ;;  %v3030_v25 = vmul.f32 %v3014_v61, %v3014_v61  ;;  %v3031_v4 = vmul.f32 %v3015_v27, %v3015_v27  ;;  %v3032_v51 = vmul.f32 %v3016_v38, %v3016_v38 }
 0x3bf   :  { %v3041_v2 = vadd.f32 %v3026_v32, %v3025_v22  ;;  %v3033_v55 = vmul.f32 %v3017_v12, %v3017_v12  ;;  %v3034_v56 = vmul.f32 %v3018_v39, %v3018_v39  ;;  %v3035_v9 = vmul.f32 %v3019_v3, %v3019_v3  ;;  %v3325_v22 = vld [vmem:[%s5061_s7] ss:$0 sm:$0xff]  ;;  %s4198_s7 = smov [#allocation9]  }
 0x3c0   :  { %v3036_v46 = vmul.f32 %v3020_v18, %v3020_v18  ;;  %v3037_v16 = vmul.f32 %v3021_v14, %v3021_v14  ;;  %v3038_v13 = vmul.f32 %v3022_v57, %v3022_v57  ;;  %v3039_v42 = vmul.f32 %v3023_v60, %v3023_v60 }
 0x3c1   :  { %v3042_v43 = vadd.f32 %v3041_v2, %v3027_v44  ;;  %v3040_v30 = vmul.f32 %v3024_v5, %v3024_v5 }
 0x3c3   :  { %v3043_v35 = vadd.f32 %v3042_v43, %v3028_v6 }
 0x3c5   :  { %v3044_v23 = vadd.f32 %v3043_v35, %v3029_v1 }
 0x3c7   :  { %v3045_v40 = vadd.f32 %v3044_v23, %v3030_v25  ;;  %v3326_v23 = vld [vmem:[%s5062_s8] ss:$0 sm:$0xff]  ;;  %s3164_s8 = sshll.u32 %s4198_s7, 4  ;;  %s5035_s8 = int_to_ptr.vmem [resolvable:$true] %s3164_s8 }
 0x3c8   :  { %s4162_s1 = scalar_lea.vmem %s5035_s8, 2048  ;;  %p4167_p11 = scmp.lt.s32.totalorder %s5035_s8, %s5035_s8 }
 0x3c9   :  { %v3046_v45 = vadd.f32 %v3045_v40, %v3031_v4  ;;  %p4163_p10 = scmp.ne.s32.totalorder %s5035_s8, %s4162_s1  ;;  %p4168_p12 = scmp.lt.s32.totalorder %s4162_s1, %s4162_s1 }
 0x3cb   :  { %v3047_v8 = vadd.f32 %v3046_v45, %v3032_v51  ;;  %p4169_p13 = por %p4168_p12, %p4167_p11 }
 0x3cd   :  { %v3048_v48 = vadd.f32 %v3047_v8, %v3033_v55  ;;  %p4170_p0 = pnand %p4169_p13, %p4163_p10 }
 0x3cf   :  { %v3049_v20 = vadd.f32 %v3048_v48, %v3034_v56 }
 0x3d1   :  { %v3050_v54 = vadd.f32 %v3049_v20, %v3035_v9 }
 0x3d3   :  { %v3051_v28 = vadd.f32 %v3050_v54, %v3036_v46 }
 0x3d5   :  { %v3052_v41 = vadd.f32 %v3051_v28, %v3037_v16 }
 0x3d7   :  { %v3053_v7 = vadd.f32 %v3052_v41, %v3038_v13 }
 0x3d9   :  { %v3054_v52 = vadd.f32 %v3053_v7, %v3039_v42 }
 0x3db   :  { %v3055_v63 = vadd.f32 %v3054_v52, %v3040_v30 }
 0x3dd   :  { %v3056_v62 = vrot.slane %v3055_v63, 4 }
 0x3df   :  { %v3057_v36 = vadd.f32 %v3056_v62, %v3055_v63 }
 0x3e1   :  { %v3058_v33 = vrot.slane %v3057_v36, 2 }
 0x3e3   :  { %v3059_v21 = vadd.f32 %v3058_v33, %v3057_v36 }
 0x3e5   :  { %v3060_v15 = vrot.slane %v3059_v21, 1 }
 0x3e7   :  { %v3061_v47 = vadd.f32 %v3060_v15, %v3059_v21 }
 0x3e9   :  { %v3062_v24 = vmul.f32 0.0078125, %v3061_v47 }
 0x3eb   :  { %v3063_v19 = vadd.f32 1e-05, %v3062_v24 }
 0x3ed   :  { %4092 = vrsqrt.f32 %v3063_v19 }
 0x3f7   :  { %v4093_v49 = vpop.eup %4092 }
 0x3f8   :  { %v3065_v17 = vmul.f32 %v4093_v49, %v3009_v10  ;;  %v3066_v34 = vmul.f32 %v4093_v49, %v3010_v26  ;;  %v3067_v58 = vmul.f32 %v4093_v49, %v3011_v59  ;;  %v3068_v50 = vmul.f32 %v4093_v49, %v3012_v31 }
 0x3f9   :  { %v3069_v11 = vmul.f32 %v4093_v49, %v3013_v29  ;;  %v3070_v53 = vmul.f32 %v4093_v49, %v3014_v61  ;;  %v3071_v37 = vmul.f32 %v4093_v49, %v3015_v27  ;;  %v3072_v0 = vmul.f32 %v4093_v49, %v3016_v38 }
 0x3fa   :  { %v3073_v32 = vmul.f32 %v4093_v49, %v3017_v12  ;;  %v3074_v44 = vmul.f32 %v4093_v49, %v3018_v39  ;;  %v3075_v2 = vmul.f32 %v4093_v49, %v3019_v3  ;;  %v3076_v6 = vmul.f32 %v4093_v49, %v3020_v18 }
 0x3fb   :  { %v3077_v43 = vmul.f32 %v4093_v49, %v3021_v14  ;;  %v3078_v1 = vmul.f32 %v4093_v49, %v3022_v57  ;;  %v3079_v35 = vmul.f32 %v4093_v49, %v3023_v60  ;;  %v3080_v25 = vmul.f32 %v4093_v49, %v3024_v5 }
 0x3fc   :  { %v3088_v10 = vmul.f32 %v3325_v22, %v3065_v17  ;;  %v3089_v26 = vmul.f32 %v3325_v22, %v3066_v34  ;;  %v3090_v59 = vmul.f32 %v3325_v22, %v3067_v58  ;;  %v3091_v31 = vmul.f32 %v3325_v22, %v3068_v50 }
 0x3fd   :  { %v3092_v29 = vmul.f32 %v3325_v22, %v3069_v11  ;;  %v3093_v61 = vmul.f32 %v3325_v22, %v3070_v53  ;;  %v3094_v27 = vmul.f32 %v3325_v22, %v3071_v37  ;;  %v3095_v38 = vmul.f32 %v3325_v22, %v3072_v0 }
 0x3fe   :  { %v3096_v12 = vmul.f32 %v3325_v22, %v3073_v32  ;;  %v3097_v39 = vmul.f32 %v3325_v22, %v3074_v44  ;;  %v3098_v3 = vmul.f32 %v3325_v22, %v3075_v2  ;;  %v3099_v18 = vmul.f32 %v3325_v22, %v3076_v6 }
 0x3ff   :  { %v3100_v14 = vmul.f32 %v3325_v22, %v3077_v43  ;;  %v3101_v57 = vmul.f32 %v3325_v22, %v3078_v1  ;;  %v3102_v60 = vmul.f32 %v3325_v22, %v3079_v35  ;;  %v3103_v5 = vmul.f32 %v3325_v22, %v3080_v25 }
 0x400   :  { %v3111_v4 = vadd.f32 %v3326_v23, %v3088_v10  ;;  %v3112_v40 = vadd.f32 %v3326_v23, %v3089_v26  ;;  %v3113_v51 = vadd.f32 %v3326_v23, %v3090_v59  ;;  %v3114_v45 = vadd.f32 %v3326_v23, %v3091_v31 }
 0x401   :  { %v3115_v55 = vadd.f32 %v3326_v23, %v3092_v29  ;;  %v3116_v8 = vadd.f32 %v3326_v23, %v3093_v61  ;;  %v3117_v56 = vadd.f32 %v3326_v23, %v3094_v27  ;;  %v3118_v48 = vadd.f32 %v3326_v23, %v3095_v38 }
 0x402   :  { %v3119_v9 = vadd.f32 %v3326_v23, %v3096_v12  ;;  %v3120_v20 = vadd.f32 %v3326_v23, %v3097_v39  ;;  %v3121_v46 = vadd.f32 %v3326_v23, %v3098_v3  ;;  %v3122_v54 = vadd.f32 %v3326_v23, %v3099_v18 }
 0x403   :  { %v3123_v16 = vadd.f32 %v3326_v23, %v3100_v14  ;;  %v3124_v28 = vadd.f32 %v3326_v23, %v3101_v57  ;;  %v3125_v13 = vadd.f32 %v3326_v23, %v3102_v60  ;;  %v3126_v41 = vadd.f32 %v3326_v23, %v3103_v5 }
 0x404   :  { %v3127_v42 = vmax.f32 %v3111_v4, 0.0  ;;  %v3128_v7 = vmax.f32 %v3112_v40, 0.0  ;;  %v3129_v30 = vmax.f32 %v3113_v51, 0.0  ;;  %v3130_v52 = vmax.f32 %v3114_v45, 0.0 }
 0x405   :  { %v3131_v63 = vmax.f32 %v3115_v55, 0.0  ;;  %v3132_v62 = vmax.f32 %v3116_v8, 0.0  ;;  %v3133_v36 = vmax.f32 %v3117_v56, 0.0  ;;  %v3134_v33 = vmax.f32 %v3118_v48, 0.0 }
 0x406   :  { %v3135_v21 = vmax.f32 %v3119_v9, 0.0  ;;  %v3136_v15 = vmax.f32 %v3120_v20, 0.0  ;;  %v3137_v47 = vmax.f32 %v3121_v46, 0.0  ;;  %v3138_v24 = vmax.f32 %v3122_v54, 0.0  ;;  %3143 = vst [vmem:[#allocation9] sm:$0xff] %v3127_v42  ;;  %3144 = vst [vmem:[#allocation9 + $0x8] sm:$0xff] %v3128_v7 }
 0x407   :  { %3145 = vst [vmem:[#allocation9 + $0x10] sm:$0xff] %v3129_v30  ;;  %3146 = vst [vmem:[#allocation9 + $0x18] sm:$0xff] %v3130_v52  ;;  %v3139_v19 = vmax.f32 %v3123_v16, 0.0  ;;  %v3140_v49 = vmax.f32 %v3124_v28, 0.0  ;;  %v3141_v17 = vmax.f32 %v3125_v13, 0.0  ;;  %v3142_v34 = vmax.f32 %v3126_v41, 0.0 }
 0x408   :  { %3147 = vst [vmem:[#allocation9 + $0x20] sm:$0xff] %v3131_v63  ;;  %3148 = vst [vmem:[#allocation9 + $0x28] sm:$0xff] %v3132_v62 }
 0x409   :  { %3149 = vst [vmem:[#allocation9 + $0x30] sm:$0xff] %v3133_v36  ;;  %3150 = vst [vmem:[#allocation9 + $0x38] sm:$0xff] %v3134_v33 }
 0x40a   :  { %3151 = vst [vmem:[#allocation9 + $0x40] sm:$0xff] %v3135_v21  ;;  %3152 = vst [vmem:[#allocation9 + $0x48] sm:$0xff] %v3136_v15 }
 0x40b   :  { %3153 = vst [vmem:[#allocation9 + $0x50] sm:$0xff] %v3137_v47  ;;  %3154 = vst [vmem:[#allocation9 + $0x58] sm:$0xff] %v3138_v24 }
 0x40c   :  { %3155 = vst [vmem:[#allocation9 + $0x60] sm:$0xff] %v3139_v19  ;;  %3156 = vst [vmem:[#allocation9 + $0x68] sm:$0xff] %v3140_v49 }
 0x40d   :  { %3157 = vst [vmem:[#allocation9 + $0x70] sm:$0xff] %v3141_v17  ;;  %3158 = vst [vmem:[#allocation9 + $0x78] sm:$0xff] %v3142_v34 }
 0x40e   :  { %4173 = shalt.err (!%p4170_p0)
}
 0x40f   :  { %s4174_s14 = scalar_lea.hbm %s5063_s9, 2048 }
 0x410   :  { %p4175_p1 = scmp.ne.s32.totalorder %s5063_s9, %s4174_s14  ;;  %p4178_p2 = scmp.lt.u32.totalorder %s4174_s14, %s5063_s9 }
 0x412   :  { %p4180_p3 = pnand %p4178_p2, %p4175_p1 }
 0x414   :  { %4183 = shalt.err (!%p4180_p3)
}
 0x415   :  { %s4199_s21 = smov 128   ;;  %s4200_s22 = smov 8  }
 0x416   :  { %3170 = dma.vmem_to_hbm [thread:$0]  %s5035_s8, 2048, %s5063_s9, [#allocation5], %s4199_s21, %s4199_s21, %s4200_s22  }
 0x417   :  { %4188 = dma.done.wait [#allocation5], 2048  }
 0x418   :  { %4189 = vsyncadd [#allocation5], 4294965248 }
 0x419   :  { %3174 = vsyncpa [#allocation4], 1 }
 0x41a   :  { %3175 = vsyncpa [#allocation7], 1 }
 0x41b   :  { %3176 = vsyncpa [#allocation5], 1 }

</bundles_post_ra>
